<compile_context>
chip_gen: v7x
topology: tpu7x:2x2x1
jax: 0.10.0
libtpu: 0.0.40
codegen_flags: <defaults>
</compile_context>

<pallas_src>
import functools

import jax
import jax.numpy as jnp
from jax.experimental import pallas as pl
from jax.experimental.pallas import tpu as pltpu

BN_EPS = 1e-5
MID_CH = 256                      # Conv2d / BatchNorm2d channel count fixed by the module
LANE = 128
VMEM_LIMIT = 32 * 1024 * 1024     # safe on v5e/v6e (128 MiB) and v7x (64 MiB physical)
TILE_BUDGET = 20 * 1024 * 1024    # keep resident buffers well under the scoped limit


# --------------------------------------------------------------------------------------
# shared in-kernel helpers
# --------------------------------------------------------------------------------------
def _conv1x1_T(xr, w, c_in):
    """y = W @ xr in the transposed (channel-major) orientation.

    xr: (c_in, T) ReLU'd (and boundary-masked) activations.
    w : (256, c_in) 1x1-conv weight (optionally pre-scaled by the folded BN factor).
    Returns (256, T) float32.
    """
    if c_in <= 8:
        # Broadcast FMAs on the VPU: (256,1) * (1,T) per input channel.
        y = w[:, 0:1] * xr[0:1, :]
        for c in range(1, c_in):
            y = y + w[:, c:c + 1] * xr[c:c + 1, :]
        return y
    # MXU path, f32-faithful (multi-pass bf16) to match the f32 PyTorch reference.
    return jax.lax.dot_general(
        w, xr, dimension_numbers=(((1,), (0,)), ((), ())),
        precision=jax.lax.Precision.HIGHEST,
        preferred_element_type=jnp.float32)


def _lane_group_sum(v, tile, pw):
    """Fold (256, tile) down to (256, pw) with pure vreg adds (no cross-lane XLU)."""
    part = v[:, 0:pw]
    for j in range(1, tile // pw):
        part = part + v[:, j * pw:(j + 1) * pw]
    return part


# --------------------------------------------------------------------------------------
# pass 1: per-chunk partial BN statistics of y = conv(relu(x))
# --------------------------------------------------------------------------------------
def _stats_kernel(x_ref, wconv_ref, part_ref, *, c_in, hw, tile, pw,
                  tiles_per_sample, tiles_per_chunk):
    tj = pl.program_id(1)

    @pl.when(tj == 0)
    def _():
        part_ref[...] = jnp.zeros_like(part_ref)

    x = x_ref[0]                                              # (c_in, T)
    if hw % tile != 0:
        # Mask out-of-range spatial columns of the (partial) last tile of each sample.
        flat = pl.program_id(0) * tiles_per_chunk + tj
        k_in_sample = flat % tiles_per_sample
        tail = hw - (tiles_per_sample - 1) * tile
        valid = jnp.where(k_in_sample == tiles_per_sample - 1, tail, tile)
        col = jax.lax.broadcasted_iota(jnp.int32, (1, tile), 1)
        x = jnp.where(col < valid, x, 0.0)

    xr = jnp.maximum(x, 0.0)
    y = _conv1x1_T(xr, wconv_ref[...], c_in)                  # (256, T)
    y2 = y * y
    part_ref[0, 0] += _lane_group_sum(y, tile, pw)            # (256, pw) lane-dense acc
    part_ref[0, 1] += _lane_group_sum(y2, tile, pw)


# --------------------------------------------------------------------------------------
# pass 2: fold BN in-kernel, apply conv+BN+ReLU, per-sample average pool
# --------------------------------------------------------------------------------------
def _bn_pool_kernel(x_ref, wconv_ref, gamma_ref, beta_ref, stats_ref, pooled_ref,
                    wsc_ref, shift_ref, acc_ref, *, c_in, hw, tile, pw, num_chunks,
                    inv_nhw, inv_hw):
    k = pl.program_id(1)
    n_k = pl.num_programs(1)

    @pl.when(k == 0)
    def _():
        # Reduce the per-chunk partial stats and fold BN into (scaled W, shift column).
        ssum = stats_ref[0, 0]
        ssq = stats_ref[0, 1]
        for c in range(1, num_chunks):
            ssum = ssum + stats_ref[c, 0]
            ssq = ssq + stats_ref[c, 1]
        s1 = jnp.sum(ssum, axis=1, keepdims=True)             # (256, 1)
        s2 = jnp.sum(ssq, axis=1, keepdims=True)              # (256, 1)
        mean = s1 * inv_nhw
        # TODO(synk): E[y^2]-E[y]^2 in f32 can lose precision for very large N*H*W;
        # switch to a centered / Welford-style chunk combine if tighter tolerance needed.
        var = jnp.maximum(s2 * inv_nhw - mean * mean, 0.0)
        scale = gamma_ref[...] * jax.lax.rsqrt(var + BN_EPS)  # (256, 1)
        wsc_ref[...] = wconv_ref[...] * scale                 # BN scale folded into W
        shift_ref[...] = beta_ref[...] - mean * scale         # (256, 1)
        acc_ref[...] = jnp.zeros_like(acc_ref)

    x = x_ref[0]                                              # (c_in, T)
    xr = jnp.maximum(x, 0.0)
    y = _conv1x1_T(xr, wsc_ref[...], c_in)                    # (256, T), already BN-scaled
    z = jnp.maximum(y + shift_ref[...], 0.0)
    if hw % tile != 0:
        tail = hw - (hw // tile) * tile
        valid = jnp.where(k == n_k - 1, tail, tile)
        col = jax.lax.broadcasted_iota(jnp.int32, (1, tile), 1)
        z = jnp.where(col < valid, z, 0.0)
    acc_ref[...] += _lane_group_sum(z, tile, pw)              # (256, pw) pooled partials

    @pl.when(k == n_k - 1)
    def _():
        # Single narrow store per sample: pooled mean as a (256, 1) column.
        pooled_ref[0] = jnp.sum(acc_ref[...], axis=1, keepdims=True) * inv_hw


# --------------------------------------------------------------------------------------
# wrapper
# --------------------------------------------------------------------------------------
def _pick_tile_hw(hw, c_in, *, cap=2048, budget=TILE_BUDGET):
    """Lane-dense spatial tile: multiple of 128, sized against a VMEM budget."""
    if hw <= LANE:
        return hw                                             # full dim, single tile
    t = min(cap, ((hw + LANE - 1) // LANE) * LANE)
    per_col = 8 * c_in + 4 * 4 * MID_CH       # x double-buffer + ~4 f32 (256,T) values
    while t > LANE and t * per_col > budget:
        t -= LANE
    return t


def _largest_divisor_leq(n, cap):
    best = 1
    for d in range(1, min(n, cap) + 1):
        if n % d == 0:
            best = d
    return best


def basic_classify_head(x_nchw, conv_w, bn_gamma, bn_beta, cls_w, cls_b):
    """x_nchw: (N, C_in, H, W) float32.  Returns logits (N, num_classes) float32."""
    n, c_in, h, w = x_nchw.shape
    hw = h * w
    nhw = n * hw

    tile = _pick_tile_hw(hw, c_in)
    pw = LANE if tile >= LANE else tile
    tiles_per_sample = (hw + tile - 1) // tile
    total_tiles = n * tiles_per_sample
    num_chunks = _largest_divisor_leq(total_tiles, 8)         # megacore-parallel chunks
    tiles_per_chunk = total_tiles // num_chunks

    # Layout glue (all free / off the inter-pass critical path):
    x3 = x_nchw.reshape(n, c_in, hw)                          # contiguous merge, no copy
    wconv = conv_w.reshape(MID_CH, c_in).astype(jnp.float32)  # (256, C_in)
    gamma_c = bn_gamma.reshape(MID_CH, 1).astype(jnp.float32)
    beta_c = bn_beta.reshape(MID_CH, 1).astype(jnp.float32)

    if tiles_per_sample == 1:
        def x_map1(ci, tj):
            return (ci * tiles_per_chunk + tj, 0, 0)
    else:
        def x_map1(ci, tj):
            flat = ci * tiles_per_chunk + tj
            return (flat // tiles_per_sample, 0, flat % tiles_per_sample)

    # ---- Pass 1: per-chunk partial sum / sum-of-squares of y = conv(relu(x)).
    stats_parts = pl.pallas_call(
        functools.partial(_stats_kernel, c_in=c_in, hw=hw, tile=tile, pw=pw,
                          tiles_per_sample=tiles_per_sample,
                          tiles_per_chunk=tiles_per_chunk),
        out_shape=jax.ShapeDtypeStruct((num_chunks, 2, MID_CH, pw), jnp.float32),
        grid_spec=pltpu.PrefetchScalarGridSpec(
            num_scalar_prefetch=0,
            grid=(num_chunks, tiles_per_chunk),
            in_specs=[
                pl.BlockSpec((1, c_in, tile), x_map1),
                pl.BlockSpec((MID_CH, c_in), lambda ci, tj: (0, 0)),
            ],
            out_specs=pl.BlockSpec((1, 2, MID_CH, pw), lambda ci, tj: (ci, 0, 0, 0)),
        ),
        compiler_params=pltpu.CompilerParams(
            dimension_semantics=("parallel", "arbitrary"),
            vmem_limit_bytes=VMEM_LIMIT),
    )(x3, wconv)

    # ---- Pass 2: in-kernel BN fold + conv + BN + ReLU + per-sample average pool.
    # TODO(synk): for N==1 on v7x, split tiles_per_sample across cores with per-core
    # partial pooled sums; with the per-sample parallel axis the second core idles.
    pooled = pl.pallas_call(
        functools.partial(_bn_pool_kernel, c_in=c_in, hw=hw, tile=tile, pw=pw,
                          num_chunks=num_chunks,
                          inv_nhw=1.0 / nhw, inv_hw=1.0 / hw),
        out_shape=jax.ShapeDtypeStruct((n, MID_CH, 1), jnp.float32),
        grid_spec=pltpu.PrefetchScalarGridSpec(
            num_scalar_prefetch=0,
            grid=(n, tiles_per_sample),
            in_specs=[
                pl.BlockSpec((1, c_in, tile), lambda b, k: (b, 0, k)),
                pl.BlockSpec((MID_CH, c_in), lambda b, k: (0, 0)),
                pl.BlockSpec((MID_CH, 1), lambda b, k: (0, 0)),
                pl.BlockSpec((MID_CH, 1), lambda b, k: (0, 0)),
                pl.BlockSpec((num_chunks, 2, MID_CH, pw), lambda b, k: (0, 0, 0, 0)),
            ],
            out_specs=pl.BlockSpec((1, MID_CH, 1), lambda b, k: (b, 0, 0)),
            scratch_shapes=[
                pltpu.VMEM((MID_CH, c_in), jnp.float32),   # BN-scaled conv weight
                pltpu.VMEM((MID_CH, 1), jnp.float32),      # BN shift column
                pltpu.VMEM((MID_CH, pw), jnp.float32),     # pooled partial sums
            ],
        ),
        compiler_params=pltpu.CompilerParams(
            dimension_semantics=("parallel", "arbitrary"),
            vmem_limit_bytes=VMEM_LIMIT),
    )(x3, wconv, gamma_c, beta_c, stats_parts)

    # Classifier: one batched lane-dense matmul over all samples (outside the kernels).
    pooled2 = pooled[:, :, 0]                                 # (N, 256)
    return jnp.dot(pooled2, cls_w.T.astype(jnp.float32),
                   precision=jax.lax.Precision.HIGHEST) + cls_b.astype(jnp.float32)


# --------------------------------------------------------------------------------------
# pure-JAX reference mirroring the PyTorch forward (training-mode BatchNorm)
# --------------------------------------------------------------------------------------
def _reference(x_nchw, conv_w, bn_gamma, bn_beta, cls_w, cls_b):
    n, c_in, h, w = x_nchw.shape
    hp = jax.lax.Precision.HIGHEST
    x = jnp.maximum(x_nchw, 0.0)
    x = jnp.transpose(x, (0, 2, 3, 1)).reshape(n * h * w, c_in)
    y = jnp.dot(x, conv_w.reshape(MID_CH, c_in).T, precision=hp)   # (NHW, 256)
    mean = jnp.mean(y, axis=0, keepdims=True)
    var = jnp.mean((y - mean) ** 2, axis=0, keepdims=True)
    y = (y - mean) / jnp.sqrt(var + BN_EPS) * bn_gamma + bn_beta
    y = jnp.maximum(y, 0.0)
    pooled = jnp.mean(y.reshape(n, h * w, MID_CH), axis=1)         # (N, 256)
    return jnp.dot(pooled, cls_w.T, precision=hp) + cls_b


if __name__ == "__main__":
    key = jax.random.PRNGKey(0)
    k_x, k_conv, k_g, k_b, k_w, k_bias = jax.random.split(key, 6)

    batch, in_channel, H, W = 2, 4, 16, 16
    num_classes = 10

    x = jax.random.normal(k_x, (batch, in_channel, H, W), dtype=jnp.float32)

    # Deterministic synthetic parameters (module __init__ shapes).
    conv_w = jax.random.normal(k_conv, (MID_CH, in_channel, 1, 1), jnp.float32) * 0.1
    bn_gamma = 1.0 + 0.1 * jax.random.normal(k_g, (MID_CH,), jnp.float32)
    bn_beta = 0.1 * jax.random.normal(k_b, (MID_CH,), jnp.float32)
    cls_w = jax.random.normal(k_w, (num_classes, MID_CH), jnp.float32) * 0.05
    cls_b = 0.01 * jax.random.normal(k_bias, (num_classes,), jnp.float32)

    head = jax.jit(basic_classify_head)
    out = jax.block_until_ready(head(x, conv_w, bn_gamma, bn_beta, cls_w, cls_b))

    ref = _reference(x, conv_w, bn_gamma, bn_beta, cls_w, cls_b)
    assert out.shape == (batch, num_classes)
    assert jnp.allclose(out, ref, atol=1e-3, rtol=1e-3), "mismatch vs reference"

    print("KERNEL_OK")
</pallas_src>

<mosaic_0001>
module attributes {stable_mosaic.version = 11 : i64} {
  func.func @_stats_kernel(%arg0: i32, %arg1: i32, %arg2: memref<1x4x256xf32, #tpu.memory_space<vmem>>, %arg3: memref<256x4xf32, #tpu.memory_space<vmem>>, %arg4: memref<1x2x256x128xf32, #tpu.memory_space<vmem>>) attributes {dimension_semantics = [#tpu.dimension_semantics<parallel>, #tpu.dimension_semantics<arbitrary>], iteration_bounds = array<i64: 2, 1>, scalar_prefetch = 0 : i64, scratch_operands = 0 : i64, tpu.core_type = #tpu.core_type<tc>, window_params = [{transform_indices = @transform_0, window_bounds = array<i64: 1, 4, 256>}, {pipeline_mode = #tpu.pipeline_mode<synchronous>, transform_indices = @transform_1, window_bounds = array<i64: 256, 4>}, {transform_indices = @transform_2, window_bounds = array<i64: 1, 2, 256, 128>}]} {
    %c0_i32 = arith.constant 0 : i32
    %0 = arith.cmpi eq, %arg1, %c0_i32 : i32
    %1 = arith.extui %0 : i1 to i32
    %c0_i32_0 = arith.constant 0 : i32
    %2 = arith.cmpi ne, %1, %c0_i32_0 : i32
    scf.if %2 {
      %cst_20 = arith.constant 0.000000e+00 : f32
      %50 = vector.broadcast %cst_20 : f32 to vector<1x2x256x128xf32>
      %c0_21 = arith.constant 0 : index
      %c0_22 = arith.constant 0 : index
      %c0_23 = arith.constant 0 : index
      %c0_24 = arith.constant 0 : index
      %51 = vector.load %arg4[%c0_21, %c0_22, %c0_23, %c0_24] : memref<1x2x256x128xf32, #tpu.memory_space<vmem>>, vector<1x2x256x128xf32>
      tpu.vector_store %arg4[%c0_21, %c0_22, %c0_23, %c0_24], %50 {strides = array<i32>} : memref<1x2x256x128xf32, #tpu.memory_space<vmem>>, vector<1x2x256x128xf32>,
    } else {
    }
    %c0 = arith.constant 0 : index
    %c0_1 = arith.constant 0 : index
    %c0_2 = arith.constant 0 : index
    %3 = vector.load %arg2[%c0, %c0_1, %c0_2] : memref<1x4x256xf32, #tpu.memory_space<vmem>>, vector<1x4x256xf32>
    %4 = vector.shape_cast %3 : vector<1x4x256xf32> to vector<4x256xf32>
    %cst = arith.constant 0.000000e+00 : f32
    %5 = vector.broadcast %cst : f32 to vector<4x256xf32>
    %6 = arith.maximumf %4, %5 : vector<4x256xf32>
    %c0_3 = arith.constant 0 : index
    %c0_4 = arith.constant 0 : index
    %7 = vector.load %arg3[%c0_3, %c0_4] : memref<256x4xf32, #tpu.memory_space<vmem>>, vector<256x4xf32>
    %8 = vector.extract_strided_slice %7 {offsets = [0, 0], sizes = [256, 1], strides = [1, 1]} : vector<256x4xf32> to vector<256x1xf32>
    %9 = vector.extract_strided_slice %6 {offsets = [0, 0], sizes = [1, 256], strides = [1, 1]} : vector<4x256xf32> to vector<1x256xf32>
    %10 = vector.broadcast %8 : vector<256x1xf32> to vector<256x256xf32>
    %11 = vector.broadcast %9 : vector<1x256xf32> to vector<256x256xf32>
    %12 = arith.mulf %10, %11 : vector<256x256xf32>
    %13 = vector.extract_strided_slice %7 {offsets = [0, 1], sizes = [256, 1], strides = [1, 1]} : vector<256x4xf32> to vector<256x1xf32>
    %14 = vector.extract_strided_slice %6 {offsets = [1, 0], sizes = [1, 256], strides = [1, 1]} : vector<4x256xf32> to vector<1x256xf32>
    %15 = vector.broadcast %13 : vector<256x1xf32> to vector<256x256xf32>
    %16 = vector.broadcast %14 : vector<1x256xf32> to vector<256x256xf32>
    %17 = arith.mulf %15, %16 : vector<256x256xf32>
    %18 = arith.addf %12, %17 : vector<256x256xf32>
    %19 = vector.extract_strided_slice %7 {offsets = [0, 2], sizes = [256, 1], strides = [1, 1]} : vector<256x4xf32> to vector<256x1xf32>
    %20 = vector.extract_strided_slice %6 {offsets = [2, 0], sizes = [1, 256], strides = [1, 1]} : vector<4x256xf32> to vector<1x256xf32>
    %21 = vector.broadcast %19 : vector<256x1xf32> to vector<256x256xf32>
    %22 = vector.broadcast %20 : vector<1x256xf32> to vector<256x256xf32>
    %23 = arith.mulf %21, %22 : vector<256x256xf32>
    %24 = arith.addf %18, %23 : vector<256x256xf32>
    %25 = vector.extract_strided_slice %7 {offsets = [0, 3], sizes = [256, 1], strides = [1, 1]} : vector<256x4xf32> to vector<256x1xf32>
    %26 = vector.extract_strided_slice %6 {offsets = [3, 0], sizes = [1, 256], strides = [1, 1]} : vector<4x256xf32> to vector<1x256xf32>
    %27 = vector.broadcast %25 : vector<256x1xf32> to vector<256x256xf32>
    %28 = vector.broadcast %26 : vector<1x256xf32> to vector<256x256xf32>
    %29 = arith.mulf %27, %28 : vector<256x256xf32>
    %30 = arith.addf %24, %29 : vector<256x256xf32>
    %31 = arith.mulf %30, %30 : vector<256x256xf32>
    %c0_5 = arith.constant 0 : index
    %c0_6 = arith.constant 0 : index
    %c0_7 = arith.constant 0 : index
    %c0_8 = arith.constant 0 : index
    %32 = vector.load %arg4[%c0_5, %c0_6, %c0_7, %c0_8] : memref<1x2x256x128xf32, #tpu.memory_space<vmem>>, vector<1x1x256x128xf32>
    %33 = vector.shape_cast %32 : vector<1x1x256x128xf32> to vector<256x128xf32>
    %34 = vector.extract_strided_slice %30 {offsets = [0, 0], sizes = [256, 128], strides = [1, 1]} : vector<256x256xf32> to vector<256x128xf32>
    %35 = vector.extract_strided_slice %30 {offsets = [0, 128], sizes = [256, 128], strides = [1, 1]} : vector<256x256xf32> to vector<256x128xf32>
    %36 = arith.addf %34, %35 : vector<256x128xf32>
    %37 = arith.addf %33, %36 : vector<256x128xf32>
    %c0_9 = arith.constant 0 : index
    %c0_10 = arith.constant 0 : index
    %c0_11 = arith.constant 0 : index
    %c0_12 = arith.constant 0 : index
    %38 = vector.load %arg4[%c0_9, %c0_10, %c0_11, %c0_12] : memref<1x2x256x128xf32, #tpu.memory_space<vmem>>, vector<1x1x256x128xf32>
    %39 = vector.shape_cast %38 : vector<1x1x256x128xf32> to vector<256x128xf32>
    %40 = vector.shape_cast %37 : vector<256x128xf32> to vector<1x1x256x128xf32>
    tpu.vector_store %arg4[%c0_9, %c0_10, %c0_11, %c0_12], %40 {strides = array<i32>} : memref<1x2x256x128xf32, #tpu.memory_space<vmem>>, vector<1x1x256x128xf32>,
    %c0_13 = arith.constant 0 : index
    %c1 = arith.constant 1 : index
    %c0_14 = arith.constant 0 : index
    %c0_15 = arith.constant 0 : index
    %41 = vector.load %arg4[%c0_13, %c1, %c0_14, %c0_15] : memref<1x2x256x128xf32, #tpu.memory_space<vmem>>, vector<1x1x256x128xf32>
    %42 = vector.shape_cast %41 : vector<1x1x256x128xf32> to vector<256x128xf32>
    %43 = vector.extract_strided_slice %31 {offsets = [0, 0], sizes = [256, 128], strides = [1, 1]} : vector<256x256xf32> to vector<256x128xf32>
    %44 = vector.extract_strided_slice %31 {offsets = [0, 128], sizes = [256, 128], strides = [1, 1]} : vector<256x256xf32> to vector<256x128xf32>
    %45 = arith.addf %43, %44 : vector<256x128xf32>
    %46 = arith.addf %42, %45 : vector<256x128xf32>
    %c0_16 = arith.constant 0 : index
    %c1_17 = arith.constant 1 : index
    %c0_18 = arith.constant 0 : index
    %c0_19 = arith.constant 0 : index
    %47 = vector.load %arg4[%c0_16, %c1_17, %c0_18, %c0_19] : memref<1x2x256x128xf32, #tpu.memory_space<vmem>>, vector<1x1x256x128xf32>
    %48 = vector.shape_cast %47 : vector<1x1x256x128xf32> to vector<256x128xf32>
    %49 = vector.shape_cast %46 : vector<256x128xf32> to vector<1x1x256x128xf32>
    tpu.vector_store %arg4[%c0_16, %c1_17, %c0_18, %c0_19], %49 {strides = array<i32>} : memref<1x2x256x128xf32, #tpu.memory_space<vmem>>, vector<1x1x256x128xf32>,
    return
  }
  func.func @transform_0(%arg0: i32, %arg1: i32) -> (i32, i32, i32) {
    %c1_i32 = arith.constant 1 : i32
    %0 = arith.muli %arg0, %c1_i32 : i32
    %1 = arith.addi %0, %arg1 : i32
    %c0_i32 = arith.constant 0 : i32
    %c0_i32_0 = arith.constant 0 : i32
    %c0_i32_1 = arith.constant 0 : i32
    return %1, %c0_i32, %c0_i32_0 : i32, i32, i32
  }
  func.func @transform_1(%arg0: i32, %arg1: i32) -> (i32, i32) {
    %c0_i32 = arith.constant 0 : i32
    %c0_i32_0 = arith.constant 0 : i32
    %c0_i32_1 = arith.constant 0 : i32
    return %c0_i32, %c0_i32_0 : i32, i32
  }
  func.func @transform_2(%arg0: i32, %arg1: i32) -> (i32, i32, i32, i32) {
    %c0_i32 = arith.constant 0 : i32
    %c0_i32_0 = arith.constant 0 : i32
    %c0_i32_1 = arith.constant 0 : i32
    %c0_i32_2 = arith.constant 0 : i32
    return %arg0, %c0_i32, %c0_i32_0, %c0_i32_1 : i32, i32, i32, i32
  }
}

module attributes {stable_mosaic.version = 11 : i64} {
  func.func @_bn_pool_kernel(%arg0: i32, %arg1: i32, %arg2: memref<1x4x256xf32, #tpu.memory_space<vmem>>, %arg3: memref<256x4xf32, #tpu.memory_space<vmem>>, %arg4: memref<256x1xf32, #tpu.memory_space<vmem>>, %arg5: memref<256x1xf32, #tpu.memory_space<vmem>>, %arg6: memref<2x2x256x128xf32, #tpu.memory_space<vmem>>, %arg7: memref<1x256x1xf32, #tpu.memory_space<vmem>>, %arg8: memref<256x4xf32, #tpu.memory_space<vmem>>, %arg9: memref<256x1xf32, #tpu.memory_space<vmem>>, %arg10: memref<256x128xf32, #tpu.memory_space<vmem>>) attributes {dimension_semantics = [#tpu.dimension_semantics<parallel>, #tpu.dimension_semantics<arbitrary>], iteration_bounds = array<i64: 2, 1>, scalar_prefetch = 0 : i64, scratch_operands = 3 : i64, tpu.core_type = #tpu.core_type<tc>, window_params = [{transform_indices = @transform_0, window_bounds = array<i64: 1, 4, 256>}, {pipeline_mode = #tpu.pipeline_mode<synchronous>, transform_indices = @transform_1, window_bounds = array<i64: 256, 4>}, {pipeline_mode = #tpu.pipeline_mode<synchronous>, transform_indices = @transform_2, window_bounds = array<i64: 256, 1>}, {pipeline_mode = #tpu.pipeline_mode<synchronous>, transform_indices = @transform_3, window_bounds = array<i64: 256, 1>}, {pipeline_mode = #tpu.pipeline_mode<synchronous>, transform_indices = @transform_4, window_bounds = array<i64: 2, 2, 256, 128>}, {transform_indices = @transform_5, window_bounds = array<i64: 1, 256, 1>}]} {
    %c0_i32 = arith.constant 0 : i32
    %0 = arith.cmpi eq, %arg1, %c0_i32 : i32
    %1 = arith.extui %0 : i1 to i32
    %c0_i32_0 = arith.constant 0 : i32
    %2 = arith.cmpi ne, %1, %c0_i32_0 : i32
    scf.if %2 {
      %c0_14 = arith.constant 0 : index
      %c0_15 = arith.constant 0 : index
      %c0_16 = arith.constant 0 : index
      %c0_17 = arith.constant 0 : index
      %45 = vector.load %arg6[%c0_14, %c0_15, %c0_16, %c0_17] : memref<2x2x256x128xf32, #tpu.memory_space<vmem>>, vector<1x1x256x128xf32>
      %46 = vector.shape_cast %45 : vector<1x1x256x128xf32> to vector<256x128xf32>
      %c0_18 = arith.constant 0 : index
      %c1 = arith.constant 1 : index
      %c0_19 = arith.constant 0 : index
      %c0_20 = arith.constant 0 : index
      %47 = vector.load %arg6[%c0_18, %c1, %c0_19, %c0_20] : memref<2x2x256x128xf32, #tpu.memory_space<vmem>>, vector<1x1x256x128xf32>
      %48 = vector.shape_cast %47 : vector<1x1x256x128xf32> to vector<256x128xf32>
      %c1_21 = arith.constant 1 : index
      %c0_22 = arith.constant 0 : index
      %c0_23 = arith.constant 0 : index
      %c0_24 = arith.constant 0 : index
      %49 = vector.load %arg6[%c1_21, %c0_22, %c0_23, %c0_24] : memref<2x2x256x128xf32, #tpu.memory_space<vmem>>, vector<1x1x256x128xf32>
      %50 = vector.shape_cast %49 : vector<1x1x256x128xf32> to vector<256x128xf32>
      %51 = arith.addf %46, %50 : vector<256x128xf32>
      %c1_25 = arith.constant 1 : index
      %c1_26 = arith.constant 1 : index
      %c0_27 = arith.constant 0 : index
      %c0_28 = arith.constant 0 : index
      %52 = vector.load %arg6[%c1_25, %c1_26, %c0_27, %c0_28] : memref<2x2x256x128xf32, #tpu.memory_space<vmem>>, vector<1x1x256x128xf32>
      %53 = vector.shape_cast %52 : vector<1x1x256x128xf32> to vector<256x128xf32>
      %54 = arith.addf %48, %53 : vector<256x128xf32>
      %cst_29 = arith.constant dense<0.000000e+00> : vector<256xf32>
      %55 = vector.multi_reduction <add>, %51, %cst_29 [1] : vector<256x128xf32> to vector<256xf32>
      %56 = vector.shape_cast %55 : vector<256xf32> to vector<256x1xf32>
      %cst_30 = arith.constant dense<0.000000e+00> : vector<256xf32>
      %57 = vector.multi_reduction <add>, %54, %cst_30 [1] : vector<256x128xf32> to vector<256xf32>
      %58 = vector.shape_cast %57 : vector<256xf32> to vector<256x1xf32>
      %cst_31 = arith.constant 0.001953125 : f32
      %59 = vector.broadcast %cst_31 : f32 to vector<256x1xf32>
      %60 = arith.mulf %56, %59 : vector<256x1xf32>
      %cst_32 = arith.constant 0.001953125 : f32
      %61 = vector.broadcast %cst_32 : f32 to vector<256x1xf32>
      %62 = arith.mulf %58, %61 : vector<256x1xf32>
      %63 = arith.mulf %60, %60 : vector<256x1xf32>
      %64 = arith.subf %62, %63 : vector<256x1xf32>
      %cst_33 = arith.constant 0.000000e+00 : f32
      %65 = vector.broadcast %cst_33 : f32 to vector<256x1xf32>
      %66 = arith.maximumf %64, %65 : vector<256x1xf32>
      %c0_34 = arith.constant 0 : index
      %c0_35 = arith.constant 0 : index
      %67 = vector.load %arg4[%c0_34, %c0_35] : memref<256x1xf32, #tpu.memory_space<vmem>>, vector<256x1xf32>
      %cst_36 = arith.constant 9.99999974E-6 : f32
      %68 = vector.broadcast %cst_36 : f32 to vector<256x1xf32>
      %69 = arith.addf %66, %68 : vector<256x1xf32>
      %70 = math.rsqrt %69 : vector<256x1xf32>
      %71 = arith.mulf %67, %70 : vector<256x1xf32>
      %c0_37 = arith.constant 0 : index
      %c0_38 = arith.constant 0 : index
      %72 = vector.load %arg3[%c0_37, %c0_38] : memref<256x4xf32, #tpu.memory_space<vmem>>, vector<256x4xf32>
      %73 = vector.broadcast %71 : vector<256x1xf32> to vector<256x4xf32>
      %74 = arith.mulf %72, %73 : vector<256x4xf32>
      %c0_39 = arith.constant 0 : index
      %c0_40 = arith.constant 0 : index
      %75 = vector.load %arg8[%c0_39, %c0_40] : memref<256x4xf32, #tpu.memory_space<vmem>>, vector<256x4xf32>
      tpu.vector_store %arg8[%c0_39, %c0_40], %74 {strides = array<i32>} : memref<256x4xf32, #tpu.memory_space<vmem>>, vector<256x4xf32>,
      %c0_41 = arith.constant 0 : index
      %c0_42 = arith.constant 0 : index
      %76 = vector.load %arg5[%c0_41, %c0_42] : memref<256x1xf32, #tpu.memory_space<vmem>>, vector<256x1xf32>
      %77 = arith.mulf %60, %71 : vector<256x1xf32>
      %78 = arith.subf %76, %77 : vector<256x1xf32>
      %c0_43 = arith.constant 0 : index
      %c0_44 = arith.constant 0 : index
      %79 = vector.load %arg9[%c0_43, %c0_44] : memref<256x1xf32, #tpu.memory_space<vmem>>, vector<256x1xf32>
      tpu.vector_store %arg9[%c0_43, %c0_44], %78 {strides = array<i32>} : memref<256x1xf32, #tpu.memory_space<vmem>>, vector<256x1xf32>,
      %cst_45 = arith.constant 0.000000e+00 : f32
      %80 = vector.broadcast %cst_45 : f32 to vector<256x128xf32>
      %c0_46 = arith.constant 0 : index
      %c0_47 = arith.constant 0 : index
      %81 = vector.load %arg10[%c0_46, %c0_47] : memref<256x128xf32, #tpu.memory_space<vmem>>, vector<256x128xf32>
      tpu.vector_store %arg10[%c0_46, %c0_47], %80 {strides = array<i32>} : memref<256x128xf32, #tpu.memory_space<vmem>>, vector<256x128xf32>,
    } else {
    }
    %c0 = arith.constant 0 : index
    %c0_1 = arith.constant 0 : index
    %c0_2 = arith.constant 0 : index
    %3 = vector.load %arg2[%c0, %c0_1, %c0_2] : memref<1x4x256xf32, #tpu.memory_space<vmem>>, vector<1x4x256xf32>
    %4 = vector.shape_cast %3 : vector<1x4x256xf32> to vector<4x256xf32>
    %cst = arith.constant 0.000000e+00 : f32
    %5 = vector.broadcast %cst : f32 to vector<4x256xf32>
    %6 = arith.maximumf %4, %5 : vector<4x256xf32>
    %c0_3 = arith.constant 0 : index
    %c0_4 = arith.constant 0 : index
    %7 = vector.load %arg8[%c0_3, %c0_4] : memref<256x4xf32, #tpu.memory_space<vmem>>, vector<256x4xf32>
    %8 = vector.extract_strided_slice %7 {offsets = [0, 0], sizes = [256, 1], strides = [1, 1]} : vector<256x4xf32> to vector<256x1xf32>
    %9 = vector.extract_strided_slice %6 {offsets = [0, 0], sizes = [1, 256], strides = [1, 1]} : vector<4x256xf32> to vector<1x256xf32>
    %10 = vector.broadcast %8 : vector<256x1xf32> to vector<256x256xf32>
    %11 = vector.broadcast %9 : vector<1x256xf32> to vector<256x256xf32>
    %12 = arith.mulf %10, %11 : vector<256x256xf32>
    %13 = vector.extract_strided_slice %7 {offsets = [0, 1], sizes = [256, 1], strides = [1, 1]} : vector<256x4xf32> to vector<256x1xf32>
    %14 = vector.extract_strided_slice %6 {offsets = [1, 0], sizes = [1, 256], strides = [1, 1]} : vector<4x256xf32> to vector<1x256xf32>
    %15 = vector.broadcast %13 : vector<256x1xf32> to vector<256x256xf32>
    %16 = vector.broadcast %14 : vector<1x256xf32> to vector<256x256xf32>
    %17 = arith.mulf %15, %16 : vector<256x256xf32>
    %18 = arith.addf %12, %17 : vector<256x256xf32>
    %19 = vector.extract_strided_slice %7 {offsets = [0, 2], sizes = [256, 1], strides = [1, 1]} : vector<256x4xf32> to vector<256x1xf32>
    %20 = vector.extract_strided_slice %6 {offsets = [2, 0], sizes = [1, 256], strides = [1, 1]} : vector<4x256xf32> to vector<1x256xf32>
    %21 = vector.broadcast %19 : vector<256x1xf32> to vector<256x256xf32>
    %22 = vector.broadcast %20 : vector<1x256xf32> to vector<256x256xf32>
    %23 = arith.mulf %21, %22 : vector<256x256xf32>
    %24 = arith.addf %18, %23 : vector<256x256xf32>
    %25 = vector.extract_strided_slice %7 {offsets = [0, 3], sizes = [256, 1], strides = [1, 1]} : vector<256x4xf32> to vector<256x1xf32>
    %26 = vector.extract_strided_slice %6 {offsets = [3, 0], sizes = [1, 256], strides = [1, 1]} : vector<4x256xf32> to vector<1x256xf32>
    %27 = vector.broadcast %25 : vector<256x1xf32> to vector<256x256xf32>
    %28 = vector.broadcast %26 : vector<1x256xf32> to vector<256x256xf32>
    %29 = arith.mulf %27, %28 : vector<256x256xf32>
    %30 = arith.addf %24, %29 : vector<256x256xf32>
    %c0_5 = arith.constant 0 : index
    %c0_6 = arith.constant 0 : index
    %31 = vector.load %arg9[%c0_5, %c0_6] : memref<256x1xf32, #tpu.memory_space<vmem>>, vector<256x1xf32>
    %32 = vector.broadcast %31 : vector<256x1xf32> to vector<256x256xf32>
    %33 = arith.addf %30, %32 : vector<256x256xf32>
    %cst_7 = arith.constant 0.000000e+00 : f32
    %34 = vector.broadcast %cst_7 : f32 to vector<256x256xf32>
    %35 = arith.maximumf %33, %34 : vector<256x256xf32>
    %c0_8 = arith.constant 0 : index
    %c0_9 = arith.constant 0 : index
    %36 = vector.load %arg10[%c0_8, %c0_9] : memref<256x128xf32, #tpu.memory_space<vmem>>, vector<256x128xf32>
    %37 = vector.extract_strided_slice %35 {offsets = [0, 0], sizes = [256, 128], strides = [1, 1]} : vector<256x256xf32> to vector<256x128xf32>
    %38 = vector.extract_strided_slice %35 {offsets = [0, 128], sizes = [256, 128], strides = [1, 1]} : vector<256x256xf32> to vector<256x128xf32>
    %39 = arith.addf %37, %38 : vector<256x128xf32>
    %40 = arith.addf %36, %39 : vector<256x128xf32>
    %c0_10 = arith.constant 0 : index
    %c0_11 = arith.constant 0 : index
    %41 = vector.load %arg10[%c0_10, %c0_11] : memref<256x128xf32, #tpu.memory_space<vmem>>, vector<256x128xf32>
    tpu.vector_store %arg10[%c0_10, %c0_11], %40 {strides = array<i32>} : memref<256x128xf32, #tpu.memory_space<vmem>>, vector<256x128xf32>,
    %c0_i32_12 = arith.constant 0 : i32
    %42 = arith.cmpi eq, %arg1, %c0_i32_12 : i32
    %43 = arith.extui %42 : i1 to i32
    %c0_i32_13 = arith.constant 0 : i32
    %44 = arith.cmpi ne, %43, %c0_i32_13 : i32
    scf.if %44 {
      %c0_14 = arith.constant 0 : index
      %c0_15 = arith.constant 0 : index
      %45 = vector.load %arg10[%c0_14, %c0_15] : memref<256x128xf32, #tpu.memory_space<vmem>>, vector<256x128xf32>
      %cst_16 = arith.constant dense<0.000000e+00> : vector<256xf32>
      %46 = vector.multi_reduction <add>, %45, %cst_16 [1] : vector<256x128xf32> to vector<256xf32>
      %47 = vector.shape_cast %46 : vector<256xf32> to vector<256x1xf32>
      %cst_17 = arith.constant 3.906250e-03 : f32
      %48 = vector.broadcast %cst_17 : f32 to vector<256x1xf32>
      %49 = arith.mulf %47, %48 : vector<256x1xf32>
      %c0_18 = arith.constant 0 : index
      %c0_19 = arith.constant 0 : index
      %c0_20 = arith.constant 0 : index
      %50 = vector.load %arg7[%c0_18, %c0_19, %c0_20] : memref<1x256x1xf32, #tpu.memory_space<vmem>>, vector<1x256x1xf32>
      %51 = vector.shape_cast %50 : vector<1x256x1xf32> to vector<256x1xf32>
      %52 = vector.shape_cast %49 : vector<256x1xf32> to vector<1x256x1xf32>
      tpu.vector_store %arg7[%c0_18, %c0_19, %c0_20], %52 {strides = array<i32>} : memref<1x256x1xf32, #tpu.memory_space<vmem>>, vector<1x256x1xf32>,
    } else {
    }
    return
  }
  func.func @transform_0(%arg0: i32, %arg1: i32) -> (i32, i32, i32) {
    %c0_i32 = arith.constant 0 : i32
    %c0_i32_0 = arith.constant 0 : i32
    return %arg0, %c0_i32, %arg1 : i32, i32, i32
  }
  func.func @transform_1(%arg0: i32, %arg1: i32) -> (i32, i32) {
    %c0_i32 = arith.constant 0 : i32
    %c0_i32_0 = arith.constant 0 : i32
    %c0_i32_1 = arith.constant 0 : i32
    return %c0_i32, %c0_i32_0 : i32, i32
  }
  func.func @transform_2(%arg0: i32, %arg1: i32) -> (i32, i32) {
    %c0_i32 = arith.constant 0 : i32
    %c0_i32_0 = arith.constant 0 : i32
    %c0_i32_1 = arith.constant 0 : i32
    return %c0_i32, %c0_i32_0 : i32, i32
  }
  func.func @transform_3(%arg0: i32, %arg1: i32) -> (i32, i32) {
    %c0_i32 = arith.constant 0 : i32
    %c0_i32_0 = arith.constant 0 : i32
    %c0_i32_1 = arith.constant 0 : i32
    return %c0_i32, %c0_i32_0 : i32, i32
  }
  func.func @transform_4(%arg0: i32, %arg1: i32) -> (i32, i32, i32, i32) {
    %c0_i32 = arith.constant 0 : i32
    %c0_i32_0 = arith.constant 0 : i32
    %c0_i32_1 = arith.constant 0 : i32
    %c0_i32_2 = arith.constant 0 : i32
    %c0_i32_3 = arith.constant 0 : i32
    return %c0_i32, %c0_i32_0, %c0_i32_1, %c0_i32_2 : i32, i32, i32, i32
  }
  func.func @transform_5(%arg0: i32, %arg1: i32) -> (i32, i32, i32) {
    %c0_i32 = arith.constant 0 : i32
    %c0_i32_0 = arith.constant 0 : i32
    %c0_i32_1 = arith.constant 0 : i32
    return %arg0, %c0_i32, %c0_i32_0 : i32, i32, i32
  }
}

</mosaic_0001>

<bundles_post_ra>
// kernel: basic_classify_head.2
= control target key start
LH: loop header
LB: loop body
LE: loop exit
PB: predicated region body
PF: predicated region fallthrough
CT: control target
= control target key end

     0   :  { %s1871_s9 = smov 0   ;;  %s1873_s10 = smov 0   ;;  %s3201_s0 = inlined_call_operand.vmem [shape: f32[2,4,256], index: 0, kind: input, shape index: {}]   ;;  %s3202_s1 = inlined_call_operand.vmem [shape: f32[256,4], index: 1, kind: input, shape index: {}]   ;;  %s3203_s2 = inlined_call_operand.vmem [shape: f32[2,2,256,128], index: 2, kind: output, shape index: {}]  }
   0x1   :  { %s1875_s11 = smov 0  }
   0x2 LB: > { %s24_s12 = sadd.s32 1, %s1846_s10  ;;  %p1718_p0 = scmp.ge.s32.totalorder %s1850_s11, 1  ;;  %s1850_s11 = sphi %s1875_s11, %s12_s11   ;;  %s1846_s10 = sphi %s1873_s10, %s3368_s10   ;;  %s1842_s9 = sphi %s1871_s9, %s3367_s9  }
   0x3   : > { %p26_p1 = scmp.ge.s32.totalorder %s24_s12, 2  ;;  %p128_p2 = scmp.lt.s32.totalorder %s1850_s11, 3 }
   0x5   : > { %s3370_s12 = smov (%p26_p1, %s24_s12), 0  ;;  %p129_p3 = pnand %p1718_p0, %p128_p2 }
   0x7   : > { %132 = sbr.rel (%p129_p3) target bundleno = 414 (0x19e), region = 28 }
   0xe   : > { %v1894_v0 = vld [vmem:[%s3202_s1 + $0x10] sm:$0xff]  ;;  %v1899_v1 = vld [vmem:[%s3202_s1] sm:$0xff]  ;;  %v1852_v2 = vmov 0   ;;  %v1906_v3 = vld [vmem:[%s3202_s1 + $0x18] sm:$0xff]  ;;  %v1853_v33 = vmov 1   ;;  %v1854_v36 = vmov 2   ;;  %v426_v55 = vlaneseq }
   0xf   : > { %1821 = vset.pattern.permute.xlu1 %v1852_v2  ;;  %1820 = vset.pattern.permute.xlu0 %v1852_v2  ;;  %v1911_v4 = vld [vmem:[%s3202_s1 + $0x8] sm:$0xff]  ;;  %v1923_v6 = vld [vmem:[%s3202_s1 + $0x20] sm:$0xff]  ;;  %v1930_v7 = vld [vmem:[%s3202_s1 + $0x38] sm:$0xff]  ;;  %p152_p4 = scmp.lt.s32.totalorder %s1842_s9, 1 }
  0x10   : > { %277 = vperm.xlu1 %1821, %v1894_v0   ;;  %267 = vperm.xlu0 %1820, %v1899_v1   ;;  %v1918_v5 = vld [vmem:[%s3202_s1 + $0x28] sm:$0xff]  ;;  %v1935_v8 = vld [vmem:[%s3202_s1 + $0x30] sm:$0xff]  ;;  %v1947_v10 = vld [vmem:[%s3202_s1 + $0x40] sm:$0xff]  ;;  %v2187_v58 = vshrl.u32 %v426_v55, 7 }
  0x11   : > { %v1942_v9 = vld [vmem:[%s3202_s1 + $0x48] sm:$0xff]  ;;  %v1954_v11 = vld [vmem:[%s3202_s1 + $0x58] sm:$0xff]  ;;  %v1959_v12 = vld [vmem:[%s3202_s1 + $0x50] sm:$0xff]  ;;  %s3372_s9 = smov (!%p152_p4, %s1842_s9), 1 }
  0x12   : > { %v1966_v13 = vld [vmem:[%s3202_s1 + $0x68] sm:$0xff]  ;;  %v1971_v14 = vld [vmem:[%s3202_s1 + $0x60] sm:$0xff]  ;;  %v1978_v15 = vld [vmem:[%s3202_s1 + $0x78] sm:$0xff]  ;;  %s1789_s29 = sshll.u32 %s3372_s9, 3  ;;  %v428_v62 = vsub.s32 0, %v2187_v58  ;;  %v432_v63 = vsub.s32 4, %v2187_v58 }
  0x13   : > { %v1983_v16 = vld [vmem:[%s3202_s1 + $0x70] sm:$0xff]  ;;  %v1990_v17 = vld [vmem:[%s3202_s1 + $0x88] sm:$0xff]  ;;  %v1995_v18 = vld [vmem:[%s3202_s1 + $0x80] sm:$0xff]  ;;  %s156_s4 = scalar_lea.vmem %s3201_s0, %s1789_s29  ;;  %s1790_s5 = sshll.u32 %s3372_s9, 9 }
  0x14   : > { %282 = vperm.xlu1 %1821, %v1906_v3   ;;  %272 = vperm.xlu0 %1820, %v1911_v4   ;;  %v2002_v19 = vld [vmem:[%s3202_s1 + $0x98] sm:$0xff]  ;;  %v2007_v20 = vld [vmem:[%s3202_s1 + $0x90] sm:$0xff]  ;;  %v2014_v21 = vld [vmem:[%s3202_s1 + $0xa8] sm:$0xff]  ;;  %s2981_s7 = scalar_lea.vmem %s3203_s2, %s1790_s5 }
  0x15   : > { %v2019_v22 = vld [vmem:[%s3202_s1 + $0xa0] sm:$0xff]  ;;  %v2026_v23 = vld [vmem:[%s3202_s1 + $0xb8] sm:$0xff]  ;;  %v2031_v24 = vld [vmem:[%s3202_s1 + $0xb0] sm:$0xff] }
  0x16   : > { %v2038_v25 = vld [vmem:[%s3202_s1 + $0xc8] sm:$0xff]  ;;  %v2043_v26 = vld [vmem:[%s3202_s1 + $0xc0] sm:$0xff]  ;;  %v2050_v27 = vld [vmem:[%s3202_s1 + $0xd8] sm:$0xff] }
  0x17   : > { %v2055_v28 = vld [vmem:[%s3202_s1 + $0xd0] sm:$0xff]  ;;  %v2062_v29 = vld [vmem:[%s3202_s1 + $0xe8] sm:$0xff]  ;;  %v2067_v30 = vld [vmem:[%s3202_s1 + $0xe0] sm:$0xff] }
  0x18   : > { %292 = vperm.xlu1 %1821, %v1918_v5   ;;  %287 = vperm.xlu0 %1820, %v1923_v6   ;;  %v2074_v31 = vld [vmem:[%s3202_s1 + $0xf8] sm:$0xff]  ;;  %v2079_v32 = vld [vmem:[%s3202_s1 + $0xf0] sm:$0xff]  ;;  %v231_v59 = vld [vmem:[%s156_s4] sm:$0xff] }
  0x19   : > { %v2197_v2 = vmax.f32 %v231_v59, 0.0 }
  0x1b   : > { %v429_v55 = vrot.slane %v2197_v2, %v428_v62 }
  0x1c   : > { %302 = vperm.xlu1 %1821, %v1930_v7   ;;  %297 = vperm.xlu0 %1820, %v1935_v8  }
  0x20   : > { %312 = vperm.xlu1 %1821, %v1942_v9   ;;  %307 = vperm.xlu0 %1820, %v1947_v10  }
  0x24   : > { %322 = vperm.xlu1 %1821, %v1954_v11   ;;  %317 = vperm.xlu0 %1820, %v1959_v12  }
  0x28   : > { %332 = vperm.xlu1 %1821, %v1966_v13   ;;  %327 = vperm.xlu0 %1820, %v1971_v14  }
  0x2c   : > { %342 = vperm.xlu1 %1821, %v1978_v15   ;;  %337 = vperm.xlu0 %1820, %v1983_v16  }
  0x30   : > { %352 = vperm.xlu1 %1821, %v1990_v17   ;;  %347 = vperm.xlu0 %1820, %v1995_v18  }
  0x34   : > { %362 = vperm.xlu1 %1821, %v2002_v19   ;;  %357 = vperm.xlu0 %1820, %v2007_v20  }
  0x38   : > { %372 = vperm.xlu1 %1821, %v2014_v21   ;;  %367 = vperm.xlu0 %1820, %v2019_v22  }
  0x3c   : > { %382 = vperm.xlu1 %1821, %v2026_v23   ;;  %377 = vperm.xlu0 %1820, %v2031_v24  }
  0x40   : > { %392 = vperm.xlu1 %1821, %v2038_v25   ;;  %387 = vperm.xlu0 %1820, %v2043_v26  }
  0x44   : > { %402 = vperm.xlu1 %1821, %v2050_v27   ;;  %397 = vperm.xlu0 %1820, %v2055_v28  }
  0x48   : > { %412 = vperm.xlu1 %1821, %v2062_v29   ;;  %407 = vperm.xlu0 %1820, %v2067_v30  }
  0x4c   : > { %422 = vperm.xlu1 %1821, %v2074_v31   ;;  %417 = vperm.xlu0 %1820, %v2079_v32  }
  0x50   : > { %1823 = vset.pattern.permute.xlu1 %v1853_v33  ;;  %1822 = vset.pattern.permute.xlu0 %v1853_v33 }
  0x51   : > { %513 = vperm.xlu1 %1823, %v1911_v4   ;;  %509 = vperm.xlu0 %1822, %v1899_v1  }
  0x55   : > { %517 = vperm.xlu1 %1823, %v1894_v0   ;;  %521 = vperm.xlu0 %1822, %v1906_v3  }
  0x59   : > { %525 = vperm.xlu1 %1823, %v1923_v6   ;;  %529 = vperm.xlu0 %1822, %v1918_v5  }
  0x5d   : > { %533 = vperm.xlu1 %1823, %v1935_v8   ;;  %537 = vperm.xlu0 %1822, %v1930_v7  }
  0x61   : > { %541 = vperm.xlu1 %1823, %v1947_v10   ;;  %545 = vperm.xlu0 %1822, %v1942_v9  }
  0x65   : > { %549 = vperm.xlu1 %1823, %v1959_v12   ;;  %553 = vperm.xlu0 %1822, %v1954_v11  }
  0x69   : > { %557 = vperm.xlu1 %1823, %v1971_v14   ;;  %561 = vperm.xlu0 %1822, %v1966_v13  }
  0x6d   : > { %565 = vperm.xlu1 %1823, %v1983_v16   ;;  %569 = vperm.xlu0 %1822, %v1978_v15  }
  0x71   : > { %573 = vperm.xlu1 %1823, %v1995_v18   ;;  %577 = vperm.xlu0 %1822, %v1990_v17  }
  0x75   : > { %581 = vperm.xlu1 %1823, %v2007_v20   ;;  %585 = vperm.xlu0 %1822, %v2002_v19  }
  0x79   : > { %589 = vperm.xlu1 %1823, %v2019_v22   ;;  %593 = vperm.xlu0 %1822, %v2014_v21  }
  0x7d   : > { %597 = vperm.xlu1 %1823, %v2031_v24   ;;  %601 = vperm.xlu0 %1822, %v2026_v23  }
  0x81   : > { %605 = vperm.xlu1 %1823, %v2043_v26   ;;  %609 = vperm.xlu0 %1822, %v2038_v25  }
  0x85   : > { %613 = vperm.xlu1 %1823, %v2055_v28   ;;  %617 = vperm.xlu0 %1822, %v2050_v27  }
  0x89   : > { %621 = vperm.xlu1 %1823, %v2067_v30   ;;  %625 = vperm.xlu0 %1822, %v2062_v29  }
  0x8d   : > { %629 = vperm.xlu1 %1823, %v2079_v32   ;;  %633 = vperm.xlu0 %1822, %v2074_v31  }
  0x8f   : > { %v2115_v34 = vpop.permute.xlu1 %277  ;;  %v2117_v35 = vpop.permute.xlu0 %267 }
  0x91   : > { %1824 = vset.pattern.permute.xlu1 %v1854_v36  ;;  %1825 = vset.pattern.permute.xlu0 %v1854_v36 }
  0x92   : > { %783 = vperm.xlu1 %1824, %v1899_v1   ;;  %787 = vperm.xlu0 %1825, %v1911_v4  }
  0x93   : > { %v2121_v37 = vpop.permute.xlu1 %282  ;;  %v2123_v38 = vpop.permute.xlu0 %272 }
  0x96   : > { %791 = vperm.xlu1 %1824, %v1894_v0   ;;  %799 = vperm.xlu0 %1825, %v1923_v6  }
  0x97   : > { %v2127_v39 = vpop.permute.xlu1 %292  ;;  %v2129_v40 = vpop.permute.xlu0 %287 }
  0x9a   : > { %795 = vperm.xlu1 %1824, %v1906_v3   ;;  %807 = vperm.xlu0 %1825, %v1935_v8  }
  0x9b   : > { %v2133_v41 = vpop.permute.xlu1 %302  ;;  %v2135_v42 = vpop.permute.xlu0 %297 }
  0x9e   : > { %803 = vperm.xlu1 %1824, %v1918_v5   ;;  %815 = vperm.xlu0 %1825, %v1947_v10  }
  0x9f   : > { %v2139_v43 = vpop.permute.xlu1 %312  ;;  %v2141_v44 = vpop.permute.xlu0 %307 }
  0xa2   : > { %811 = vperm.xlu1 %1824, %v1930_v7   ;;  %823 = vperm.xlu0 %1825, %v1959_v12  }
  0xa3   : > { %v2145_v45 = vpop.permute.xlu1 %322  ;;  %v2147_v46 = vpop.permute.xlu0 %317 }
  0xa6   : > { %819 = vperm.xlu1 %1824, %v1942_v9   ;;  %831 = vperm.xlu0 %1825, %v1971_v14  }
  0xa7   : > { %v2151_v47 = vpop.permute.xlu1 %332  ;;  %v2153_v48 = vpop.permute.xlu0 %327 }
  0xa8   : > { %3231 = vst [vmem:[#allocation2_spill] sm:$0xff] %v2151_v47  ;;  %3232 = vst [vmem:[#allocation3_spill] sm:$0xff] %v2153_v48 }
  0xaa   : > { %827 = vperm.xlu1 %1824, %v1954_v11   ;;  %839 = vperm.xlu0 %1825, %v1983_v16  }
  0xab   : > { %v2157_v49 = vpop.permute.xlu1 %342  ;;  %v2159_v50 = vpop.permute.xlu0 %337 }
  0xac   : > { %3233 = vst [vmem:[#allocation4_spill] sm:$0xff] %v2157_v49  ;;  %3234 = vst [vmem:[#allocation5_spill] sm:$0xff] %v2159_v50  ;;  %v1855_v50 = vmov 3  }
  0xae   : > { %835 = vperm.xlu1 %1824, %v1966_v13   ;;  %847 = vperm.xlu0 %1825, %v1995_v18  }
  0xaf   : > { %v2164_v51 = vpop.permute.xlu1 %352  ;;  %v2166_v52 = vpop.permute.xlu0 %347 }
  0xb0   : > { %3235 = vst [vmem:[#allocation6_spill] sm:$0xff] %v2164_v51  ;;  %3236 = vst [vmem:[#allocation7_spill] sm:$0xff] %v2166_v52 }
  0xb2   : > { %843 = vperm.xlu1 %1824, %v1978_v15   ;;  %855 = vperm.xlu0 %1825, %v2007_v20  }
  0xb3   : > { %v2173_v53 = vpop.permute.xlu1 %362  ;;  %v2175_v54 = vpop.permute.xlu0 %357 }
  0xb4   : > { %3237 = vst [vmem:[#allocation8_spill] sm:$0xff] %v2173_v53  ;;  %3238 = vst [vmem:[#allocation9_spill] sm:$0xff] %v2175_v54 }
  0xb6   : > { %851 = vperm.xlu1 %1824, %v1990_v17   ;;  %863 = vperm.xlu0 %1825, %v2019_v22  }
  0xb7   : > { %v2180_v56 = vpop.permute.xlu1 %372  ;;  %v2182_v57 = vpop.permute.xlu0 %367 }
  0xb8   : > { %3239 = vst [vmem:[#allocation10_spill] sm:$0xff] %v2180_v56  ;;  %3240 = vst [vmem:[#allocation11_spill] sm:$0xff] %v2182_v57  ;;  %v2213_v56 = vrot.slane %v429_v55, %v428_v62 }
  0xba   : > { %859 = vperm.xlu1 %1824, %v2002_v19   ;;  %871 = vperm.xlu0 %1825, %v2031_v24  }
  0xbb   : > { %v2191_v60 = vpop.permute.xlu1 %382  ;;  %v2193_v61 = vpop.permute.xlu0 %377 }
  0xbc   : > { %3241 = vst [vmem:[#allocation12_spill] sm:$0xff] %v2191_v60  ;;  %v433_v60 = vrot.slane %v2197_v2, %v432_v63 }
  0xbe   : > { %867 = vperm.xlu1 %1824, %v2014_v21   ;;  %879 = vperm.xlu0 %1825, %v2043_v26   ;;  %v2215_v54 = vrot.slane %v433_v60, %v428_v62 }
  0xbf   : > { %v2201_v33 = vpop.permute.xlu1 %392  ;;  %v2203_v36 = vpop.permute.xlu0 %387 }
  0xc0   : > { %3242 = vst [vmem:[#allocation13_spill] sm:$0xff] %v2201_v33 }
  0xc2   : > { %875 = vperm.xlu1 %1824, %v2026_v23   ;;  %887 = vperm.xlu0 %1825, %v2055_v28  }
  0xc3   : > { %v2209_v57 = vpop.permute.xlu1 %402  ;;  %v2211_v59 = vpop.permute.xlu0 %397 }
  0xc6   : > { %883 = vperm.xlu1 %1824, %v2038_v25   ;;  %895 = vperm.xlu0 %1825, %v2067_v30  }
  0xc7   : > { %v2219_v33 = vpop.permute.xlu1 %412  ;;  %v408_v53 = vpop.permute.xlu0 %407 }
  0xc8   : > { %v2222_v63 = vmul.f32 %v2213_v56, %v408_v53  ;;  %v2225_v52 = vmul.f32 %v2215_v54, %v408_v53 }
  0xca   : > { %891 = vperm.xlu1 %1824, %v2050_v27   ;;  %903 = vperm.xlu0 %1825, %v2079_v32  }
  0xcb   : > { %v2229_v55 = vpop.permute.xlu1 %422  ;;  %v418_v60 = vpop.permute.xlu0 %417 }
  0xcc   : > { %v2232_v62 = vmul.f32 %v2213_v56, %v418_v60  ;;  %v2235_v51 = vmul.f32 %v2215_v54, %v418_v60 }
  0xce   : > { %899 = vperm.xlu1 %1824, %v2062_v29   ;;  %1826 = vset.pattern.permute.xlu0 %v1855_v50 }
  0xcf   : > { %1057 = vperm.xlu0 %1826, %v1899_v1  }
  0xd0   : > { %v2239_v53 = vpop.permute.xlu1 %513  ;;  %v2241_v49 = vpop.permute.xlu0 %509 }
  0xd1   : > { %3243 = vst [vmem:[#allocation14_spill] sm:$0xff] %v2241_v49 }
  0xd2   : > { %907 = vperm.xlu1 %1824, %v2074_v31  }
  0xd3   : > { %1069 = vperm.xlu0 %1826, %v1906_v3  }
  0xd4   : > { %v2245_v48 = vpop.permute.xlu1 %517  ;;  %v2247_v47 = vpop.permute.xlu0 %521 }
  0xd6   : > { %1827 = vset.pattern.permute.xlu1 %v1855_v50 }
  0xd7   : > { %1061 = vperm.xlu1 %1827, %v1911_v4   ;;  %1077 = vperm.xlu0 %1826, %v1918_v5  }
  0xd8   : > { %v2251_v60 = vpop.permute.xlu1 %525  ;;  %v2253_v1 = vpop.permute.xlu0 %529 }
  0xdb   : > { %1065 = vperm.xlu1 %1827, %v1894_v0   ;;  %1085 = vperm.xlu0 %1826, %v1930_v7  }
  0xdc   : > { %v2257_v49 = vpop.permute.xlu1 %533  ;;  %v2259_v3 = vpop.permute.xlu0 %537 }
  0xdf   : > { %1073 = vperm.xlu1 %1827, %v1923_v6   ;;  %1093 = vperm.xlu0 %1826, %v1942_v9  }
  0xe0   : > { %v2263_v50 = vpop.permute.xlu1 %541  ;;  %v2265_v4 = vpop.permute.xlu0 %545 }
  0xe3   : > { %1081 = vperm.xlu1 %1827, %v1935_v8   ;;  %1101 = vperm.xlu0 %1826, %v1954_v11  }
  0xe4   : > { %v2269_v5 = vpop.permute.xlu1 %549  ;;  %v2271_v0 = vpop.permute.xlu0 %553 }
  0xe5   : > { %3244 = vst [vmem:[#allocation15_spill] sm:$0xff] %v2271_v0 }
  0xe7   : > { %1089 = vperm.xlu1 %1827, %v1947_v10   ;;  %1109 = vperm.xlu0 %1826, %v1966_v13   ;;  %v638_v13 = vsub.s32 1, %v2187_v58 }
  0xe8   : > { %v2275_v7 = vpop.permute.xlu1 %557  ;;  %v2277_v6 = vpop.permute.xlu0 %561 }
  0xe9   : > { %3245 = vst [vmem:[#allocation16_spill] sm:$0xff] %v2277_v6  ;;  %v642_v6 = vsub.s32 5, %v2187_v58 }
  0xeb   : > { %1097 = vperm.xlu1 %1827, %v1959_v12   ;;  %1117 = vperm.xlu0 %1826, %v1978_v15  }
  0xec   : > { %v2281_v9 = vpop.permute.xlu1 %565  ;;  %v2283_v8 = vpop.permute.xlu0 %569 }
  0xed   : > { %3246 = vst [vmem:[#allocation17_spill] sm:$0xff] %v2283_v8 }
  0xef   : > { %1105 = vperm.xlu1 %1827, %v1971_v14   ;;  %1125 = vperm.xlu0 %1826, %v1990_v17   ;;  %v639_v14 = vrot.slane %v2197_v2, %v638_v13  ;;  %v643_v17 = vrot.slane %v2197_v2, %v642_v6 }
  0xf0   : > { %v2287_v11 = vpop.permute.xlu1 %573  ;;  %v2289_v10 = vpop.permute.xlu0 %577 }
  0xf1   : > { %3247 = vst [vmem:[#allocation18_spill] sm:$0xff] %v2289_v10  ;;  %v2307_v0 = vrot.slane %v639_v14, %v638_v13 }
  0xf3   : > { %1113 = vperm.xlu1 %1827, %v1983_v16   ;;  %1133 = vperm.xlu0 %1826, %v2002_v19   ;;  %v2309_v16 = vrot.slane %v643_v17, %v638_v13  ;;  %v492_v17 = vmul.f32 %v2213_v56, %v2203_v36 }
  0xf4   : > { %v2295_v12 = vpop.permute.xlu1 %581  ;;  %v2297_v15 = vpop.permute.xlu0 %585 }
  0xf5   : > { %3248 = vst [vmem:[#allocation19_spill] sm:$0xff] %v2297_v15 }
  0xf7   : > { %1121 = vperm.xlu1 %1827, %v1995_v18   ;;  %1141 = vperm.xlu0 %1826, %v2014_v21   ;;  %v488_v18 = vmul.f32 %v2213_v56, %v2193_v61  ;;  %v489_v21 = vmul.f32 %v2215_v54, %v2193_v61  ;;  %v493_v61 = vmul.f32 %v2215_v54, %v2203_v36 }
  0xf8   : > { %v2303_v10 = vpop.permute.xlu1 %589  ;;  %v2305_v8 = vpop.permute.xlu0 %593  ;;  %v497_v36 = vmul.f32 %v2215_v54, %v2211_v59 }
  0xf9   : > { %3249 = vst [vmem:[#allocation20_spill] sm:$0xff] %v2305_v8 }
  0xfb   : > { %1129 = vperm.xlu1 %1827, %v2007_v20   ;;  %1149 = vperm.xlu0 %1826, %v2026_v23  }
  0xfc   : > { %v598_v19 = vpop.permute.xlu1 %597  ;;  %v2313_v15 = vpop.permute.xlu0 %601 }
  0xfd   : > { %3250 = vst [vmem:[#allocation21_spill] sm:$0xff] %v2313_v15  ;;  %v698_v6 = vmul.f32 %v2307_v0, %v598_v19  ;;  %v699_v14 = vmul.f32 %v2309_v16, %v598_v19 }
  0xff   : > { %v2321_v8 = vadd.f32 %v698_v6, %v488_v18  ;;  %v2323_v13 = vadd.f32 %v699_v14, %v489_v21  ;;  %1137 = vperm.xlu1 %1827, %v2019_v22   ;;  %1157 = vperm.xlu0 %1826, %v2038_v25   ;;  %v498_v22 = vmul.f32 %v2213_v56, %v2209_v57 }
 0x100   : > { %v606_v20 = vpop.permute.xlu1 %605  ;;  %v2327_v23 = vpop.permute.xlu0 %609  ;;  %v499_v25 = vmul.f32 %v2215_v54, %v2209_v57  ;;  %v496_v6 = vmul.f32 %v2213_v56, %v2211_v59  ;;  %v912_v57 = vsub.s32 2, %v2187_v58 }
 0x101   : > { %3251 = vst [vmem:[#allocation22_spill] sm:$0xff] %v2323_v13  ;;  %3252 = vst [vmem:[#allocation23_spill] sm:$0xff] %v2327_v23  ;;  %v702_v15 = vmul.f32 %v2307_v0, %v606_v20  ;;  %v703_v19 = vmul.f32 %v2309_v16, %v606_v20 }
 0x103   : > { %v2335_v18 = vadd.f32 %v702_v15, %v492_v17  ;;  %v2337_v21 = vadd.f32 %v703_v19, %v493_v61  ;;  %1145 = vperm.xlu1 %1827, %v2031_v24   ;;  %1165 = vperm.xlu0 %1826, %v2050_v27   ;;  %v916_v19 = vsub.s32 6, %v2187_v58 }
 0x104   : > { %v614_v15 = vpop.permute.xlu1 %613  ;;  %v618_v14 = vpop.permute.xlu0 %617 }
 0x105   : > { %3253 = vst [vmem:[#allocation24_spill] sm:$0xff] %v2335_v18  ;;  %3254 = vst [vmem:[#allocation25_spill] sm:$0xff] %v2337_v21  ;;  %v706_v20 = vmul.f32 %v2307_v0, %v614_v15  ;;  %v707_v24 = vmul.f32 %v2309_v16, %v614_v15  ;;  %v708_v17 = vmul.f32 %v2307_v0, %v618_v14 }
 0x106   : > { %v709_v61 = vmul.f32 %v2309_v16, %v618_v14  ;;  %v502_v15 = vmul.f32 %v2213_v56, %v2219_v33  ;;  %v503_v14 = vmul.f32 %v2215_v54, %v2219_v33  ;;  %v913_v33 = vrot.slane %v2197_v2, %v912_v57 }
 0x107   : > { %v2355_v23 = vadd.f32 %v706_v20, %v496_v6  ;;  %v2357_v21 = vadd.f32 %v707_v24, %v497_v36  ;;  %v2359_v59 = vadd.f32 %v708_v17, %v498_v22  ;;  %1153 = vperm.xlu1 %1827, %v2043_v26   ;;  %1173 = vperm.xlu0 %1826, %v2062_v29  }
 0x108   : > { %v2361_v27 = vadd.f32 %v709_v61, %v499_v25  ;;  %v622_v18 = vpop.permute.xlu1 %621  ;;  %v626_v13 = vpop.permute.xlu0 %625  ;;  %v448_v26 = vmul.f32 %v2213_v56, %v2115_v34  ;;  %v449_v20 = vmul.f32 %v2215_v54, %v2115_v34  ;;  %v917_v29 = vrot.slane %v2197_v2, %v916_v19 }
 0x109   : > { %3255 = vst [vmem:[#allocation26_spill] sm:$0xff] %v2355_v23  ;;  %3256 = vst [vmem:[#allocation27_spill] sm:$0xff] %v2357_v21  ;;  %v710_v6 = vmul.f32 %v2307_v0, %v622_v18  ;;  %v711_v36 = vmul.f32 %v2309_v16, %v622_v18  ;;  %v712_v22 = vmul.f32 %v2307_v0, %v626_v13  ;;  %v1190_v21 = vsub.s32 7, %v2187_v58 }
 0x10a   : > { %3257 = vst [vmem:[#allocation28_spill] sm:$0xff] %v2359_v59  ;;  %3258 = vst [vmem:[#allocation29_spill] sm:$0xff] %v2361_v27  ;;  %v713_v25 = vmul.f32 %v2309_v16, %v626_v13  ;;  %v2392_v13 = vmul.f32 %v2213_v56, %v2117_v35  ;;  %v2396_v34 = vmul.f32 %v2215_v54, %v2117_v35  ;;  %v1186_v59 = vsub.s32 3, %v2187_v58 }
 0x10b   : > { %v2380_v24 = vadd.f32 %v710_v6, %v2222_v63  ;;  %v2383_v17 = vadd.f32 %v711_v36, %v2225_v52  ;;  %v2385_v18 = vadd.f32 %v712_v22, %v502_v15  ;;  %1161 = vperm.xlu1 %1827, %v2055_v28   ;;  %v506_v63 = vmul.f32 %v2213_v56, %v2229_v55 }
 0x10c   : > { %v2387_v61 = vadd.f32 %v713_v25, %v503_v14  ;;  %v507_v52 = vmul.f32 %v2215_v54, %v2229_v55  ;;  %1181 = vperm.xlu0 %1826, %v2074_v31   ;;  %v630_v19 = vpop.permute.xlu1 %629  ;;  %v634_v15 = vpop.permute.xlu0 %633  ;;  %v656_v35 = vmul.f32 %v2307_v0, %v2239_v53  ;;  %v657_v22 = vmul.f32 %v2309_v16, %v2239_v53 }
 0x10d   : > { %3259 = vst [vmem:[#allocation30_spill] sm:$0xff] %v2380_v24  ;;  %3260 = vst [vmem:[#allocation31_spill] sm:$0xff] %v2383_v17  ;;  %v714_v28 = vmul.f32 %v2307_v0, %v630_v19  ;;  %v715_v14 = vmul.f32 %v2309_v16, %v630_v19  ;;  %v716_v6 = vmul.f32 %v2307_v0, %v634_v15 }
 0x10e   : > { %3261 = vst [vmem:[#allocation32_spill] sm:$0xff] %v2385_v18  ;;  %3262 = vst [vmem:[#allocation33_spill] sm:$0xff] %v2387_v61  ;;  %v717_v36 = vmul.f32 %v2309_v16, %v634_v15  ;;  %v2411_v25 = vrot.slane %v913_v33, %v912_v57  ;;  %v2413_v55 = vrot.slane %v917_v29, %v912_v57 }
 0x10f   : > { %v2416_v31 = vadd.f32 %v714_v28, %v2232_v62  ;;  %v2419_v61 = vadd.f32 %v715_v14, %v2235_v51  ;;  %v2421_v19 = vadd.f32 %v716_v6, %v506_v63  ;;  %1169 = vperm.xlu1 %1827, %v2067_v30   ;;  %v446_v15 = vmul.f32 %v2213_v56, %v2123_v38 }
 0x110   : > { %v2423_v18 = vadd.f32 %v717_v36, %v507_v52  ;;  %v447_v53 = vmul.f32 %v2215_v54, %v2123_v38  ;;  %v658_v57 = vmul.f32 %v2307_v0, %v2245_v48  ;;  %v659_v62 = vmul.f32 %v2309_v16, %v2245_v48 }
 0x111   : > { %3263 = vst [vmem:[#allocation34_spill] sm:$0xff] %v2416_v31  ;;  %3264 = vst [vmem:[#allocation35_spill] sm:$0xff] %v2419_v61  ;;  %v2436_v51 = vmul.f32 %v2213_v56, %v2121_v37  ;;  %v2440_v33 = vmul.f32 %v2215_v54, %v2121_v37  ;;  %v662_v30 = vmul.f32 %v2307_v0, %v2251_v60  ;;  %v2446_v29 = vpop.permute.xlu1 %783  ;;  %v788_v63 = vpop.permute.xlu0 %787 }
 0x112   : > { %3265 = vst [vmem:[#allocation36_spill] sm:$0xff] %v2421_v19  ;;  %3266 = vst [vmem:[#allocation37_spill] sm:$0xff] %v2423_v18  ;;  %v663_v38 = vmul.f32 %v2309_v16, %v2251_v60  ;;  %v720_v52 = vadd.f32 %v656_v35, %v446_v15  ;;  %v721_v28 = vadd.f32 %v657_v22, %v447_v53 }
 0x113   : > { %3267 = vst [vmem:[#allocation38_spill] sm:$0xff] %v2446_v29  ;;  %v930_v48 = vmul.f32 %v2411_v25, %v788_v63  ;;  %v931_v14 = vmul.f32 %v2413_v55, %v788_v63  ;;  %v2452_v6 = vmul.f32 %v2213_v56, %v2127_v39  ;;  %v2456_v37 = vmul.f32 %v2215_v54, %v2127_v39 }
 0x114   : > { %v452_v60 = vmul.f32 %v2213_v56, %v2129_v40  ;;  %v453_v36 = vmul.f32 %v2215_v54, %v2129_v40  ;;  %1177 = vperm.xlu1 %1827, %v2079_v32   ;;  %v722_v35 = vadd.f32 %v658_v57, %v448_v26  ;;  %v723_v22 = vadd.f32 %v659_v62, %v449_v20 }
 0x115   : > { %v2463_v15 = vadd.f32 %v930_v48, %v720_v52  ;;  %v2465_v53 = vadd.f32 %v931_v14, %v721_v28  ;;  %v666_v39 = vmul.f32 %v2307_v0, %v2257_v49  ;;  %v667_v19 = vmul.f32 %v2309_v16, %v2257_v49  ;;  %v792_v61 = vpop.permute.xlu1 %791  ;;  %v800_v31 = vpop.permute.xlu0 %799 }
 0x116   : > { %v726_v63 = vadd.f32 %v662_v30, %v452_v60  ;;  %v727_v18 = vadd.f32 %v663_v38, %v453_v36  ;;  %v932_v40 = vmul.f32 %v2411_v25, %v792_v61  ;;  %v933_v32 = vmul.f32 %v2413_v55, %v792_v61 }
 0x117   : > { %3268 = vst [vmem:[#allocation39_spill] sm:$0xff] %v2463_v15  ;;  %3269 = vst [vmem:[#allocation40_spill] sm:$0xff] %v2465_v53  ;;  %v936_v26 = vmul.f32 %v2411_v25, %v800_v31  ;;  %v937_v20 = vmul.f32 %v2413_v55, %v800_v31  ;;  %v2477_v57 = vmul.f32 %v2213_v56, %v2133_v41 }
 0x118   : > { %v2481_v62 = vmul.f32 %v2215_v54, %v2133_v41  ;;  %v456_v49 = vmul.f32 %v2213_v56, %v2135_v42  ;;  %v457_v30 = vmul.f32 %v2215_v54, %v2135_v42  ;;  %v2487_v38 = vadd.f32 %v932_v40, %v722_v35 }
 0x119   : > { %v2489_v61 = vadd.f32 %v933_v32, %v723_v22  ;;  %v2491_v52 = vadd.f32 %v936_v26, %v726_v63  ;;  %v2493_v31 = vadd.f32 %v937_v20, %v727_v18  ;;  %v2497_v28 = vmul.f32 %v2213_v56, %v2139_v43  ;;  %v2503_v60 = vpop.permute.xlu1 %795  ;;  %v808_v42 = vpop.permute.xlu0 %807  ;;  %v3277_v20 = vld [vmem:[#allocation2_spill] sm:$0xff] }
 0x11a   : > { %3270 = vst [vmem:[#allocation41_spill] sm:$0xff] %v2487_v38  ;;  %v2501_v41 = vmul.f32 %v2215_v54, %v2139_v43  ;;  %v730_v48 = vadd.f32 %v666_v39, %v456_v49  ;;  %v731_v14 = vadd.f32 %v667_v19, %v457_v30  ;;  %3274 = vst [vmem:[#allocation45_spill] sm:$0xff] %v2503_v60 }
 0x11b   : > { %3271 = vst [vmem:[#allocation42_spill] sm:$0xff] %v2489_v61  ;;  %3272 = vst [vmem:[#allocation43_spill] sm:$0xff] %v2491_v52  ;;  %v670_v36 = vmul.f32 %v2307_v0, %v2263_v50  ;;  %v671_v18 = vmul.f32 %v2309_v16, %v2263_v50  ;;  %v940_v35 = vmul.f32 %v2411_v25, %v808_v42  ;;  %v3284_v61 = vld [vmem:[#allocation6_spill] sm:$0xff] }
 0x11c   : > { %3273 = vst [vmem:[#allocation44_spill] sm:$0xff] %v2493_v31  ;;  %v941_v22 = vmul.f32 %v2413_v55, %v808_v42  ;;  %v460_v63 = vmul.f32 %v2213_v56, %v2141_v44  ;;  %v461_v43 = vmul.f32 %v2215_v54, %v2141_v44  ;;  %v2517_v19 = vmul.f32 %v2213_v56, %v2145_v45  ;;  %v3280_v31 = vld [vmem:[#allocation4_spill] sm:$0xff] }
 0x11d   : > { %v2521_v39 = vmul.f32 %v2215_v54, %v2145_v45  ;;  %v464_v50 = vmul.f32 %v2213_v56, %v2147_v46  ;;  %v465_v40 = vmul.f32 %v2215_v54, %v2147_v46  ;;  %v2527_v32 = vadd.f32 %v940_v35, %v730_v48  ;;  %v2543_v42 = vpop.permute.xlu1 %803  ;;  %v816_v46 = vpop.permute.xlu0 %815 }
 0x11e   : > { %v2529_v26 = vadd.f32 %v941_v22, %v731_v14  ;;  %v2533_v44 = vmul.f32 %v2213_v56, %v3277_v20  ;;  %v2537_v49 = vmul.f32 %v2215_v54, %v3277_v20  ;;  %v674_v45 = vmul.f32 %v2307_v0, %v2269_v5  ;;  %3278 = vst [vmem:[#allocation2_spill] sm:$0xff] %v2543_v42 }
 0x11f   : > { %3275 = vst [vmem:[#allocation46_spill] sm:$0xff] %v2527_v32  ;;  %v675_v30 = vmul.f32 %v2309_v16, %v2269_v5  ;;  %v734_v48 = vadd.f32 %v670_v36, %v460_v63  ;;  %v735_v14 = vadd.f32 %v671_v18, %v461_v43  ;;  %v944_v35 = vmul.f32 %v2411_v25, %v816_v46  ;;  %v3281_v36 = vld [vmem:[#allocation5_spill] sm:$0xff] }
 0x120   : > { %3276 = vst [vmem:[#allocation47_spill] sm:$0xff] %v2529_v26  ;;  %v945_v22 = vmul.f32 %v2413_v55, %v816_v46  ;;  %v3279_v26 = vld [vmem:[#allocation3_spill] sm:$0xff]  ;;  %v2553_v52 = vmul.f32 %v2213_v56, %v3280_v31  ;;  %v2557_v5 = vmul.f32 %v2215_v54, %v3280_v31  ;;  %v472_v18 = vmul.f32 %v2213_v56, %v3281_v36 }
 0x121   : > { %v468_v32 = vmul.f32 %v2213_v56, %v3279_v26  ;;  %v469_v20 = vmul.f32 %v2215_v54, %v3279_v26  ;;  %v473_v63 = vmul.f32 %v2215_v54, %v3281_v36  ;;  %v2563_v43 = vadd.f32 %v944_v35, %v734_v48  ;;  %v2575_v15 = vpop.permute.xlu1 %811  ;;  %v824_v27 = vpop.permute.xlu0 %823 }
 0x122   : > { %v2565_v46 = vadd.f32 %v945_v22, %v735_v14  ;;  %v2569_v26 = vmul.f32 %v2213_v56, %v3284_v61  ;;  %v2573_v38 = vmul.f32 %v2215_v54, %v3284_v61  ;;  %v738_v31 = vadd.f32 %v674_v45, %v464_v50  ;;  %3285 = vst [vmem:[#allocation5_spill] sm:$0xff] %v2575_v15  ;;  %v3286_v22 = vld [vmem:[#allocation7_spill] sm:$0xff]  ;;  %v3287_v50 = vld [vmem:[#allocation8_spill] sm:$0xff] }
 0x123   : > { %3282 = vst [vmem:[#allocation3_spill] sm:$0xff] %v2563_v43  ;;  %v739_v53 = vadd.f32 %v675_v30, %v465_v40  ;;  %v678_v36 = vmul.f32 %v2307_v0, %v2275_v7  ;;  %v679_v48 = vmul.f32 %v2309_v16, %v2275_v7  ;;  %v948_v14 = vmul.f32 %v2411_v25, %v824_v27  ;;  %v3289_v30 = vld [vmem:[#allocation9_spill] sm:$0xff] }
 0x124   : > { %3283 = vst [vmem:[#allocation4_spill] sm:$0xff] %v2565_v46  ;;  %v949_v35 = vmul.f32 %v2413_v55, %v824_v27  ;;  %v476_v46 = vmul.f32 %v2213_v56, %v3286_v22  ;;  %v477_v61 = vmul.f32 %v2215_v54, %v3286_v22  ;;  %v2589_v40 = vmul.f32 %v2213_v56, %v3287_v50 }
 0x125   : > { %v2593_v45 = vmul.f32 %v2215_v54, %v3287_v50  ;;  %v480_v7 = vmul.f32 %v2213_v56, %v3289_v30  ;;  %v2597_v43 = vadd.f32 %v948_v14, %v738_v31  ;;  %v481_v22 = vmul.f32 %v2215_v54, %v3289_v30  ;;  %v2608_v50 = vpop.permute.xlu1 %819  ;;  %v832_v24 = vpop.permute.xlu0 %831 }
 0x126   : > { %v2599_v27 = vadd.f32 %v949_v35, %v739_v53  ;;  %v682_v15 = vmul.f32 %v2307_v0, %v2281_v9  ;;  %v683_v17 = vmul.f32 %v2309_v16, %v2281_v9  ;;  %3292 = vst [vmem:[#allocation9_spill] sm:$0xff] %v2608_v50  ;;  %v742_v31 = vadd.f32 %v678_v36, %v468_v32  ;;  %v3294_v9 = vld [vmem:[#allocation11_spill] sm:$0xff]  ;;  %v3295_v32 = vld [vmem:[#allocation12_spill] sm:$0xff] }
 0x127   : > { %3288 = vst [vmem:[#allocation6_spill] sm:$0xff] %v2593_v45  ;;  %3290 = vst [vmem:[#allocation7_spill] sm:$0xff] %v2597_v43  ;;  %v743_v14 = vadd.f32 %v679_v48, %v469_v20  ;;  %v952_v53 = vmul.f32 %v2411_v25, %v832_v24  ;;  %v953_v35 = vmul.f32 %v2413_v55, %v832_v24 }
 0x128   : > { %3291 = vst [vmem:[#allocation8_spill] sm:$0xff] %v2599_v27  ;;  %v3293_v27 = vld [vmem:[#allocation10_spill] sm:$0xff]  ;;  %v2623_v50 = vmul.f32 %v2213_v56, %v3294_v9  ;;  %v2627_v58 = vmul.f32 %v2215_v54, %v3294_v9  ;;  %v2631_v20 = vmul.f32 %v2213_v56, %v3295_v32  ;;  %v1187_v48 = vrot.slane %v2197_v2, %v1186_v59 }
 0x129   : > { %v2615_v30 = vmul.f32 %v2213_v56, %v3293_v27  ;;  %v2619_v43 = vmul.f32 %v2215_v54, %v3293_v27  ;;  %v2633_v24 = vadd.f32 %v952_v53, %v742_v31  ;;  %v2635_v36 = vadd.f32 %v953_v35, %v743_v14  ;;  %v2642_v60 = vpop.permute.xlu1 %827  ;;  %v840_v9 = vpop.permute.xlu0 %839  ;;  %v3299_v35 = vld [vmem:[#allocation13_spill] sm:$0xff] }
 0x12a   : > { %v2640_v27 = vmul.f32 %v2215_v54, %v3295_v32  ;;  %v746_v23 = vadd.f32 %v682_v15, %v472_v18  ;;  %v747_v42 = vadd.f32 %v683_v17, %v473_v63  ;;  %3298 = vst [vmem:[#allocation12_spill] sm:$0xff] %v2642_v60  ;;  %v1191_v45 = vrot.slane %v2197_v2, %v1190_v21  ;;  %v3301_v17 = vld [vmem:[#allocation14_spill] sm:$0xff] }
 0x12b   : > { %3296 = vst [vmem:[#allocation10_spill] sm:$0xff] %v2633_v24  ;;  %3297 = vst [vmem:[#allocation11_spill] sm:$0xff] %v2635_v36  ;;  %v686_v29 = vmul.f32 %v2307_v0, %v2287_v11  ;;  %v687_v31 = vmul.f32 %v2309_v16, %v2287_v11  ;;  %v956_v14 = vmul.f32 %v2411_v25, %v840_v9 }
 0x12c   : > { %v957_v53 = vmul.f32 %v2413_v55, %v840_v9  ;;  %v2653_v32 = vmul.f32 %v2213_v56, %v3299_v35  ;;  %v654_v15 = vmul.f32 %v2307_v0, %v3301_v17  ;;  %v655_v2 = vmul.f32 %v2309_v16, %v3301_v17 }
 0x12d   : > { %v660_v21 = vmul.f32 %v2307_v0, %v2247_v47  ;;  %v2663_v11 = vmul.f32 %v2215_v54, %v3299_v35  ;;  %v2665_v18 = vadd.f32 %v956_v14, %v746_v23  ;;  %v2669_v9 = vrot.slane %v1187_v48, %v1186_v59  ;;  %v2675_v17 = vpop.permute.xlu1 %835  ;;  %v848_v24 = vpop.permute.xlu0 %847 }
 0x12e   : > { %3300 = vst [vmem:[#allocation13_spill] sm:$0xff] %v2653_v32  ;;  %v2667_v63 = vadd.f32 %v957_v53, %v747_v42  ;;  %v690_v56 = vmul.f32 %v2307_v0, %v2295_v12  ;;  %v691_v36 = vmul.f32 %v2309_v16, %v2295_v12  ;;  %v2677_v60 = vrot.slane %v1191_v45, %v1186_v59 }
 0x12f   : > { %v750_v32 = vadd.f32 %v686_v29, %v476_v46  ;;  %v751_v54 = vadd.f32 %v687_v31, %v477_v61  ;;  %v960_v23 = vmul.f32 %v2411_v25, %v848_v24  ;;  %v961_v42 = vmul.f32 %v2413_v55, %v848_v24 }
 0x130   : > { %v2682_v48 = vadd.f32 %v654_v15, %v2392_v13  ;;  %v2685_v14 = vadd.f32 %v655_v2, %v2396_v34  ;;  %v661_v12 = vmul.f32 %v2309_v16, %v2247_v47  ;;  %v2690_v53 = vadd.f32 %v660_v21, %v2436_v51 }
 0x131   : > { %v664_v59 = vmul.f32 %v2307_v0, %v2253_v1  ;;  %v665_v29 = vmul.f32 %v2309_v16, %v2253_v1  ;;  %v2696_v46 = vadd.f32 %v960_v23, %v750_v32  ;;  %v2698_v61 = vadd.f32 %v961_v42, %v751_v54  ;;  %v2704_v51 = vpop.permute.xlu1 %843  ;;  %v856_v24 = vpop.permute.xlu0 %855  ;;  %v3303_v23 = vld [vmem:[#allocation16_spill] sm:$0xff] }
 0x132   : > { %v668_v13 = vmul.f32 %v2307_v0, %v2259_v3  ;;  %v669_v34 = vmul.f32 %v2309_v16, %v2259_v3  ;;  %v754_v47 = vadd.f32 %v690_v56, %v480_v7  ;;  %v755_v45 = vadd.f32 %v691_v36, %v481_v22  ;;  %v3302_v22 = vld [vmem:[#allocation15_spill] sm:$0xff] }
 0x133   : > { %v694_v31 = vmul.f32 %v2307_v0, %v2303_v10  ;;  %v695_v1 = vmul.f32 %v2309_v16, %v2303_v10  ;;  %v964_v35 = vmul.f32 %v2411_v25, %v856_v24  ;;  %v965_v32 = vmul.f32 %v2413_v55, %v856_v24 }
 0x134   : > { %v2713_v15 = vadd.f32 %v661_v12, %v2440_v33  ;;  %v672_v3 = vmul.f32 %v2307_v0, %v2265_v4  ;;  %v673_v7 = vmul.f32 %v2309_v16, %v2265_v4  ;;  %v676_v36 = vmul.f32 %v2307_v0, %v3302_v22 }
 0x135   : > { %v2722_v2 = vadd.f32 %v664_v59, %v2452_v6  ;;  %v2725_v10 = vadd.f32 %v665_v29, %v2456_v37  ;;  %v2727_v21 = vadd.f32 %v964_v35, %v754_v47  ;;  %v2729_v56 = vadd.f32 %v965_v32, %v755_v45  ;;  %v2741_v42 = vpop.permute.xlu1 %851  ;;  %v864_v37 = vpop.permute.xlu0 %863  ;;  %v3304_v45 = vld [vmem:[#allocation17_spill] sm:$0xff] }
 0x136   : > { %v2732_v33 = vadd.f32 %v668_v13, %v2477_v57  ;;  %v2735_v54 = vadd.f32 %v669_v34, %v2481_v62  ;;  %v677_v4 = vmul.f32 %v2309_v16, %v3302_v22  ;;  %v680_v6 = vmul.f32 %v2307_v0, %v3303_v23 }
 0x137   : > { %v758_v12 = vadd.f32 %v694_v31, %v2623_v50  ;;  %v759_v59 = vadd.f32 %v695_v1, %v2627_v58  ;;  %v968_v29 = vmul.f32 %v2411_v25, %v864_v37  ;;  %v969_v57 = vmul.f32 %v2413_v55, %v864_v37  ;;  %v3308_v1 = vld [vmem:[#allocation20_spill] sm:$0xff] }
 0x138   : > { %v2748_v62 = vadd.f32 %v672_v3, %v2497_v28  ;;  %v2751_v13 = vadd.f32 %v673_v7, %v2501_v41  ;;  %v2754_v34 = vadd.f32 %v676_v36, %v2517_v19  ;;  %v681_v47 = vmul.f32 %v2309_v16, %v3303_v23  ;;  %v3307_v28 = vld [vmem:[#allocation18_spill] sm:$0xff] }
 0x139   : > { %v684_v50 = vmul.f32 %v2307_v0, %v3304_v45  ;;  %v685_v58 = vmul.f32 %v2309_v16, %v3304_v45  ;;  %v2762_v24 = vadd.f32 %v968_v29, %v758_v12  ;;  %v2764_v31 = vadd.f32 %v969_v57, %v759_v59  ;;  %v2774_v3 = vpop.permute.xlu1 %859  ;;  %v872_v7 = vpop.permute.xlu0 %871  ;;  %v3309_v59 = vld [vmem:[#allocation19_spill] sm:$0xff]  ;;  %v3310_v57 = vld [vmem:[#allocation21_spill] sm:$0xff] }
 0x13a   : > { %v688_v41 = vmul.f32 %v2307_v0, %v3307_v28  ;;  %v689_v19 = vmul.f32 %v2309_v16, %v3307_v28  ;;  %v696_v35 = vmul.f32 %v2307_v0, %v3308_v1  ;;  %v697_v32 = vmul.f32 %v2309_v16, %v3308_v1 }
 0x13b   : > { %3305 = vst [vmem:[#allocation14_spill] sm:$0xff] %v2762_v24  ;;  %3306 = vst [vmem:[#allocation15_spill] sm:$0xff] %v2764_v31  ;;  %v2777_v22 = vadd.f32 %v677_v4, %v2521_v39  ;;  %v2780_v36 = vadd.f32 %v680_v6, %v2533_v44  ;;  %v972_v23 = vmul.f32 %v2411_v25, %v872_v7 }
 0x13c   : > { %v973_v37 = vmul.f32 %v2413_v55, %v872_v7  ;;  %v2785_v12 = vadd.f32 %v681_v47, %v2537_v49  ;;  %v692_v29 = vmul.f32 %v2307_v0, %v3309_v59  ;;  %v700_v45 = vmul.f32 %v2307_v0, %v3310_v57  ;;  %v3312_v49 = vld [vmem:[#allocation22_spill] sm:$0xff] }
 0x13d   : > { %v701_v39 = vmul.f32 %v2309_v16, %v3310_v57  ;;  %v2794_v4 = vadd.f32 %v684_v50, %v2553_v52  ;;  %v2797_v44 = vadd.f32 %v685_v58, %v2557_v5  ;;  %v2800_v6 = vadd.f32 %v972_v23, %v2321_v8  ;;  %v868_v50 = vpop.permute.xlu1 %867  ;;  %v880_v57 = vpop.permute.xlu0 %879 }
 0x13e   : > { %v2803_v47 = vadd.f32 %v973_v37, %v3312_v49  ;;  %v2806_v28 = vadd.f32 %v688_v41, %v2569_v26  ;;  %v2809_v1 = vadd.f32 %v689_v19, %v2573_v38  ;;  %v760_v7 = vadd.f32 %v696_v35, %v2615_v30  ;;  %v3314_v35 = vld [vmem:[#allocation24_spill] sm:$0xff]  ;;  %v3316_v37 = vld [vmem:[#allocation25_spill] sm:$0xff] }
 0x13f   : > { %3311 = vst [vmem:[#allocation16_spill] sm:$0xff] %v2800_v6  ;;  %v761_v52 = vadd.f32 %v697_v32, %v2619_v43  ;;  %v970_v5 = vmul.f32 %v2411_v25, %v868_v50  ;;  %v971_v8 = vmul.f32 %v2413_v55, %v868_v50  ;;  %v976_v58 = vmul.f32 %v2411_v25, %v880_v57  ;;  %v3318_v50 = vld [vmem:[#allocation23_spill] sm:$0xff] }
 0x140   : > { %3313 = vst [vmem:[#allocation17_spill] sm:$0xff] %v2803_v47  ;;  %v977_v23 = vmul.f32 %v2413_v55, %v880_v57  ;;  %v693_v26 = vmul.f32 %v2309_v16, %v3309_v59  ;;  %v2820_v38 = vadd.f32 %v692_v29, %v2589_v40  ;;  %v764_v30 = vadd.f32 %v700_v45, %v2631_v20  ;;  %v3319_v29 = vld [vmem:[#allocation38_spill] sm:$0xff] }
 0x141   : > { %v765_v43 = vadd.f32 %v701_v39, %v2640_v27  ;;  %v2824_v41 = vadd.f32 %v970_v5, %v760_v7  ;;  %v2826_v19 = vadd.f32 %v971_v8, %v761_v52  ;;  %v2829_v32 = vadd.f32 %v976_v58, %v3314_v35  ;;  %v876_v45 = vpop.permute.xlu1 %875  ;;  %v888_v39 = vpop.permute.xlu0 %887  ;;  %v3322_v35 = vld [vmem:[#allocation2_spill] sm:$0xff] }
 0x142   : > { %v2832_v49 = vadd.f32 %v977_v23, %v3316_v37  ;;  %v704_v59 = vmul.f32 %v2307_v0, %v3318_v50  ;;  %v705_v40 = vmul.f32 %v2309_v16, %v3318_v50  ;;  %v928_v20 = vmul.f32 %v2411_v25, %v3319_v29  ;;  %v3320_v0 = vld [vmem:[#allocation6_spill] sm:$0xff]  ;;  %v3321_v16 = vld [vmem:[#allocation45_spill] sm:$0xff] }
 0x143   : > { %3315 = vst [vmem:[#allocation18_spill] sm:$0xff] %v2829_v32  ;;  %v929_v27 = vmul.f32 %v2413_v55, %v3319_v29  ;;  %v974_v7 = vmul.f32 %v2411_v25, %v876_v45  ;;  %v975_v52 = vmul.f32 %v2413_v55, %v876_v45  ;;  %v980_v57 = vmul.f32 %v2411_v25, %v888_v39  ;;  %v3323_v45 = vld [vmem:[#allocation26_spill] sm:$0xff] }
 0x144   : > { %3317 = vst [vmem:[#allocation20_spill] sm:$0xff] %v2832_v49  ;;  %v981_v5 = vmul.f32 %v2413_v55, %v888_v39  ;;  %v2847_v8 = vadd.f32 %v693_v26, %v3320_v0  ;;  %v934_v58 = vmul.f32 %v2411_v25, %v3321_v16  ;;  %v935_v23 = vmul.f32 %v2413_v55, %v3321_v16  ;;  %v3325_v39 = vld [vmem:[#allocation27_spill] sm:$0xff]  ;;  %v3327_v26 = vld [vmem:[#allocation13_spill] sm:$0xff] }
 0x145   : > { %v938_v37 = vmul.f32 %v2411_v25, %v3322_v35  ;;  %v2855_v50 = vadd.f32 %v974_v7, %v764_v30  ;;  %v2857_v29 = vadd.f32 %v975_v52, %v765_v43  ;;  %v2860_v49 = vadd.f32 %v980_v57, %v3323_v45  ;;  %v884_v31 = vpop.permute.xlu1 %883  ;;  %v896_v24 = vpop.permute.xlu0 %895 }
 0x146   : > { %v2863_v32 = vadd.f32 %v981_v5, %v3325_v39  ;;  %v768_v0 = vadd.f32 %v704_v59, %v3327_v26  ;;  %v769_v47 = vadd.f32 %v705_v40, %v2663_v11  ;;  %v992_v6 = vadd.f32 %v928_v20, %v2682_v48 }
 0x147   : > { %3324 = vst [vmem:[#allocation19_spill] sm:$0xff] %v2860_v49  ;;  %v993_v16 = vadd.f32 %v929_v27, %v2685_v14  ;;  %v978_v30 = vmul.f32 %v2411_v25, %v884_v31  ;;  %v979_v43 = vmul.f32 %v2413_v55, %v884_v31  ;;  %v984_v7 = vmul.f32 %v2411_v25, %v896_v24  ;;  %v3328_v31 = vld [vmem:[#allocation30_spill] sm:$0xff] }
 0x148   : > { %3326 = vst [vmem:[#allocation21_spill] sm:$0xff] %v2863_v32  ;;  %v985_v52 = vmul.f32 %v2413_v55, %v896_v24  ;;  %v2874_v57 = vadd.f32 %v934_v58, %v2690_v53  ;;  %v2877_v59 = vadd.f32 %v935_v23, %v2713_v15  ;;  %v939_v11 = vmul.f32 %v2413_v55, %v3322_v35  ;;  %v3330_v24 = vld [vmem:[#allocation31_spill] sm:$0xff]  ;;  %v3332_v53 = vld [vmem:[#allocation5_spill] sm:$0xff] }
 0x149   : > { %v2882_v48 = vadd.f32 %v938_v37, %v2722_v2  ;;  %v2884_v14 = vadd.f32 %v978_v30, %v768_v0  ;;  %v2886_v40 = vadd.f32 %v979_v43, %v769_v47  ;;  %v2889_v20 = vadd.f32 %v984_v7, %v3328_v31  ;;  %v3333_v58 = vld [vmem:[#allocation9_spill] sm:$0xff]  ;;  %v892_v47 = vpop.permute.xlu1 %891  ;;  %v904_v35 = vpop.permute.xlu0 %903  ;;  %v3334_v0 = vld [vmem:[#allocation12_spill] sm:$0xff] }
 0x14a   : > { %v2892_v27 = vadd.f32 %v985_v52, %v3330_v24  ;;  %v942_v15 = vmul.f32 %v2411_v25, %v3332_v53  ;;  %v943_v5 = vmul.f32 %v2413_v55, %v3332_v53  ;;  %v946_v2 = vmul.f32 %v2411_v25, %v3333_v58  ;;  %v3335_v31 = vld [vmem:[#allocation28_spill] sm:$0xff]  ;;  %v3336_v53 = vld [vmem:[#allocation29_spill] sm:$0xff] }
 0x14b   : > { %3329 = vst [vmem:[#allocation22_spill] sm:$0xff] %v2889_v20  ;;  %v947_v23 = vmul.f32 %v2413_v55, %v3333_v58  ;;  %v982_v37 = vmul.f32 %v2411_v25, %v892_v47  ;;  %v983_v45 = vmul.f32 %v2413_v55, %v892_v47  ;;  %v988_v39 = vmul.f32 %v2411_v25, %v904_v35  ;;  %v3337_v47 = vld [vmem:[#allocation34_spill] sm:$0xff] }
 0x14c   : > { %3331 = vst [vmem:[#allocation24_spill] sm:$0xff] %v2892_v27  ;;  %v989_v26 = vmul.f32 %v2413_v55, %v904_v35  ;;  %v950_v30 = vmul.f32 %v2411_v25, %v3334_v0  ;;  %v951_v43 = vmul.f32 %v2413_v55, %v3334_v0  ;;  %v954_v7 = vmul.f32 %v2411_v25, %v2675_v17  ;;  %v3338_v27 = vld [vmem:[#allocation35_spill] sm:$0xff] }
 0x14d   : > { %v955_v52 = vmul.f32 %v2413_v55, %v2675_v17  ;;  %v2915_v24 = vadd.f32 %v982_v37, %v3335_v31  ;;  %v2918_v58 = vadd.f32 %v983_v45, %v3336_v53  ;;  %v2921_v35 = vadd.f32 %v988_v39, %v3337_v47  ;;  %v900_v37 = vpop.permute.xlu1 %899 }
 0x14e   : > { %v2924_v20 = vadd.f32 %v989_v26, %v3338_v27  ;;  %v1003_v0 = vadd.f32 %v939_v11, %v2725_v10  ;;  %v2928_v32 = vadd.f32 %v942_v15, %v2732_v33  ;;  %v2931_v49 = vadd.f32 %v943_v5, %v2735_v54  ;;  %v1058_v33 = vpop.permute.xlu0 %1057  ;;  %v3340_v26 = vld [vmem:[#allocation33_spill] sm:$0xff] }
 0x14f   : > { %v958_v17 = vmul.f32 %v2411_v25, %v2704_v51  ;;  %v2936_v45 = vadd.f32 %v946_v2, %v2748_v62  ;;  %v2939_v39 = vadd.f32 %v947_v23, %v2751_v13  ;;  %v986_v27 = vmul.f32 %v2411_v25, %v900_v37  ;;  %v3339_v2 = vld [vmem:[#allocation32_spill] sm:$0xff] }
 0x150   : > { %v987_v10 = vmul.f32 %v2413_v55, %v900_v37  ;;  %v2944_v11 = vadd.f32 %v950_v30, %v2754_v34  ;;  %v2947_v54 = vadd.f32 %v951_v43, %v2777_v22  ;;  %v1202_v15 = vmul.f32 %v2669_v9, %v1058_v33 }
 0x151   : > { %v1203_v5 = vmul.f32 %v2677_v60, %v1058_v33  ;;  %v2952_v62 = vadd.f32 %v954_v7, %v2780_v36  ;;  %v2955_v13 = vadd.f32 %v955_v52, %v2785_v12  ;;  %v2958_v23 = vadd.f32 %v986_v27, %v3339_v2  ;;  %v908_v36 = vpop.permute.xlu1 %907 }
 0x152   : > { %v2961_v31 = vadd.f32 %v987_v10, %v3340_v26  ;;  %v959_v34 = vmul.f32 %v2413_v55, %v2704_v51  ;;  %v2966_v22 = vadd.f32 %v958_v17, %v2794_v4  ;;  %v1266_v30 = vadd.f32 %v1202_v15, %v992_v6  ;;  %v1070_v47 = vpop.permute.xlu0 %1069  ;;  %v3342_v17 = vld [vmem:[#allocation37_spill] sm:$0xff] }
 0x153   : > { %v1267_v43 = vadd.f32 %v1203_v5, %v993_v16  ;;  %v962_v12 = vmul.f32 %v2411_v25, %v2741_v42  ;;  %v963_v7 = vmul.f32 %v2413_v55, %v2741_v42  ;;  %v990_v52 = vmul.f32 %v2411_v25, %v908_v36  ;;  %v3341_v16 = vld [vmem:[#allocation36_spill] sm:$0xff] }
 0x154   : > { %v991_v53 = vmul.f32 %v2413_v55, %v908_v36  ;;  %v1330_v37 = vmul.f32 %v1266_v30, %v1266_v30  ;;  %v1208_v4 = vmul.f32 %v2669_v9, %v1070_v47  ;;  %v966_v6 = vmul.f32 %v2411_v25, %v2774_v3 }
 0x155   : > { %v1331_v51 = vmul.f32 %v1267_v43, %v1267_v43  ;;  %v1426_v27 = vadd.f32 %v1267_v43, %v1266_v30  ;;  %v2984_v42 = vadd.f32 %v990_v52, %v3341_v16  ;;  %v1209_v33 = vmul.f32 %v2677_v60, %v1070_v47  ;;  %v3344_v47 = vld [vmem:[#allocation40_spill] sm:$0xff] }
 0x156   : > { %v2987_v10 = vadd.f32 %v991_v53, %v3342_v17  ;;  %v967_v15 = vmul.f32 %v2413_v55, %v2774_v3  ;;  %v1272_v25 = vadd.f32 %v1208_v4, %v2874_v57  ;;  %v2994_v2 = vadd.f32 %v959_v34, %v2797_v44  ;;  %v1062_v36 = vpop.permute.xlu1 %1061  ;;  %v1078_v57 = vpop.permute.xlu0 %1077 }
 0x157   : > { %v1555_v5 = vadd.f32 %v1331_v51, %v1330_v37  ;;  %v2997_v26 = vadd.f32 %v962_v12, %v2806_v28  ;;  %v3000_v30 = vadd.f32 %v963_v7, %v2809_v1  ;;  %v1273_v43 = vadd.f32 %v1209_v33, %v2877_v59  ;;  %1490 = vst [vmem:[%s2981_s7] sm:$0xff] %v1426_v27  ;;  %v3343_v12 = vld [vmem:[#allocation39_spill] sm:$0xff] }
 0x158   : > { %v1336_v52 = vmul.f32 %v1272_v25, %v1272_v25  ;;  %v1204_v55 = vmul.f32 %v2669_v9, %v1062_v36  ;;  %v1205_v3 = vmul.f32 %v2677_v60, %v1062_v36  ;;  %v1212_v34 = vmul.f32 %v2669_v9, %v1078_v57 }
 0x159   : > { %v1337_v53 = vmul.f32 %v1273_v43, %v1273_v43  ;;  %v1429_v44 = vadd.f32 %v1273_v43, %v1272_v25  ;;  %v1213_v28 = vmul.f32 %v2677_v60, %v1078_v57  ;;  %v3009_v1 = vadd.f32 %v966_v6, %v2820_v38  ;;  %1755 = vst [vmem:[%s2981_s7 + $0x100] sm:$0xff] %v1555_v5 }
 0x15a   : > { %v3012_v59 = vadd.f32 %v967_v15, %v2847_v8  ;;  %v1268_v7 = vadd.f32 %v1204_v55, %v3343_v12  ;;  %v1269_v37 = vadd.f32 %v1205_v3, %v3344_v47  ;;  %v1276_v27 = vadd.f32 %v1212_v34, %v2882_v48  ;;  %v1066_v16 = vpop.permute.xlu1 %1065  ;;  %v1086_v6 = vpop.permute.xlu0 %1085 }
 0x15b   : > { %v1558_v51 = vadd.f32 %v1337_v53, %v1336_v52  ;;  %v1277_v4 = vadd.f32 %v1213_v28, %v1003_v0  ;;  %v1206_v38 = vmul.f32 %v2669_v9, %v1066_v16  ;;  %1493 = vst [vmem:[%s2981_s7 + $0x18] sm:$0xff] %v1429_v44  ;;  %v1207_v36 = vmul.f32 %v2677_v60, %v1066_v16  ;;  %v3345_v52 = vld [vmem:[#allocation41_spill] sm:$0xff]  ;;  %v3346_v53 = vld [vmem:[#allocation42_spill] sm:$0xff] }
 0x15c   : > { %v1332_v17 = vmul.f32 %v1268_v7, %v1268_v7  ;;  %v1333_v33 = vmul.f32 %v1269_v37, %v1269_v37  ;;  %v1427_v25 = vadd.f32 %v1269_v37, %v1268_v7  ;;  %v1340_v8 = vmul.f32 %v1276_v27, %v1276_v27 }
 0x15d   : > { %v1341_v15 = vmul.f32 %v1277_v4, %v1277_v4  ;;  %v1431_v5 = vadd.f32 %v1277_v4, %v1276_v27  ;;  %v1270_v48 = vadd.f32 %v1206_v38, %v3345_v52  ;;  %1758 = vst [vmem:[%s2981_s7 + $0x118] sm:$0xff] %v1558_v51  ;;  %v1216_v55 = vmul.f32 %v2669_v9, %v1086_v6  ;;  %v3347_v4 = vld [vmem:[#allocation43_spill] sm:$0xff] }
 0x15e   : > { %v1556_v43 = vadd.f32 %v1333_v33, %v1332_v17  ;;  %v1217_v3 = vmul.f32 %v2677_v60, %v1086_v6  ;;  %v1074_v57 = vpop.permute.xlu1 %1073  ;;  %1491 = vst [vmem:[%s2981_s7 + $0x8] sm:$0xff] %v1427_v25  ;;  %v1271_v44 = vadd.f32 %v1207_v36, %v3346_v53  ;;  %v1094_v12 = vpop.permute.xlu0 %1093  ;;  %v3348_v6 = vld [vmem:[#allocation44_spill] sm:$0xff] }
 0x15f   : > { %v1560_v0 = vadd.f32 %v1341_v15, %v1340_v8  ;;  %v1334_v34 = vmul.f32 %v1270_v48, %v1270_v48  ;;  %v1210_v28 = vmul.f32 %v2669_v9, %v1074_v57  ;;  %1495 = vst [vmem:[%s2981_s7 + $0x28] sm:$0xff] %v1431_v5  ;;  %v1280_v7 = vadd.f32 %v1216_v55, %v2928_v32 }
 0x160   : > { %v1281_v47 = vadd.f32 %v1217_v3, %v2931_v49  ;;  %v1211_v37 = vmul.f32 %v2677_v60, %v1074_v57  ;;  %1756 = vst [vmem:[%s2981_s7 + $0x108] sm:$0xff] %v1556_v43  ;;  %v1335_v51 = vmul.f32 %v1271_v44, %v1271_v44  ;;  %v1428_v27 = vadd.f32 %v1271_v44, %v1270_v48 }
 0x161   : > { %v1274_v16 = vadd.f32 %v1210_v28, %v3347_v4  ;;  %v1220_v17 = vmul.f32 %v2669_v9, %v1094_v12  ;;  %1760 = vst [vmem:[%s2981_s7 + $0x128] sm:$0xff] %v1560_v0  ;;  %v1344_v33 = vmul.f32 %v1280_v7, %v1280_v7  ;;  %v1221_v5 = vmul.f32 %v2677_v60, %v1094_v12 }
 0x162   : > { %v1345_v25 = vmul.f32 %v1281_v47, %v1281_v47  ;;  %v1433_v38 = vadd.f32 %v1281_v47, %v1280_v7  ;;  %v1275_v8 = vadd.f32 %v1211_v37, %v3348_v6  ;;  %v1082_v32 = vpop.permute.xlu1 %1081  ;;  %v1557_v49 = vadd.f32 %v1335_v51, %v1334_v34  ;;  %v1102_v43 = vpop.permute.xlu0 %1101  ;;  %1492 = vst [vmem:[%s2981_s7 + $0x10] sm:$0xff] %v1428_v27  ;;  %v3349_v7 = vld [vmem:[#allocation46_spill] sm:$0xff] }
 0x163   : > { %v1338_v15 = vmul.f32 %v1274_v16, %v1274_v16  ;;  %v1284_v0 = vadd.f32 %v1220_v17, %v2936_v45  ;;  %v1285_v55 = vadd.f32 %v1221_v5, %v2939_v39  ;;  %v1214_v3 = vmul.f32 %v2669_v9, %v1082_v32  ;;  %v3350_v45 = vld [vmem:[#allocation47_spill] sm:$0xff] }
 0x164   : > { %v1562_v36 = vadd.f32 %v1345_v25, %v1344_v33  ;;  %v1339_v52 = vmul.f32 %v1275_v8, %v1275_v8  ;;  %v1430_v48 = vadd.f32 %v1275_v8, %v1274_v16  ;;  %1497 = vst [vmem:[%s2981_s7 + $0x38] sm:$0xff] %v1433_v38  ;;  %v1215_v53 = vmul.f32 %v2677_v60, %v1082_v32 }
 0x165   : > { %1757 = vst [vmem:[%s2981_s7 + $0x110] sm:$0xff] %v1557_v49  ;;  %v1348_v34 = vmul.f32 %v1284_v0, %v1284_v0  ;;  %v1349_v28 = vmul.f32 %v1285_v55, %v1285_v55  ;;  %v1435_v12 = vadd.f32 %v1285_v55, %v1284_v0  ;;  %v1278_v47 = vadd.f32 %v1214_v3, %v3349_v7  ;;  %v3351_v49 = vld [vmem:[#allocation3_spill] sm:$0xff]  ;;  %v3352_v55 = vld [vmem:[#allocation4_spill] sm:$0xff] }
 0x166   : > { %v1559_v57 = vadd.f32 %v1339_v52, %v1338_v15  ;;  %v1090_v44 = vpop.permute.xlu1 %1089  ;;  %v1110_v37 = vpop.permute.xlu0 %1109  ;;  %1762 = vst [vmem:[%s2981_s7 + $0x138] sm:$0xff] %v1562_v36  ;;  %1494 = vst [vmem:[%s2981_s7 + $0x20] sm:$0xff] %v1430_v48  ;;  %v1279_v39 = vadd.f32 %v1215_v53, %v3350_v45  ;;  %v1224_v51 = vmul.f32 %v2669_v9, %v1102_v43 }
 0x167   : > { %v1225_v27 = vmul.f32 %v2677_v60, %v1102_v43  ;;  %v1564_v4 = vadd.f32 %v1349_v28, %v1348_v34  ;;  %v1342_v16 = vmul.f32 %v1278_v47, %v1278_v47  ;;  %v1218_v17 = vmul.f32 %v2669_v9, %v1090_v44  ;;  %1499 = vst [vmem:[%s2981_s7 + $0x48] sm:$0xff] %v1435_v12 }
 0x168   : > { %1759 = vst [vmem:[%s2981_s7 + $0x120] sm:$0xff] %v1559_v57  ;;  %v1343_v33 = vmul.f32 %v1279_v39, %v1279_v39  ;;  %v1432_v25 = vadd.f32 %v1279_v39, %v1278_v47  ;;  %v1288_v38 = vadd.f32 %v1224_v51, %v2944_v11  ;;  %v1219_v32 = vmul.f32 %v2677_v60, %v1090_v44  ;;  %v3353_v51 = vld [vmem:[#allocation7_spill] sm:$0xff] }
 0x169   : > { %v1289_v6 = vadd.f32 %v1225_v27, %v2947_v54  ;;  %v1282_v15 = vadd.f32 %v1218_v17, %v3351_v49  ;;  %v1228_v5 = vmul.f32 %v2669_v9, %v1110_v37  ;;  %1764 = vst [vmem:[%s2981_s7 + $0x148] sm:$0xff] %v1564_v4  ;;  %v1229_v54 = vmul.f32 %v2677_v60, %v1110_v37 }
 0x16a   : > { %v1098_v8 = vpop.permute.xlu1 %1097  ;;  %v1118_v43 = vpop.permute.xlu0 %1117  ;;  %v1561_v36 = vadd.f32 %v1343_v33, %v1342_v16  ;;  %v1352_v52 = vmul.f32 %v1288_v38, %v1288_v38  ;;  %v1283_v11 = vadd.f32 %v1219_v32, %v3352_v55  ;;  %1496 = vst [vmem:[%s2981_s7 + $0x30] sm:$0xff] %v1432_v25  ;;  %v3354_v16 = vld [vmem:[#allocation8_spill] sm:$0xff] }
 0x16b   : > { %v1353_v48 = vmul.f32 %v1289_v6, %v1289_v6  ;;  %v1437_v0 = vadd.f32 %v1289_v6, %v1288_v38  ;;  %v1346_v3 = vmul.f32 %v1282_v15, %v1282_v15  ;;  %v1292_v53 = vadd.f32 %v1228_v5, %v2952_v62 }
 0x16c   : > { %v1222_v44 = vmul.f32 %v2669_v9, %v1098_v8  ;;  %v1347_v28 = vmul.f32 %v1283_v11, %v1283_v11  ;;  %v1434_v12 = vadd.f32 %v1283_v11, %v1282_v15  ;;  %v1293_v7 = vadd.f32 %v1229_v54, %v2955_v13  ;;  %1761 = vst [vmem:[%s2981_s7 + $0x130] sm:$0xff] %v1561_v36 }
 0x16d   : > { %v1566_v57 = vadd.f32 %v1353_v48, %v1352_v52  ;;  %v1356_v45 = vmul.f32 %v1292_v53, %v1292_v53  ;;  %v1223_v39 = vmul.f32 %v2677_v60, %v1098_v8  ;;  %1501 = vst [vmem:[%s2981_s7 + $0x58] sm:$0xff] %v1437_v0  ;;  %v1232_v13 = vmul.f32 %v2669_v9, %v1118_v43  ;;  %v3355_v48 = vld [vmem:[#allocation10_spill] sm:$0xff] }
 0x16e   : > { %v1106_v34 = vpop.permute.xlu1 %1105  ;;  %v1126_v47 = vpop.permute.xlu0 %1125  ;;  %v1286_v37 = vadd.f32 %v1222_v44, %v3353_v51  ;;  %v1563_v27 = vadd.f32 %v1347_v28, %v1346_v3  ;;  %v1357_v4 = vmul.f32 %v1293_v7, %v1293_v7  ;;  %v1439_v62 = vadd.f32 %v1293_v7, %v1292_v53  ;;  %1498 = vst [vmem:[%s2981_s7 + $0x40] sm:$0xff] %v1434_v12  ;;  %v3356_v53 = vld [vmem:[#allocation11_spill] sm:$0xff] }
 0x16f   : > { %1766 = vst [vmem:[%s2981_s7 + $0x158] sm:$0xff] %v1566_v57  ;;  %v1287_v17 = vadd.f32 %v1223_v39, %v3354_v16  ;;  %v1233_v25 = vmul.f32 %v2677_v60, %v1118_v43  ;;  %v1226_v8 = vmul.f32 %v2669_v9, %v1106_v34  ;;  %v1296_v5 = vadd.f32 %v1232_v13, %v2966_v22 }
 0x170   : > { %v1350_v33 = vmul.f32 %v1286_v37, %v1286_v37  ;;  %v1568_v6 = vadd.f32 %v1357_v4, %v1356_v45  ;;  %1763 = vst [vmem:[%s2981_s7 + $0x140] sm:$0xff] %v1563_v27  ;;  %1503 = vst [vmem:[%s2981_s7 + $0x68] sm:$0xff] %v1439_v62  ;;  %v1227_v52 = vmul.f32 %v2677_v60, %v1106_v34 }
 0x171   : > { %v1351_v49 = vmul.f32 %v1287_v17, %v1287_v17  ;;  %v1436_v15 = vadd.f32 %v1287_v17, %v1286_v37  ;;  %v1297_v36 = vadd.f32 %v1233_v25, %v2994_v2  ;;  %v1290_v43 = vadd.f32 %v1226_v8, %v3355_v48 }
 0x172   : > { %v1114_v38 = vpop.permute.xlu1 %1113  ;;  %v1134_v32 = vpop.permute.xlu0 %1133  ;;  %v1236_v0 = vmul.f32 %v2669_v9, %v1126_v47  ;;  %v1360_v11 = vmul.f32 %v1296_v5, %v1296_v5  ;;  %1768 = vst [vmem:[%s2981_s7 + $0x168] sm:$0xff] %v1568_v6  ;;  %v1291_v22 = vadd.f32 %v1227_v52, %v3356_v53  ;;  %v1237_v2 = vmul.f32 %v2677_v60, %v1126_v47 }
 0x173   : > { %v1565_v55 = vadd.f32 %v1351_v49, %v1350_v33  ;;  %v1361_v3 = vmul.f32 %v1297_v36, %v1297_v36  ;;  %v1441_v57 = vadd.f32 %v1297_v36, %v1296_v5  ;;  %v1354_v44 = vmul.f32 %v1290_v43, %v1290_v43  ;;  %1500 = vst [vmem:[%s2981_s7 + $0x50] sm:$0xff] %v1436_v15 }
 0x174   : > { %v1300_v34 = vadd.f32 %v1236_v0, %v2997_v26  ;;  %v1230_v12 = vmul.f32 %v2669_v9, %v1114_v38  ;;  %v1355_v45 = vmul.f32 %v1291_v22, %v1291_v22  ;;  %v1438_v39 = vadd.f32 %v1291_v22, %v1290_v43 }
 0x175   : > { %v1570_v28 = vadd.f32 %v1361_v3, %v1360_v11  ;;  %v1301_v51 = vadd.f32 %v1237_v2, %v3000_v30  ;;  %1765 = vst [vmem:[%s2981_s7 + $0x150] sm:$0xff] %v1565_v55  ;;  %v1231_v27 = vmul.f32 %v2677_v60, %v1114_v38  ;;  %1505 = vst [vmem:[%s2981_s7 + $0x78] sm:$0xff] %v1441_v57 }
 0x176   : > { %v1122_v54 = vpop.permute.xlu1 %1121  ;;  %v1142_v7 = vpop.permute.xlu0 %1141  ;;  %v1364_v37 = vmul.f32 %v1300_v34, %v1300_v34  ;;  %v1294_v4 = vadd.f32 %v1230_v12, %v2665_v18  ;;  %v1567_v62 = vadd.f32 %v1355_v45, %v1354_v44  ;;  %v1240_v13 = vmul.f32 %v2669_v9, %v1134_v32  ;;  %1502 = vst [vmem:[%s2981_s7 + $0x60] sm:$0xff] %v1438_v39 }
 0x177   : > { %v1365_v16 = vmul.f32 %v1301_v51, %v1301_v51  ;;  %v1443_v26 = vadd.f32 %v1301_v51, %v1300_v34  ;;  %1770 = vst [vmem:[%s2981_s7 + $0x178] sm:$0xff] %v1570_v28  ;;  %v1295_v17 = vadd.f32 %v1231_v27, %v2667_v63  ;;  %v1241_v30 = vmul.f32 %v2677_v60, %v1134_v32 }
 0x178   : > { %v1358_v33 = vmul.f32 %v1294_v4, %v1294_v4  ;;  %v1234_v18 = vmul.f32 %v2669_v9, %v1122_v54  ;;  %v1304_v8 = vadd.f32 %v1240_v13, %v3009_v1  ;;  %1767 = vst [vmem:[%s2981_s7 + $0x160] sm:$0xff] %v1567_v62  ;;  %v1235_v63 = vmul.f32 %v2677_v60, %v1122_v54 }
 0x179   : > { %v1572_v25 = vadd.f32 %v1365_v16, %v1364_v37  ;;  %v1359_v38 = vmul.f32 %v1295_v17, %v1295_v17  ;;  %v1440_v6 = vadd.f32 %v1295_v17, %v1294_v4  ;;  %v1305_v49 = vadd.f32 %v1241_v30, %v3012_v59  ;;  %1507 = vst [vmem:[%s2981_s7 + $0x88] sm:$0xff] %v1443_v26  ;;  %v3357_v16 = vld [vmem:[#allocation14_spill] sm:$0xff] }
 0x17a   : > { %v1130_v47 = vpop.permute.xlu1 %1129  ;;  %v1150_v15 = vpop.permute.xlu0 %1149  ;;  %v1298_v32 = vadd.f32 %v1234_v18, %v2696_v46  ;;  %v1244_v36 = vmul.f32 %v2669_v9, %v1142_v7  ;;  %v1368_v48 = vmul.f32 %v1304_v8, %v1304_v8  ;;  %v1299_v1 = vadd.f32 %v1235_v63, %v2698_v61 }
 0x17b   : > { %v1569_v52 = vadd.f32 %v1359_v38, %v1358_v33  ;;  %v1369_v43 = vmul.f32 %v1305_v49, %v1305_v49  ;;  %1772 = vst [vmem:[%s2981_s7 + $0x188] sm:$0xff] %v1572_v25  ;;  %v1445_v0 = vadd.f32 %v1305_v49, %v1304_v8  ;;  %v1245_v55 = vmul.f32 %v2677_v60, %v1142_v7 }
 0x17c   : > { %v1362_v59 = vmul.f32 %v1298_v32, %v1298_v32  ;;  %1504 = vst [vmem:[%s2981_s7 + $0x70] sm:$0xff] %v1440_v6  ;;  %v1308_v3 = vadd.f32 %v1244_v36, %v2824_v41  ;;  %v1238_v46 = vmul.f32 %v2669_v9, %v1130_v47  ;;  %v1363_v57 = vmul.f32 %v1299_v1, %v1299_v1 }
 0x17d   : > { %v1574_v11 = vadd.f32 %v1369_v43, %v1368_v48  ;;  %v1442_v53 = vadd.f32 %v1299_v1, %v1298_v32  ;;  %v1309_v22 = vadd.f32 %v1245_v55, %v2826_v19  ;;  %1769 = vst [vmem:[%s2981_s7 + $0x170] sm:$0xff] %v1569_v52  ;;  %v1239_v61 = vmul.f32 %v2677_v60, %v1130_v47  ;;  %v3359_v48 = vld [vmem:[#allocation16_spill] sm:$0xff]  ;;  %v3360_v55 = vld [vmem:[#allocation17_spill] sm:$0xff] }
 0x17e   : > { %v1138_v5 = vpop.permute.xlu1 %1137  ;;  %v1372_v44 = vmul.f32 %v1308_v3, %v1308_v3  ;;  %v1302_v2 = vadd.f32 %v1238_v46, %v2727_v21  ;;  %v1158_v28 = vpop.permute.xlu0 %1157  ;;  %1509 = vst [vmem:[%s2981_s7 + $0x98] sm:$0xff] %v1445_v0  ;;  %v1571_v34 = vadd.f32 %v1363_v57, %v1362_v59  ;;  %v1248_v39 = vmul.f32 %v2669_v9, %v1150_v15 }
 0x17f   : > { %v1373_v12 = vmul.f32 %v1309_v22, %v1309_v22  ;;  %v1447_v41 = vadd.f32 %v1309_v22, %v1308_v3  ;;  %1774 = vst [vmem:[%s2981_s7 + $0x198] sm:$0xff] %v1574_v11  ;;  %v1303_v7 = vadd.f32 %v1239_v61, %v2729_v56  ;;  %v1249_v19 = vmul.f32 %v2677_v60, %v1150_v15 }
 0x180   : > { %v1366_v45 = vmul.f32 %v1302_v2, %v1302_v2  ;;  %1506 = vst [vmem:[%s2981_s7 + $0x80] sm:$0xff] %v1442_v53  ;;  %v1242_v21 = vmul.f32 %v2669_v9, %v1138_v5  ;;  %v1312_v4 = vadd.f32 %v1248_v39, %v2855_v50  ;;  %1771 = vst [vmem:[%s2981_s7 + $0x180] sm:$0xff] %v1571_v34  ;;  %v3358_v50 = vld [vmem:[#allocation15_spill] sm:$0xff]  ;;  %v3361_v34 = vld [vmem:[#allocation18_spill] sm:$0xff] }
 0x181   : > { %v1576_v51 = vadd.f32 %v1373_v12, %v1372_v44  ;;  %v1367_v37 = vmul.f32 %v1303_v7, %v1303_v7  ;;  %v1444_v27 = vadd.f32 %v1303_v7, %v1302_v2  ;;  %v1313_v47 = vadd.f32 %v1249_v19, %v2857_v29  ;;  %1511 = vst [vmem:[%s2981_s7 + $0xa8] sm:$0xff] %v1447_v41 }
 0x182   : > { %v1146_v54 = vpop.permute.xlu1 %1145  ;;  %v1243_v56 = vmul.f32 %v2677_v60, %v1138_v5  ;;  %v1306_v26 = vadd.f32 %v1242_v21, %v3357_v16  ;;  %v1252_v17 = vmul.f32 %v2669_v9, %v1158_v28  ;;  %v1376_v13 = vmul.f32 %v1312_v4, %v1312_v4  ;;  %v1166_v25 = vpop.permute.xlu0 %1165  ;;  %v3362_v21 = vld [vmem:[#allocation20_spill] sm:$0xff] }
 0x183   : > { %v1573_v33 = vadd.f32 %v1367_v37, %v1366_v45  ;;  %v1377_v30 = vmul.f32 %v1313_v47, %v1313_v47  ;;  %1776 = vst [vmem:[%s2981_s7 + $0x1a8] sm:$0xff] %v1576_v51  ;;  %v1449_v18 = vadd.f32 %v1313_v47, %v1312_v4  ;;  %v1253_v6 = vmul.f32 %v2677_v60, %v1158_v28 }
 0x184   : > { %v1307_v29 = vadd.f32 %v1243_v56, %v3358_v50  ;;  %v1370_v38 = vmul.f32 %v1306_v26, %v1306_v26  ;;  %1508 = vst [vmem:[%s2981_s7 + $0x90] sm:$0xff] %v1444_v27  ;;  %v1316_v49 = vadd.f32 %v1252_v17, %v2884_v14  ;;  %v1246_v15 = vmul.f32 %v2669_v9, %v1146_v54  ;;  %v3364_v50 = vld [vmem:[#allocation21_spill] sm:$0xff] }
 0x185   : > { %v1578_v8 = vadd.f32 %v1377_v30, %v1376_v13  ;;  %v1317_v32 = vadd.f32 %v1253_v6, %v2886_v40  ;;  %1773 = vst [vmem:[%s2981_s7 + $0x190] sm:$0xff] %v1573_v33  ;;  %v1247_v52 = vmul.f32 %v2677_v60, %v1146_v54  ;;  %1513 = vst [vmem:[%s2981_s7 + $0xb8] sm:$0xff] %v1449_v18  ;;  %v3363_v13 = vld [vmem:[#allocation19_spill] sm:$0xff] }
 0x186   : > { %v1154_v62 = vpop.permute.xlu1 %1153  ;;  %v1371_v5 = vmul.f32 %v1307_v29, %v1307_v29  ;;  %v1446_v63 = vadd.f32 %v1307_v29, %v1306_v26  ;;  %v1380_v36 = vmul.f32 %v1316_v49, %v1316_v49  ;;  %v1310_v43 = vadd.f32 %v1246_v15, %v3359_v48  ;;  %v1174_v57 = vpop.permute.xlu0 %1173  ;;  %v3365_v48 = vld [vmem:[#allocation22_spill] sm:$0xff] }
 0x187   : > { %v1381_v59 = vmul.f32 %v1317_v32, %v1317_v32  ;;  %v1451_v14 = vadd.f32 %v1317_v32, %v1316_v49  ;;  %1778 = vst [vmem:[%s2981_s7 + $0x1b8] sm:$0xff] %v1578_v8  ;;  %v1311_v11 = vadd.f32 %v1247_v52, %v3360_v55  ;;  %v1256_v40 = vmul.f32 %v2669_v9, %v1166_v25 }
 0x188   : > { %v1575_v1 = vadd.f32 %v1371_v5, %v1370_v38  ;;  %v1374_v3 = vmul.f32 %v1310_v43, %v1310_v43  ;;  %v1257_v46 = vmul.f32 %v2677_v60, %v1166_v25  ;;  %1510 = vst [vmem:[%s2981_s7 + $0xa0] sm:$0xff] %v1446_v63  ;;  %v1250_v53 = vmul.f32 %v2669_v9, %v1154_v62 }
 0x189   : > { %v1580_v54 = vadd.f32 %v1381_v59, %v1380_v36  ;;  %v1375_v22 = vmul.f32 %v1311_v11, %v1311_v11  ;;  %v1448_v44 = vadd.f32 %v1311_v11, %v1310_v43  ;;  %v1320_v61 = vadd.f32 %v1256_v40, %v2915_v24  ;;  %1515 = vst [vmem:[%s2981_s7 + $0xc8] sm:$0xff] %v1451_v14  ;;  %v3366_v11 = vld [vmem:[#allocation24_spill] sm:$0xff] }
 0x18a   : > { %v1162_v0 = vpop.permute.xlu1 %1161  ;;  %v1321_v2 = vadd.f32 %v1257_v46, %v2918_v58  ;;  %1775 = vst [vmem:[%s2981_s7 + $0x1a0] sm:$0xff] %v1575_v1  ;;  %v1251_v28 = vmul.f32 %v2677_v60, %v1154_v62  ;;  %v1314_v12 = vadd.f32 %v1250_v53, %v3361_v34  ;;  %v1260_v41 = vmul.f32 %v2669_v9, %v1174_v57 }
 0x18b   : > { %v1577_v7 = vadd.f32 %v1375_v22, %v1374_v3  ;;  %v1384_v45 = vmul.f32 %v1320_v61, %v1320_v61  ;;  %1780 = vst [vmem:[%s2981_s7 + $0x1c8] sm:$0xff] %v1580_v54  ;;  %v1261_v58 = vmul.f32 %v2677_v60, %v1174_v57  ;;  %1512 = vst [vmem:[%s2981_s7 + $0xb0] sm:$0xff] %v1448_v44  ;;  %v1182_v26 = vpop.permute.xlu0 %1181 }
 0x18c   : > { %v1385_v39 = vmul.f32 %v1321_v2, %v1321_v2  ;;  %v1453_v51 = vadd.f32 %v1321_v2, %v1320_v61  ;;  %v1315_v24 = vadd.f32 %v1251_v28, %v3362_v21  ;;  %v1378_v37 = vmul.f32 %v1314_v12, %v1314_v12 }
 0x18d   : > { %v1324_v4 = vadd.f32 %v1260_v41, %v2958_v23  ;;  %v1254_v47 = vmul.f32 %v2669_v9, %v1162_v0  ;;  %v1325_v16 = vadd.f32 %v1261_v58, %v2961_v31  ;;  %1777 = vst [vmem:[%s2981_s7 + $0x1b0] sm:$0xff] %v1577_v7  ;;  %v1255_v33 = vmul.f32 %v2677_v60, %v1162_v0 }
 0x18e   : > { %v1170_v19 = vpop.permute.xlu1 %1169  ;;  %v1582_v27 = vadd.f32 %v1385_v39, %v1384_v45  ;;  %v1379_v62 = vmul.f32 %v1315_v24, %v1315_v24  ;;  %v1450_v56 = vadd.f32 %v1315_v24, %v1314_v12  ;;  %1517 = vst [vmem:[%s2981_s7 + $0xd8] sm:$0xff] %v1453_v51  ;;  %v1264_v31 = vmul.f32 %v2669_v9, %v1182_v26 }
 0x18f   : > { %v1388_v17 = vmul.f32 %v1324_v4, %v1324_v4  ;;  %v1318_v30 = vadd.f32 %v1254_v47, %v3363_v13  ;;  %v1389_v18 = vmul.f32 %v1325_v16, %v1325_v16  ;;  %v1455_v23 = vadd.f32 %v1325_v16, %v1324_v4 }
 0x190   : > { %v1579_v25 = vadd.f32 %v1379_v62, %v1378_v37  ;;  %1782 = vst [vmem:[%s2981_s7 + $0x1d8] sm:$0xff] %v1582_v27  ;;  %v1319_v29 = vadd.f32 %v1255_v33, %v3364_v50  ;;  %v1265_v6 = vmul.f32 %v2677_v60, %v1182_v26  ;;  %1514 = vst [vmem:[%s2981_s7 + $0xc0] sm:$0xff] %v1450_v56 }
 0x191   : > { %v1382_v38 = vmul.f32 %v1318_v30, %v1318_v30  ;;  %v1584_v49 = vadd.f32 %v1389_v18, %v1388_v17  ;;  %v1258_v15 = vmul.f32 %v2669_v9, %v1170_v19  ;;  %v1328_v32 = vadd.f32 %v1264_v31, %v2984_v42  ;;  %1519 = vst [vmem:[%s2981_s7 + $0xe8] sm:$0xff] %v1455_v23 }
 0x192   : > { %v1383_v5 = vmul.f32 %v1319_v29, %v1319_v29  ;;  %v1452_v63 = vadd.f32 %v1319_v29, %v1318_v30  ;;  %v1329_v36 = vadd.f32 %v1265_v6, %v2987_v10  ;;  %1779 = vst [vmem:[%s2981_s7 + $0x1c0] sm:$0xff] %v1579_v25  ;;  %v1259_v52 = vmul.f32 %v2677_v60, %v1170_v19 }
 0x193   : > { %v1178_v8 = vpop.permute.xlu1 %1177  ;;  %v1322_v43 = vadd.f32 %v1258_v15, %v3365_v48  ;;  %v1392_v59 = vmul.f32 %v1328_v32, %v1328_v32  ;;  %1784 = vst [vmem:[%s2981_s7 + $0x1e8] sm:$0xff] %v1584_v49 }
 0x194   : > { %v1262_v0 = vmul.f32 %v2669_v9, %v1178_v8  ;;  %v1581_v1 = vadd.f32 %v1383_v5, %v1382_v38  ;;  %v1393_v14 = vmul.f32 %v1329_v36, %v1329_v36  ;;  %v1457_v55 = vadd.f32 %v1329_v36, %v1328_v32  ;;  %1516 = vst [vmem:[%s2981_s7 + $0xd0] sm:$0xff] %v1452_v63 }
 0x195   : > { %v1323_v42 = vadd.f32 %v1259_v52, %v3366_v11  ;;  %v1386_v10 = vmul.f32 %v1322_v43, %v1322_v43  ;;  %v1263_v3 = vmul.f32 %v2677_v60, %v1178_v8 }
 0x196   : > { %v1586_v40 = vadd.f32 %v1393_v14, %v1392_v59  ;;  %v1326_v9 = vadd.f32 %v1262_v0, %v2921_v35  ;;  %1781 = vst [vmem:[%s2981_s7 + $0x1d0] sm:$0xff] %v1581_v1  ;;  %1521 = vst [vmem:[%s2981_s7 + $0xf8] sm:$0xff] %v1457_v55 }
 0x197   : > { %v1387_v46 = vmul.f32 %v1323_v42, %v1323_v42  ;;  %v1454_v57 = vadd.f32 %v1323_v42, %v1322_v43  ;;  %v1327_v54 = vadd.f32 %v1263_v3, %v2924_v20 }
 0x198   : > { %v1390_v53 = vmul.f32 %v1326_v9, %v1326_v9  ;;  %1786 = vst [vmem:[%s2981_s7 + $0x1f8] sm:$0xff] %v1586_v40 }
 0x199   : > { %v1583_v22 = vadd.f32 %v1387_v46, %v1386_v10  ;;  %v1391_v44 = vmul.f32 %v1327_v54, %v1327_v54  ;;  %v1456_v61 = vadd.f32 %v1327_v54, %v1326_v9  ;;  %1518 = vst [vmem:[%s2981_s7 + $0xe0] sm:$0xff] %v1454_v57 }
 0x19b   : > { %v1585_v60 = vadd.f32 %v1391_v44, %v1390_v53  ;;  %1783 = vst [vmem:[%s2981_s7 + $0x1e0] sm:$0xff] %v1583_v22  ;;  %1520 = vst [vmem:[%s2981_s7 + $0xf0] sm:$0xff] %v1456_v61 }
 0x19d   : > { %1785 = vst [vmem:[%s2981_s7 + $0x1f0] sm:$0xff] %v1585_v60 }
 0x19e PF: > { %s12_s11 = sadd.s32 1, %s1850_s11   ;;  %s3367_s9 = smov %s1846_s10 }
 0x19f   : > { %p9_p5 = scmp.ge.s32.totalorder %s12_s11, 4   ;;  %s3368_s10 = smov %s3370_s12 }
 0x1a1   :  { %11 = sbr.rel (!%p9_p5) target bundleno = 2 (0x2), region = 63 }

// kernel: basic_classify_head.3
= control target key start
LH: loop header
LB: loop body
LE: loop exit
PB: predicated region body
PF: predicated region fallthrough
CT: control target
= control target key end

     0   :  { %s3335_s18 = smov 0   ;;  %s3337_s19 = smov 0   ;;  %s5920_s0 = inlined_call_operand.vmem [shape: f32[2,4,256], index: 0, kind: input, shape index: {}]   ;;  %s5921_s1 = inlined_call_operand.vmem [shape: f32[256,4], index: 1, kind: input, shape index: {}]   ;;  %s5922_s2 = inlined_call_operand.vmem [shape: f32[256,1], index: 2, kind: input, shape index: {}]   ;;  %s5923_s3 = inlined_call_operand.vmem [shape: f32[256,1], index: 3, kind: input, shape index: {}]   ;;  %s5924_s4 = inlined_call_operand.vmem [shape: f32[2,2,256,128], index: 4, kind: input, shape index: {}]   ;;  %s5925_s5 = inlined_call_operand.vmem [shape: f32[2,256,1], index: 5, kind: output, shape index: {}]  }
   0x1   :  { %s3339_s20 = smov 0  }
   0x2 LB: > { %s27_s21 = sadd.s32 1, %s3295_s19  ;;  %p3070_p0 = scmp.ge.s32.totalorder %s3299_s20, 1  ;;  %s3299_s20 = sphi %s3339_s20, %s15_s20   ;;  %s3295_s19 = sphi %s3337_s19, %s6390_s19   ;;  %s3291_s18 = sphi %s3335_s18, %s6389_s18  }
   0x3   : > { %p29_p1 = scmp.ge.s32.totalorder %s27_s21, 2  ;;  %p206_p2 = scmp.lt.s32.totalorder %s3299_s20, 3 }
   0x5   : > { %s6392_s21 = smov (%p29_p1, %s27_s21), 0  ;;  %p207_p3 = pnand %p3070_p0, %p206_p2 }
   0x7   : > { %210 = sbr.rel (%p207_p3) target bundleno = 1020 (0x3fc), region = 40 }
   0xe   : > { %v259_v0 = vld [vmem:[%s5924_s4 + $0x10] sm:$0xff]  ;;  %v257_v2 = vld [vmem:[%s5924_s4] sm:$0xff]  ;;  %v260_v5 = vld [vmem:[%s5924_s4 + $0x18] sm:$0xff]  ;;  %vm1221_vm0 = vcmask 7168   ;;  %vm1092_vm1 = vcmask 31744   ;;  %p239_p4 = scmp.lt.s32.totalorder %s3291_s18, 1 }
   0xf   : > { %v3109_v1 = vld [vmem:[%s5924_s4 + $0x210] sm:$0xff]  ;;  %v3107_v4 = vld [vmem:[%s5924_s4 + $0x200] sm:$0xff]  ;;  %v3110_v6 = vld [vmem:[%s5924_s4 + $0x218] sm:$0xff] }
  0x10   : > { %v357_v3 = vadd.f32 %v3109_v1, %v259_v0  ;;  %v355_v7 = vadd.f32 %v3107_v4, %v257_v2  ;;  %v258_v8 = vld [vmem:[%s5924_s4 + $0x8] sm:$0xff]  ;;  %v358_v10 = vadd.f32 %v3110_v6, %v260_v5  ;;  %v261_v14 = vld [vmem:[%s5924_s4 + $0x20] sm:$0xff]  ;;  %v264_v18 = vld [vmem:[%s5924_s4 + $0x38] sm:$0xff]  ;;  %s6394_s18 = smov (!%p239_p4, %s3291_s18), 1 }
  0x11   : > { %v3108_v9 = vld [vmem:[%s5924_s4 + $0x208] sm:$0xff]  ;;  %v3111_v15 = vld [vmem:[%s5924_s4 + $0x220] sm:$0xff]  ;;  %v3114_v19 = vld [vmem:[%s5924_s4 + $0x238] sm:$0xff]  ;;  %s3173_s29 = sshll.u32 %s6394_s18, 3  ;;  %s3174_s8 = sshll.u32 %s6394_s18, 8 }
  0x12   : > { %456 = vadd.xlane.f32.xlu1 %v357_v3  ;;  %452 = vadd.xlane.f32.xlu0 %v355_v7  ;;  %v356_v11 = vadd.f32 %v3108_v9, %v258_v8  ;;  %v262_v12 = vld [vmem:[%s5924_s4 + $0x28] sm:$0xff]  ;;  %v359_v17 = vadd.f32 %v3111_v15, %v261_v14  ;;  %v263_v20 = vld [vmem:[%s5924_s4 + $0x30] sm:$0xff]  ;;  %v362_v22 = vadd.f32 %v3114_v19, %v264_v18  ;;  %v265_v26 = vld [vmem:[%s5924_s4 + $0x40] sm:$0xff]  ;;  %s246_s7 = scalar_lea.vmem %s5920_s0, %s3173_s29  ;;  %s5845_s11 = scalar_lea.vmem %s5925_s5, %s3174_s8 }
  0x13   : > { %v3112_v13 = vld [vmem:[%s5924_s4 + $0x228] sm:$0xff]  ;;  %v3113_v21 = vld [vmem:[%s5924_s4 + $0x230] sm:$0xff]  ;;  %v3115_v27 = vld [vmem:[%s5924_s4 + $0x240] sm:$0xff] }
  0x14   : > { %v360_v16 = vadd.f32 %v3112_v13, %v262_v12  ;;  %v361_v23 = vadd.f32 %v3113_v21, %v263_v20  ;;  %v266_v24 = vld [vmem:[%s5924_s4 + $0x48] sm:$0xff]  ;;  %v363_v29 = vadd.f32 %v3115_v27, %v265_v26  ;;  %v268_v30 = vld [vmem:[%s5924_s4 + $0x58] sm:$0xff]  ;;  %v267_v32 = vld [vmem:[%s5924_s4 + $0x50] sm:$0xff] }
  0x15   : > { %v3116_v25 = vld [vmem:[%s5924_s4 + $0x248] sm:$0xff]  ;;  %v3118_v31 = vld [vmem:[%s5924_s4 + $0x258] sm:$0xff]  ;;  %v3117_v33 = vld [vmem:[%s5924_s4 + $0x250] sm:$0xff] }
  0x16   : > { %458 = vadd.xlane.f32.xlu1 %v358_v10  ;;  %454 = vadd.xlane.f32.xlu0 %v356_v11  ;;  %v364_v28 = vadd.f32 %v3116_v25, %v266_v24  ;;  %v366_v34 = vadd.f32 %v3118_v31, %v268_v30  ;;  %v365_v35 = vadd.f32 %v3117_v33, %v267_v32  ;;  %v270_v36 = vld [vmem:[%s5924_s4 + $0x68] sm:$0xff]  ;;  %v269_v38 = vld [vmem:[%s5924_s4 + $0x60] sm:$0xff]  ;;  %v272_v42 = vld [vmem:[%s5924_s4 + $0x78] sm:$0xff] }
  0x17   : > { %v3120_v37 = vld [vmem:[%s5924_s4 + $0x268] sm:$0xff]  ;;  %v3119_v39 = vld [vmem:[%s5924_s4 + $0x260] sm:$0xff]  ;;  %v3122_v43 = vld [vmem:[%s5924_s4 + $0x278] sm:$0xff] }
  0x18   : > { %v368_v40 = vadd.f32 %v3120_v37, %v270_v36  ;;  %v367_v41 = vadd.f32 %v3119_v39, %v269_v38  ;;  %v271_v44 = vld [vmem:[%s5924_s4 + $0x70] sm:$0xff]  ;;  %v370_v46 = vadd.f32 %v3122_v43, %v272_v42  ;;  %v274_v48 = vld [vmem:[%s5924_s4 + $0x88] sm:$0xff]  ;;  %v273_v50 = vld [vmem:[%s5924_s4 + $0x80] sm:$0xff] }
  0x19   : > { %v3121_v45 = vld [vmem:[%s5924_s4 + $0x270] sm:$0xff]  ;;  %v3124_v49 = vld [vmem:[%s5924_s4 + $0x288] sm:$0xff]  ;;  %v3123_v51 = vld [vmem:[%s5924_s4 + $0x280] sm:$0xff] }
  0x1a   : > { %462 = vadd.xlane.f32.xlu1 %v360_v16  ;;  %460 = vadd.xlane.f32.xlu0 %v359_v17  ;;  %v369_v47 = vadd.f32 %v3121_v45, %v271_v44  ;;  %v372_v52 = vadd.f32 %v3124_v49, %v274_v48  ;;  %v371_v53 = vadd.f32 %v3123_v51, %v273_v50  ;;  %v276_v54 = vld [vmem:[%s5924_s4 + $0x98] sm:$0xff]  ;;  %v275_v56 = vld [vmem:[%s5924_s4 + $0x90] sm:$0xff]  ;;  %v278_v60 = vld [vmem:[%s5924_s4 + $0xa8] sm:$0xff] }
  0x1b   : > { %v3126_v55 = vld [vmem:[%s5924_s4 + $0x298] sm:$0xff]  ;;  %v3125_v57 = vld [vmem:[%s5924_s4 + $0x290] sm:$0xff]  ;;  %v3128_v61 = vld [vmem:[%s5924_s4 + $0x2a8] sm:$0xff] }
  0x1c   : > { %v374_v58 = vadd.f32 %v3126_v55, %v276_v54  ;;  %v373_v59 = vadd.f32 %v3125_v57, %v275_v56  ;;  %v277_v62 = vld [vmem:[%s5924_s4 + $0xa0] sm:$0xff]  ;;  %v376_v0 = vadd.f32 %v3128_v61, %v278_v60  ;;  %v280_v2 = vld [vmem:[%s5924_s4 + $0xb8] sm:$0xff]  ;;  %v279_v4 = vld [vmem:[%s5924_s4 + $0xb0] sm:$0xff] }
  0x1d   : > { %v3127_v63 = vld [vmem:[%s5924_s4 + $0x2a0] sm:$0xff]  ;;  %v3130_v3 = vld [vmem:[%s5924_s4 + $0x2b8] sm:$0xff]  ;;  %v3129_v5 = vld [vmem:[%s5924_s4 + $0x2b0] sm:$0xff] }
  0x1e   : > { %466 = vadd.xlane.f32.xlu1 %v362_v22  ;;  %464 = vadd.xlane.f32.xlu0 %v361_v23  ;;  %v375_v1 = vadd.f32 %v3127_v63, %v277_v62  ;;  %v378_v6 = vadd.f32 %v3130_v3, %v280_v2  ;;  %v377_v7 = vadd.f32 %v3129_v5, %v279_v4  ;;  %v282_v8 = vld [vmem:[%s5924_s4 + $0xc8] sm:$0xff]  ;;  %v281_v10 = vld [vmem:[%s5924_s4 + $0xc0] sm:$0xff]  ;;  %v284_v14 = vld [vmem:[%s5924_s4 + $0xd8] sm:$0xff] }
  0x1f   : > { %v3132_v9 = vld [vmem:[%s5924_s4 + $0x2c8] sm:$0xff]  ;;  %v3131_v11 = vld [vmem:[%s5924_s4 + $0x2c0] sm:$0xff]  ;;  %v3134_v15 = vld [vmem:[%s5924_s4 + $0x2d8] sm:$0xff] }
  0x20   : > { %v380_v12 = vadd.f32 %v3132_v9, %v282_v8  ;;  %v379_v13 = vadd.f32 %v3131_v11, %v281_v10  ;;  %v283_v16 = vld [vmem:[%s5924_s4 + $0xd0] sm:$0xff]  ;;  %v382_v18 = vadd.f32 %v3134_v15, %v284_v14  ;;  %v286_v20 = vld [vmem:[%s5924_s4 + $0xe8] sm:$0xff]  ;;  %v285_v22 = vld [vmem:[%s5924_s4 + $0xe0] sm:$0xff] }
  0x21   : > { %v3133_v17 = vld [vmem:[%s5924_s4 + $0x2d0] sm:$0xff]  ;;  %v3136_v21 = vld [vmem:[%s5924_s4 + $0x2e8] sm:$0xff]  ;;  %v3135_v23 = vld [vmem:[%s5924_s4 + $0x2e0] sm:$0xff] }
  0x22   : > { %470 = vadd.xlane.f32.xlu1 %v364_v28  ;;  %468 = vadd.xlane.f32.xlu0 %v363_v29  ;;  %v381_v19 = vadd.f32 %v3133_v17, %v283_v16  ;;  %v384_v24 = vadd.f32 %v3136_v21, %v286_v20  ;;  %v383_v25 = vadd.f32 %v3135_v23, %v285_v22  ;;  %v288_v26 = vld [vmem:[%s5924_s4 + $0xf8] sm:$0xff]  ;;  %v287_v28 = vld [vmem:[%s5924_s4 + $0xf0] sm:$0xff]  ;;  %v3076_v32 = vld [vmem:[%s5924_s4 + $0x108] sm:$0xff] }
  0x23   : > { %v3138_v27 = vld [vmem:[%s5924_s4 + $0x2f8] sm:$0xff]  ;;  %v3137_v29 = vld [vmem:[%s5924_s4 + $0x2f0] sm:$0xff]  ;;  %v3140_v33 = vld [vmem:[%s5924_s4 + $0x308] sm:$0xff] }
  0x24   : > { %v386_v30 = vadd.f32 %v3138_v27, %v288_v26  ;;  %v385_v31 = vadd.f32 %v3137_v29, %v287_v28  ;;  %v421_v36 = vadd.f32 %v3140_v33, %v3076_v32  ;;  %v3078_v38 = vld [vmem:[%s5924_s4 + $0x118] sm:$0xff]  ;;  %v3080_v44 = vld [vmem:[%s5924_s4 + $0x128] sm:$0xff]  ;;  %v5926_v32 = vmov 0  }
  0x25   : > { %v3142_v39 = vld [vmem:[%s5924_s4 + $0x318] sm:$0xff]  ;;  %v3144_v45 = vld [vmem:[%s5924_s4 + $0x328] sm:$0xff]  ;;  %3204 = vset.pattern.permute.xlu1 %v5926_v32  ;;  %3203 = vset.pattern.permute.xlu0 %v5926_v32 }
  0x26   : > { %474 = vadd.xlane.f32.xlu1 %v366_v34  ;;  %472 = vadd.xlane.f32.xlu0 %v365_v35  ;;  %v3075_v34 = vld [vmem:[%s5924_s4 + $0x100] sm:$0xff]  ;;  %v423_v42 = vadd.f32 %v3142_v39, %v3078_v38  ;;  %v425_v48 = vadd.f32 %v3144_v45, %v3080_v44  ;;  %v3082_v50 = vld [vmem:[%s5924_s4 + $0x138] sm:$0xff]  ;;  %v3084_v56 = vld [vmem:[%s5924_s4 + $0x148] sm:$0xff] }
  0x27   : > { %v3139_v35 = vld [vmem:[%s5924_s4 + $0x300] sm:$0xff]  ;;  %v3146_v51 = vld [vmem:[%s5924_s4 + $0x338] sm:$0xff]  ;;  %v3148_v57 = vld [vmem:[%s5924_s4 + $0x348] sm:$0xff] }
  0x28   : > { %v420_v37 = vadd.f32 %v3139_v35, %v3075_v34  ;;  %v427_v54 = vadd.f32 %v3146_v51, %v3082_v50  ;;  %v429_v60 = vadd.f32 %v3148_v57, %v3084_v56  ;;  %v3086_v62 = vld [vmem:[%s5924_s4 + $0x158] sm:$0xff]  ;;  %v3088_v4 = vld [vmem:[%s5924_s4 + $0x168] sm:$0xff]  ;;  %v3161_v38 = vld [vmem:[%s5924_s4 + $0x3b0] sm:$0xff] }
  0x29   : > { %v3150_v63 = vld [vmem:[%s5924_s4 + $0x358] sm:$0xff]  ;;  %v3152_v5 = vld [vmem:[%s5924_s4 + $0x368] sm:$0xff]  ;;  %v3163_v44 = vld [vmem:[%s5924_s4 + $0x3c0] sm:$0xff] }
  0x2a   : > { %478 = vadd.xlane.f32.xlu1 %v368_v40  ;;  %476 = vadd.xlane.f32.xlu0 %v367_v41  ;;  %v3077_v40 = vld [vmem:[%s5924_s4 + $0x110] sm:$0xff]  ;;  %v431_v2 = vadd.f32 %v3150_v63, %v3086_v62  ;;  %v433_v8 = vadd.f32 %v3152_v5, %v3088_v4  ;;  %v3090_v10 = vld [vmem:[%s5924_s4 + $0x178] sm:$0xff]  ;;  %v3092_v16 = vld [vmem:[%s5924_s4 + $0x188] sm:$0xff] }
  0x2b   : > { %v3141_v41 = vld [vmem:[%s5924_s4 + $0x310] sm:$0xff]  ;;  %v3154_v11 = vld [vmem:[%s5924_s4 + $0x378] sm:$0xff]  ;;  %v3156_v17 = vld [vmem:[%s5924_s4 + $0x388] sm:$0xff] }
  0x2c   : > { %v422_v43 = vadd.f32 %v3141_v41, %v3077_v40  ;;  %v435_v14 = vadd.f32 %v3154_v11, %v3090_v10  ;;  %v437_v20 = vadd.f32 %v3156_v17, %v3092_v16  ;;  %v3094_v22 = vld [vmem:[%s5924_s4 + $0x198] sm:$0xff]  ;;  %v3096_v28 = vld [vmem:[%s5924_s4 + $0x1a8] sm:$0xff]  ;;  %v3165_v50 = vld [vmem:[%s5924_s4 + $0x3d0] sm:$0xff] }
  0x2d   : > { %v3158_v23 = vld [vmem:[%s5924_s4 + $0x398] sm:$0xff]  ;;  %v3160_v29 = vld [vmem:[%s5924_s4 + $0x3a8] sm:$0xff]  ;;  %v3167_v56 = vld [vmem:[%s5924_s4 + $0x3e0] sm:$0xff] }
  0x2e   : > { %482 = vadd.xlane.f32.xlu1 %v370_v46  ;;  %480 = vadd.xlane.f32.xlu0 %v369_v47  ;;  %v3079_v46 = vld [vmem:[%s5924_s4 + $0x120] sm:$0xff]  ;;  %v439_v26 = vadd.f32 %v3158_v23, %v3094_v22  ;;  %v441_v33 = vadd.f32 %v3160_v29, %v3096_v28  ;;  %v3098_v35 = vld [vmem:[%s5924_s4 + $0x1b8] sm:$0xff]  ;;  %v3100_v41 = vld [vmem:[%s5924_s4 + $0x1c8] sm:$0xff] }
  0x2f   : > { %v3143_v47 = vld [vmem:[%s5924_s4 + $0x320] sm:$0xff]  ;;  %v3169_v62 = vld [vmem:[%s5924_s4 + $0x3f0] sm:$0xff] }
  0x30   : > { %v424_v49 = vadd.f32 %v3143_v47, %v3079_v46  ;;  %v3102_v47 = vld [vmem:[%s5924_s4 + $0x1d8] sm:$0xff] }
  0x32   : > { %486 = vadd.xlane.f32.xlu1 %v372_v52  ;;  %484 = vadd.xlane.f32.xlu0 %v371_v53  ;;  %v3081_v52 = vld [vmem:[%s5924_s4 + $0x130] sm:$0xff] }
  0x33   : > { %v3145_v53 = vld [vmem:[%s5924_s4 + $0x330] sm:$0xff] }
  0x34   : > { %v426_v55 = vadd.f32 %v3145_v53, %v3081_v52  ;;  %v3104_v53 = vld [vmem:[%s5924_s4 + $0x1e8] sm:$0xff] }
  0x36   : > { %490 = vadd.xlane.f32.xlu1 %v374_v58  ;;  %488 = vadd.xlane.f32.xlu0 %v373_v59  ;;  %v3083_v58 = vld [vmem:[%s5924_s4 + $0x140] sm:$0xff] }
  0x37   : > { %v3147_v59 = vld [vmem:[%s5924_s4 + $0x340] sm:$0xff] }
  0x38   : > { %v428_v61 = vadd.f32 %v3147_v59, %v3083_v58  ;;  %v3106_v59 = vld [vmem:[%s5924_s4 + $0x1f8] sm:$0xff] }
  0x3a   : > { %494 = vadd.xlane.f32.xlu1 %v376_v0  ;;  %492 = vadd.xlane.f32.xlu0 %v375_v1  ;;  %v3085_v0 = vld [vmem:[%s5924_s4 + $0x150] sm:$0xff] }
  0x3b   : > { %v3149_v1 = vld [vmem:[%s5924_s4 + $0x350] sm:$0xff] }
  0x3c   : > { %v430_v3 = vadd.f32 %v3149_v1, %v3085_v0 }
  0x3e   : > { %498 = vadd.xlane.f32.xlu1 %v378_v6  ;;  %496 = vadd.xlane.f32.xlu0 %v377_v7  ;;  %v3087_v6 = vld [vmem:[%s5924_s4 + $0x160] sm:$0xff] }
  0x3f   : > { %v3151_v7 = vld [vmem:[%s5924_s4 + $0x360] sm:$0xff] }
  0x40   : > { %v432_v9 = vadd.f32 %v3151_v7, %v3087_v6 }
  0x42   : > { %502 = vadd.xlane.f32.xlu1 %v380_v12  ;;  %500 = vadd.xlane.f32.xlu0 %v379_v13  ;;  %v3089_v12 = vld [vmem:[%s5924_s4 + $0x170] sm:$0xff] }
  0x43   : > { %v3153_v13 = vld [vmem:[%s5924_s4 + $0x370] sm:$0xff] }
  0x44   : > { %v434_v15 = vadd.f32 %v3153_v13, %v3089_v12 }
  0x46   : > { %506 = vadd.xlane.f32.xlu1 %v382_v18  ;;  %504 = vadd.xlane.f32.xlu0 %v381_v19  ;;  %v3091_v18 = vld [vmem:[%s5924_s4 + $0x180] sm:$0xff] }
  0x47   : > { %v3155_v19 = vld [vmem:[%s5924_s4 + $0x380] sm:$0xff] }
  0x48   : > { %v436_v21 = vadd.f32 %v3155_v19, %v3091_v18 }
  0x4a   : > { %510 = vadd.xlane.f32.xlu1 %v384_v24  ;;  %508 = vadd.xlane.f32.xlu0 %v383_v25  ;;  %v3093_v24 = vld [vmem:[%s5924_s4 + $0x190] sm:$0xff] }
  0x4b   : > { %v3157_v25 = vld [vmem:[%s5924_s4 + $0x390] sm:$0xff] }
  0x4c   : > { %v438_v27 = vadd.f32 %v3157_v25, %v3093_v24 }
  0x4e   : > { %514 = vadd.xlane.f32.xlu1 %v386_v30  ;;  %512 = vadd.xlane.f32.xlu0 %v385_v31  ;;  %v3095_v30 = vld [vmem:[%s5924_s4 + $0x1a0] sm:$0xff] }
  0x4f   : > { %v3159_v31 = vld [vmem:[%s5924_s4 + $0x3a0] sm:$0xff] }
  0x50   : > { %v440_v34 = vadd.f32 %v3159_v31, %v3095_v30 }
  0x52   : > { %518 = vadd.xlane.f32.xlu1 %v421_v36  ;;  %516 = vadd.xlane.f32.xlu0 %v420_v37  ;;  %v3162_v36 = vld [vmem:[%s5924_s4 + $0x3b8] sm:$0xff]  ;;  %v3097_v37 = vld [vmem:[%s5924_s4 + $0x1b0] sm:$0xff] }
  0x53   : > { %v443_v39 = vadd.f32 %v3162_v36, %v3098_v35  ;;  %v442_v40 = vadd.f32 %v3161_v38, %v3097_v37 }
  0x56   : > { %522 = vadd.xlane.f32.xlu1 %v423_v42  ;;  %520 = vadd.xlane.f32.xlu0 %v422_v43  ;;  %v3164_v42 = vld [vmem:[%s5924_s4 + $0x3c8] sm:$0xff]  ;;  %v3099_v43 = vld [vmem:[%s5924_s4 + $0x1c0] sm:$0xff] }
  0x57   : > { %v445_v45 = vadd.f32 %v3164_v42, %v3100_v41  ;;  %v444_v46 = vadd.f32 %v3163_v44, %v3099_v43 }
  0x5a   : > { %526 = vadd.xlane.f32.xlu1 %v425_v48  ;;  %524 = vadd.xlane.f32.xlu0 %v424_v49  ;;  %v3166_v48 = vld [vmem:[%s5924_s4 + $0x3d8] sm:$0xff]  ;;  %v3101_v49 = vld [vmem:[%s5924_s4 + $0x1d0] sm:$0xff] }
  0x5b   : > { %v447_v51 = vadd.f32 %v3166_v48, %v3102_v47  ;;  %v446_v52 = vadd.f32 %v3165_v50, %v3101_v49 }
  0x5e   : > { %530 = vadd.xlane.f32.xlu1 %v427_v54  ;;  %528 = vadd.xlane.f32.xlu0 %v426_v55  ;;  %v3168_v54 = vld [vmem:[%s5924_s4 + $0x3e8] sm:$0xff]  ;;  %v3103_v55 = vld [vmem:[%s5924_s4 + $0x1e0] sm:$0xff] }
  0x5f   : > { %v449_v57 = vadd.f32 %v3168_v54, %v3104_v53  ;;  %v448_v58 = vadd.f32 %v3167_v56, %v3103_v55 }
  0x62   : > { %534 = vadd.xlane.f32.xlu1 %v429_v60  ;;  %532 = vadd.xlane.f32.xlu0 %v428_v61  ;;  %v3170_v60 = vld [vmem:[%s5924_s4 + $0x3f8] sm:$0xff]  ;;  %v3105_v61 = vld [vmem:[%s5924_s4 + $0x1f0] sm:$0xff] }
  0x63   : > { %v451_v63 = vadd.f32 %v3170_v60, %v3106_v59  ;;  %v450_v0 = vadd.f32 %v3169_v62, %v3105_v61 }
  0x66   : > { %538 = vadd.xlane.f32.xlu1 %v431_v2  ;;  %536 = vadd.xlane.f32.xlu0 %v430_v3 }
  0x6a   : > { %542 = vadd.xlane.f32.xlu1 %v433_v8  ;;  %540 = vadd.xlane.f32.xlu0 %v432_v9 }
  0x6e   : > { %546 = vadd.xlane.f32.xlu1 %v435_v14  ;;  %544 = vadd.xlane.f32.xlu0 %v434_v15 }
  0x72   : > { %550 = vadd.xlane.f32.xlu1 %v437_v20  ;;  %548 = vadd.xlane.f32.xlu0 %v436_v21 }
  0x76   : > { %554 = vadd.xlane.f32.xlu1 %v439_v26  ;;  %552 = vadd.xlane.f32.xlu0 %v438_v27 }
  0x7a   : > { %558 = vadd.xlane.f32.xlu1 %v441_v33  ;;  %556 = vadd.xlane.f32.xlu0 %v440_v34 }
  0x7e   : > { %562 = vadd.xlane.f32.xlu1 %v443_v39  ;;  %560 = vadd.xlane.f32.xlu0 %v442_v40 }
  0x82   : > { %566 = vadd.xlane.f32.xlu1 %v445_v45  ;;  %564 = vadd.xlane.f32.xlu0 %v444_v46 }
  0x86   : > { %570 = vadd.xlane.f32.xlu1 %v447_v51  ;;  %568 = vadd.xlane.f32.xlu0 %v446_v52 }
  0x8a   : > { %574 = vadd.xlane.f32.xlu1 %v449_v57  ;;  %572 = vadd.xlane.f32.xlu0 %v448_v58 }
  0x8e   : > { %578 = vadd.xlane.f32.xlu1 %v451_v63  ;;  %576 = vadd.xlane.f32.xlu0 %v450_v0 }
  0x9f   : > { %v457_v1 = vpop.xlane.xlu1 %456  ;;  %v453_v2 = vpop.xlane.xlu0 %452 }
  0xa0   : > { %v3751_v30 = vmul.f32 0.001953125, %v457_v1  ;;  %v3753_v31 = vmul.f32 0.001953125, %v453_v2 }
  0xa2   : > { %v646_v41 = vmul.f32 %v3751_v30, %v3751_v30  ;;  %v644_v42 = vmul.f32 %v3753_v31, %v3753_v31 }
  0xa3   : > { %v459_v3 = vpop.xlane.xlu1 %458  ;;  %v455_v4 = vpop.xlane.xlu0 %454 }
  0xa4   : > { %v3757_v34 = vmul.f32 0.001953125, %v459_v3  ;;  %v3759_v35 = vmul.f32 0.001953125, %v455_v4 }
  0xa6   : > { %v647_v46 = vmul.f32 %v3757_v34, %v3757_v34  ;;  %v645_v47 = vmul.f32 %v3759_v35, %v3759_v35 }
  0xa7   : > { %v463_v5 = vpop.xlane.xlu1 %462  ;;  %v461_v6 = vpop.xlane.xlu0 %460 }
  0xa8   : > { %v3761_v36 = vmul.f32 0.001953125, %v463_v5  ;;  %v3763_v37 = vmul.f32 0.001953125, %v461_v6 }
  0xaa   : > { %v3791_v50 = vmul.f32 %v3761_v36, %v3761_v36  ;;  %v3801_v54 = vmul.f32 %v3763_v37, %v3763_v37 }
  0xab   : > { %v467_v7 = vpop.xlane.xlu1 %466  ;;  %v465_v8 = vpop.xlane.xlu0 %464 }
  0xac   : > { %v3765_v38 = vmul.f32 0.001953125, %v467_v7  ;;  %v3767_v39 = vmul.f32 0.001953125, %v465_v8 }
  0xae   : > { %v3805_v55 = vmul.f32 %v3765_v38, %v3765_v38  ;;  %v3809_v56 = vmul.f32 %v3767_v39, %v3767_v39 }
  0xaf   : > { %v471_v9 = vpop.xlane.xlu1 %470  ;;  %v469_v10 = vpop.xlane.xlu0 %468 }
  0xb0   : > { %v3775_v43 = vmul.f32 0.001953125, %v471_v9  ;;  %v3777_v44 = vmul.f32 0.001953125, %v469_v10 }
  0xb2   : > { %v3815_v59 = vmul.f32 %v3775_v43, %v3775_v43  ;;  %v3819_v60 = vmul.f32 %v3777_v44, %v3777_v44 }
  0xb3   : > { %v475_v11 = vpop.xlane.xlu1 %474  ;;  %v473_v12 = vpop.xlane.xlu0 %472 }
  0xb4   : > { %v3785_v48 = vmul.f32 0.001953125, %v475_v11  ;;  %v3787_v49 = vmul.f32 0.001953125, %v473_v12 }
  0xb6   : > { %v3825_v0 = vmul.f32 %v3785_v48, %v3785_v48  ;;  %v3829_v1 = vmul.f32 %v3787_v49, %v3787_v49 }
  0xb7   : > { %v479_v13 = vpop.xlane.xlu1 %478  ;;  %v477_v14 = vpop.xlane.xlu0 %476 }
  0xb8   : > { %v3793_v51 = vmul.f32 0.001953125, %v479_v13  ;;  %v3795_v52 = vmul.f32 0.001953125, %v477_v14 }
  0xba   : > { %v3835_v4 = vmul.f32 %v3793_v51, %v3793_v51  ;;  %v3839_v5 = vmul.f32 %v3795_v52, %v3795_v52 }
  0xbb   : > { %v483_v15 = vpop.xlane.xlu1 %482  ;;  %v481_v16 = vpop.xlane.xlu0 %480 }
  0xbc   : > { %v3797_v53 = vmul.f32 0.001953125, %v483_v15  ;;  %v3811_v57 = vmul.f32 0.001953125, %v481_v16 }
  0xbe   : > { %v3843_v6 = vmul.f32 %v3797_v53, %v3797_v53  ;;  %v3847_v8 = vmul.f32 %v3811_v57, %v3811_v57 }
  0xbf   : > { %v487_v17 = vpop.xlane.xlu1 %486  ;;  %v485_v18 = vpop.xlane.xlu0 %484 }
  0xc0   : > { %v3821_v61 = vmul.f32 0.001953125, %v487_v17  ;;  %v3831_v2 = vmul.f32 0.001953125, %v485_v18 }
  0xc2   : > { %v3855_v13 = vmul.f32 %v3821_v61, %v3821_v61  ;;  %v3861_v18 = vmul.f32 %v3831_v2, %v3831_v2 }
  0xc3   : > { %v491_v19 = vpop.xlane.xlu1 %490  ;;  %v489_v20 = vpop.xlane.xlu0 %488 }
  0xc4   : > { %v3849_v9 = vmul.f32 0.001953125, %v491_v19  ;;  %v3851_v10 = vmul.f32 0.001953125, %v489_v20 }
  0xc6   : > { %6016 = vst [vmem:[#allocation5_spill] sm:$0xff] %v3851_v10 }
  0xc7   : > { %v495_v21 = vpop.xlane.xlu1 %494  ;;  %v493_v22 = vpop.xlane.xlu0 %492 }
  0xc8   : > { %v3857_v14 = vmul.f32 0.001953125, %v495_v21  ;;  %v3871_v21 = vmul.f32 %v3849_v9, %v3849_v9 }
  0xcb   : > { %v499_v23 = vpop.xlane.xlu1 %498  ;;  %v497_v24 = vpop.xlane.xlu0 %496 }
  0xcf   : > { %v3741_v25 = vpop.xlane.xlu1 %502  ;;  %v3743_v26 = vpop.xlane.xlu0 %500 }
  0xd3   : > { %v3745_v27 = vpop.xlane.xlu1 %506  ;;  %v3747_v28 = vpop.xlane.xlu0 %504 }
  0xd4   : > { %v3902_v32 = vmul.f32 0.001953125, %v3745_v27 }
  0xd6   : > { %6022 = vst [vmem:[#allocation11_spill] sm:$0xff] %v3902_v32 }
  0xd7   : > { %v3749_v29 = vpop.xlane.xlu1 %510  ;;  %v3755_v33 = vpop.xlane.xlu0 %508 }
  0xdb   : > { %v3769_v40 = vpop.xlane.xlu1 %514  ;;  %v3779_v45 = vpop.xlane.xlu0 %512 }
  0xdf   : > { %v519_v58 = vpop.xlane.xlu1 %518  ;;  %v517_v63 = vpop.xlane.xlu0 %516 }
  0xe0   : > { %v613_v62 = vmul.f32 0.001953125, %v519_v58  ;;  %v612_v3 = vmul.f32 0.001953125, %v517_v63  ;;  %v3865_v58 = vmul.f32 0.001953125, %v499_v23 }
  0xe2   : > { %v677_v7 = vsub.f32 %v613_v62, %v645_v47  ;;  %v676_v11 = vsub.f32 %v612_v3, %v644_v42  ;;  %v3863_v47 = vmul.f32 0.001953125, %v493_v22  ;;  %6018 = vst [vmem:[#allocation7_spill] sm:$0xff] %v3865_v58  ;;  %v3867_v42 = vmul.f32 0.001953125, %v497_v24 }
  0xe3   : > { %v523_v12 = vpop.xlane.xlu1 %522  ;;  %v521_v17 = vpop.xlane.xlu0 %520  ;;  %v3875_v3 = vmul.f32 %v3851_v10, %v3851_v10 }
  0xe4   : > { %v709_v15 = vmax.f32 %v677_v7, 0.0  ;;  %v615_v16 = vmul.f32 0.001953125, %v523_v12  ;;  %6017 = vst [vmem:[#allocation6_spill] sm:$0xff] %v3863_v47  ;;  %v708_v19 = vmax.f32 %v676_v11, 0.0  ;;  %v614_v20 = vmul.f32 0.001953125, %v521_v17  ;;  %6019 = vst [vmem:[#allocation8_spill] sm:$0xff] %v3867_v42 }
  0xe5   : > { %v3879_v11 = vmul.f32 %v3857_v14, %v3857_v14 }
  0xe6   : > { %v773_v62 = vadd.f32 1e-05, %v709_v15  ;;  %v679_v63 = vsub.f32 %v615_v16, %v647_v46  ;;  %v772_v7 = vadd.f32 1e-05, %v708_v19  ;;  %v678_v12 = vsub.f32 %v614_v20, %v646_v41 }
  0xe7   : > { %v527_v22 = vpop.xlane.xlu1 %526  ;;  %v525_v15 = vpop.xlane.xlu0 %524  ;;  %v3883_v46 = vmul.f32 %v3863_v47, %v3863_v47  ;;  %v3887_v19 = vmul.f32 %v3865_v58, %v3865_v58  ;;  %v3891_v41 = vmul.f32 %v3867_v42, %v3867_v42 }
  0xe8   : > { %3213 = vrsqrt.f32 %v773_v62  ;;  %v711_v23 = vmax.f32 %v679_v63, 0.0  ;;  %v617_v24 = vmul.f32 0.001953125, %v527_v22  ;;  %v710_v16 = vmax.f32 %v678_v12, 0.0 }
  0xe9   : > { %3215 = vrsqrt.f32 %v772_v7  ;;  %v616_v17 = vmul.f32 0.001953125, %v525_v15  ;;  %v3895_v63 = vmul.f32 0.001953125, %v3741_v25  ;;  %v3898_v22 = vmul.f32 0.001953125, %v3743_v26 }
  0xea   : > { %v775_v20 = vadd.f32 1e-05, %v711_v23  ;;  %v681_v62 = vsub.f32 %v617_v24, %v3791_v50  ;;  %v774_v7 = vadd.f32 1e-05, %v710_v16  ;;  %v3905_v23 = vmul.f32 0.001953125, %v3747_v28 }
  0xeb   : > { %6020 = vst [vmem:[#allocation9_spill] sm:$0xff] %v3895_v63  ;;  %6021 = vst [vmem:[#allocation10_spill] sm:$0xff] %v3898_v22  ;;  %v680_v12 = vsub.f32 %v616_v17, %v3801_v54  ;;  %v531_v15 = vpop.xlane.xlu1 %530  ;;  %v529_v47 = vpop.xlane.xlu0 %528  ;;  %v3908_v26 = vmul.f32 0.001953125, %v3749_v29  ;;  %v3911_v24 = vmul.f32 0.001953125, %v3755_v33  ;;  %v3916_v16 = vmul.f32 %v3895_v63, %v3895_v63 }
  0xec   : > { %3217 = vrsqrt.f32 %v775_v20  ;;  %v713_v58 = vmax.f32 %v681_v62, 0.0  ;;  %v619_v42 = vmul.f32 0.001953125, %v531_v15  ;;  %6023 = vst [vmem:[#allocation12_spill] sm:$0xff] %v3905_v23  ;;  %v618_v50 = vmul.f32 0.001953125, %v529_v47  ;;  %v741_v20 = vld [vmem:[%s5922_s2 + $0x8] sm:$0xff] }
  0xed   : > { %3219 = vrsqrt.f32 %v774_v7  ;;  %v712_v25 = vmax.f32 %v680_v12, 0.0  ;;  %6024 = vst [vmem:[#allocation13_spill] sm:$0xff] %v3908_v26  ;;  %6025 = vst [vmem:[#allocation14_spill] sm:$0xff] %v3911_v24  ;;  %v3920_v28 = vmul.f32 %v3898_v22, %v3898_v22  ;;  %v3925_v33 = vmul.f32 %v3902_v32, %v3902_v32  ;;  %v740_v12 = vld [vmem:[%s5922_s2] sm:$0xff] }
  0xee   : > { %v777_v54 = vadd.f32 1e-05, %v713_v58  ;;  %v683_v27 = vsub.f32 %v619_v42, %v3805_v55  ;;  %v682_v47 = vsub.f32 %v618_v50, %v3809_v56  ;;  %v3932_v62 = vmul.f32 %v3905_v23, %v3905_v23 }
  0xef   : > { %v776_v17 = vadd.f32 1e-05, %v712_v25  ;;  %v535_v29 = vpop.xlane.xlu1 %534  ;;  %v533_v42 = vpop.xlane.xlu0 %532  ;;  %v3939_v25 = vmul.f32 %v3908_v26, %v3908_v26  ;;  %v3943_v50 = vmul.f32 %v3911_v24, %v3911_v24  ;;  %v1126_v24 = vld [vmem:[%s5923_s3 + $0x8] sm:$0xff] }
  0xf0   : > { %3221 = vrsqrt.f32 %v777_v54  ;;  %v715_v58 = vmax.f32 %v683_v27, 0.0  ;;  %v621_v55 = vmul.f32 0.001953125, %v535_v29  ;;  %v714_v7 = vmax.f32 %v682_v47, 0.0 }
  0xf1   : > { %3223 = vrsqrt.f32 %v776_v17  ;;  %v620_v56 = vmul.f32 0.001953125, %v533_v42  ;;  %v3947_v17 = vmul.f32 0.001953125, %v3769_v40 }
  0xf2   : > { %v3214_v15 = vpop.eup %3213  ;;  %v779_v54 = vadd.f32 1e-05, %v715_v58  ;;  %v685_v27 = vsub.f32 %v621_v55, %v3815_v59  ;;  %v778_v47 = vadd.f32 1e-05, %v714_v7  ;;  %v743_v59 = vld [vmem:[%s5922_s2 + $0x18] sm:$0xff]  ;;  %v3961_v7 = vmul.f32 0.001953125, %v3779_v45 }
  0xf3   : > { %v3216_v29 = vpop.eup %3215  ;;  %v684_v42 = vsub.f32 %v620_v56, %v3819_v60  ;;  %v539_v23 = vpop.xlane.xlu1 %538  ;;  %v837_v32 = vmul.f32 %v3214_v15, %v741_v20 }
  0xf4   : > { %3225 = vrsqrt.f32 %v779_v54  ;;  %v717_v22 = vmax.f32 %v685_v27, 0.0  ;;  %v623_v26 = vmul.f32 0.001953125, %v539_v23  ;;  %v537_v63 = vpop.xlane.xlu0 %536  ;;  %v836_v58 = vmul.f32 %v3216_v29, %v740_v12  ;;  %v1125_v23 = vld [vmem:[%s5923_s3] sm:$0xff] }
  0xf5   : > { %3227 = vrsqrt.f32 %v778_v47  ;;  %v716_v40 = vmax.f32 %v684_v42, 0.0  ;;  %v622_v55 = vmul.f32 0.001953125, %v537_v63  ;;  %907 = vperm.xlu1 %3204, %v837_v32   ;;  %v1158_v60 = vmul.f32 %v837_v32, %v3759_v35  ;;  %v742_v63 = vld [vmem:[%s5922_s2 + $0x10] sm:$0xff] }
  0xf6   : > { %v3218_v20 = vpop.eup %3217  ;;  %v781_v56 = vadd.f32 1e-05, %v717_v22  ;;  %v687_v12 = vsub.f32 %v623_v26, %v3825_v0  ;;  %902 = vperm.xlu0 %3203, %v836_v58   ;;  %v1157_v15 = vmul.f32 %v836_v58, %v3753_v31  ;;  %v745_v31 = vld [vmem:[%s5922_s2 + $0x28] sm:$0xff]  ;;  %v3974_v0 = vmul.f32 %v3947_v17, %v3947_v17  ;;  %v1128_v58 = vld [vmem:[%s5923_s3 + $0x18] sm:$0xff] }
  0xf7   : > { %v3220_v54 = vpop.eup %3219  ;;  %v780_v32 = vadd.f32 1e-05, %v716_v40  ;;  %v686_v35 = vsub.f32 %v622_v55, %v3829_v1  ;;  %v1190_v27 = vsub.f32 %v1126_v24, %v1158_v60  ;;  %v543_v29 = vpop.xlane.xlu1 %542  ;;  %v839_v47 = vmul.f32 %v3218_v20, %v743_v59  ;;  %v1127_v60 = vld [vmem:[%s5923_s3 + $0x10] sm:$0xff] }
  0xf8   : > { %3229 = vrsqrt.f32 %v781_v56  ;;  %v719_v45 = vmax.f32 %v687_v12, 0.0  ;;  %v1189_v42 = vsub.f32 %v1125_v23, %v1157_v15  ;;  %v625_v22 = vmul.f32 0.001953125, %v543_v29  ;;  %v541_v10 = vpop.xlane.xlu0 %540 }
  0xf9   : > { %v718_v26 = vmax.f32 %v686_v35, 0.0  ;;  %1223 = vst.msk [vmem:[#allocation3 + $0x8] sm:$0xff] %vm1221_vm0, %v1190_v27  ;;  %v624_v1 = vmul.f32 0.001953125, %v541_v10  ;;  %v838_v24 = vmul.f32 %v3220_v54, %v742_v63  ;;  %3231 = vrsqrt.f32 %v780_v32  ;;  %v744_v63 = vld [vmem:[%s5922_s2 + $0x20] sm:$0xff] }
  0xfa   : > { %v3222_v59 = vpop.eup %3221  ;;  %v783_v40 = vadd.f32 1e-05, %v719_v45  ;;  %1222 = vst.msk [vmem:[#allocation3] sm:$0xff] %vm1221_vm0, %v1189_v42  ;;  %v689_v55 = vsub.f32 %v625_v22, %v3835_v4  ;;  %v1160_v23 = vmul.f32 %v839_v47, %v3757_v34  ;;  %v747_v34 = vld [vmem:[%s5922_s2 + $0x38] sm:$0xff] }
  0xfb   : > { %v3224_v20 = vpop.eup %3223  ;;  %v782_v10 = vadd.f32 1e-05, %v718_v26  ;;  %v688_v56 = vsub.f32 %v624_v1, %v3839_v5  ;;  %912 = vperm.xlu1 %3204, %v838_v24   ;;  %v1159_v12 = vmul.f32 %v838_v24, %v3751_v30  ;;  %v547_v15 = vpop.xlane.xlu1 %546  ;;  %v3991_v54 = vmul.f32 %v3222_v59, %v745_v31  ;;  %v1130_v26 = vld [vmem:[%s5923_s3 + $0x28] sm:$0xff] }
  0xfc   : > { %3233 = vrsqrt.f32 %v783_v40  ;;  %v721_v4 = vmax.f32 %v689_v55, 0.0  ;;  %v627_v32 = vmul.f32 0.001953125, %v547_v15  ;;  %v545_v35 = vpop.xlane.xlu0 %544  ;;  %v1192_v27 = vsub.f32 %v1128_v58, %v1160_v23  ;;  %v1129_v55 = vld [vmem:[%s5923_s3 + $0x20] sm:$0xff] }
  0xfd   : > { %3235 = vrsqrt.f32 %v782_v10  ;;  %v720_v5 = vmax.f32 %v688_v56, 0.0  ;;  %v1191_v29 = vsub.f32 %v1127_v60, %v1159_v12  ;;  %v626_v30 = vmul.f32 0.001953125, %v545_v35 }
  0xfe   : > { %v3226_v45 = vpop.eup %3225  ;;  %v785_v42 = vadd.f32 1e-05, %v721_v4  ;;  %v691_v22 = vsub.f32 %v627_v32, %v3843_v6  ;;  %1225 = vst.msk [vmem:[#allocation3 + $0x18] sm:$0xff] %vm1221_vm0, %v1192_v27  ;;  %v840_v31 = vmul.f32 %v3224_v20, %v744_v63  ;;  %v1162_v1 = vmul.f32 %v3991_v54, %v3761_v36  ;;  %v746_v36 = vld [vmem:[%s5922_s2 + $0x30] sm:$0xff] }
  0xff   : > { %v3228_v24 = vpop.eup %3227  ;;  %v4005_v58 = vmul.f32 %v3961_v7, %v3961_v7  ;;  %v784_v59 = vadd.f32 1e-05, %v720_v5  ;;  %1224 = vst.msk [vmem:[#allocation3 + $0x10] sm:$0xff] %vm1221_vm0, %v1191_v29  ;;  %v690_v6 = vsub.f32 %v626_v30, %v3847_v8  ;;  %917 = vperm.xlu1 %3204, %v839_v47   ;;  %v551_v40 = vpop.xlane.xlu1 %550  ;;  %v4015_v60 = vmul.f32 %v3226_v45, %v747_v34  ;;  %v749_v8 = vld [vmem:[%s5922_s2 + $0x48] sm:$0xff]  ;;  %v1131_v30 = vld [vmem:[%s5923_s3 + $0x30] sm:$0xff]  ;;  %v1132_v45 = vld [vmem:[%s5923_s3 + $0x38] sm:$0xff] }
 0x100   : > { %3237 = vrsqrt.f32 %v785_v42  ;;  %v723_v23 = vmax.f32 %v691_v22, 0.0  ;;  %v629_v20 = vmul.f32 0.001953125, %v551_v40  ;;  %v549_v10 = vpop.xlane.xlu0 %548  ;;  %v1161_v56 = vmul.f32 %v840_v31, %v3763_v37  ;;  %v748_v40 = vld [vmem:[%s5922_s2 + $0x40] sm:$0xff] }
 0x101   : > { %3239 = vrsqrt.f32 %v784_v59  ;;  %v722_v47 = vmax.f32 %v690_v6, 0.0  ;;  %v628_v12 = vmul.f32 0.001953125, %v549_v10  ;;  %v1194_v15 = vsub.f32 %v1130_v26, %v1162_v1  ;;  %v1134_v26 = vld [vmem:[%s5923_s3 + $0x48] sm:$0xff]  ;;  %v751_v1 = vld [vmem:[%s5922_s2 + $0x58] sm:$0xff] }
 0x102   : > { %v3230_v63 = vpop.eup %3229  ;;  %v787_v4 = vadd.f32 1e-05, %v723_v23  ;;  %v693_v32 = vsub.f32 %v629_v20, %v3855_v13  ;;  %v1193_v35 = vsub.f32 %v1129_v55, %v1161_v56  ;;  %v4022_v27 = vmul.f32 %v3228_v24, %v746_v36 }
 0x103   : > { %v786_v34 = vadd.f32 1e-05, %v722_v47  ;;  %v692_v5 = vsub.f32 %v628_v12, %v3861_v18  ;;  %922 = vperm.xlu1 %3204, %v840_v31   ;;  %v555_v37 = vpop.xlane.xlu1 %554  ;;  %v845_v29 = vmul.f32 %v3230_v63, %v749_v8  ;;  %1227 = vst.msk [vmem:[#allocation3 + $0x28] sm:$0xff] %vm1221_vm0, %v1194_v15  ;;  %v1164_v13 = vmul.f32 %v4015_v60, %v3765_v38  ;;  %v3232_v42 = vpop.eup %3231  ;;  %v750_v15 = vld [vmem:[%s5922_s2 + $0x50] sm:$0xff] }
 0x104   : > { %3241 = vrsqrt.f32 %v787_v4  ;;  %v725_v22 = vmax.f32 %v693_v32, 0.0  ;;  %1226 = vst.msk [vmem:[#allocation3 + $0x20] sm:$0xff] %vm1221_vm0, %v1193_v35  ;;  %v631_v18 = vmul.f32 0.001953125, %v555_v37  ;;  %v553_v31 = vpop.xlane.xlu0 %552  ;;  %v1163_v24 = vmul.f32 %v4022_v27, %v3767_v39  ;;  %v1133_v37 = vld [vmem:[%s5923_s3 + $0x40] sm:$0xff] }
 0x105   : > { %3243 = vrsqrt.f32 %v786_v34  ;;  %v724_v38 = vmax.f32 %v692_v5, 0.0  ;;  %v630_v59 = vmul.f32 0.001953125, %v553_v31  ;;  %v1166_v6 = vmul.f32 %v845_v29, %v3775_v43  ;;  %947 = vperm.xlu0 %3203, %v845_v29  }
 0x106   : > { %v3234_v55 = vpop.eup %3233  ;;  %v789_v36 = vadd.f32 1e-05, %v725_v22  ;;  %v695_v23 = vsub.f32 %v631_v18, %v3871_v21  ;;  %v1195_v20 = vsub.f32 %v1131_v30, %v1163_v24  ;;  %v1196_v10 = vsub.f32 %v1132_v45, %v1164_v13  ;;  %v1136_v21 = vld [vmem:[%s5923_s3 + $0x58] sm:$0xff]  ;;  %v752_v24 = vld [vmem:[%s5922_s2 + $0x60] sm:$0xff] }
 0x107   : > { %v3236_v56 = vpop.eup %3235  ;;  %v788_v8 = vadd.f32 1e-05, %v724_v38  ;;  %v694_v39 = vsub.f32 %v630_v59, %v3875_v3  ;;  %v1198_v47 = vsub.f32 %v1134_v26, %v1166_v6  ;;  %927 = vperm.xlu1 %3204, %v3991_v54   ;;  %v559_v12 = vpop.xlane.xlu1 %558  ;;  %v847_v43 = vmul.f32 %v3234_v55, %v751_v1  ;;  %v753_v3 = vld [vmem:[%s5922_s2 + $0x68] sm:$0xff] }
 0x108   : > { %3245 = vrsqrt.f32 %v789_v36  ;;  %v727_v63 = vmax.f32 %v695_v23, 0.0  ;;  %v633_v4 = vmul.f32 0.001953125, %v559_v12  ;;  %v557_v32 = vpop.xlane.xlu0 %556  ;;  %1228 = vst.msk [vmem:[#allocation3 + $0x30] sm:$0xff] %vm1221_vm0, %v1195_v20  ;;  %1229 = vst.msk [vmem:[#allocation3 + $0x38] sm:$0xff] %vm1221_vm0, %v1196_v10  ;;  %v4061_v54 = vmul.f32 %v3232_v42, %v748_v40  ;;  %v1135_v36 = vld [vmem:[%s5923_s3 + $0x50] sm:$0xff] }
 0x109   : > { %3247 = vrsqrt.f32 %v788_v8  ;;  %v726_v35 = vmax.f32 %v694_v39, 0.0  ;;  %1231 = vst.msk [vmem:[#allocation3 + $0x48] sm:$0xff] %vm1221_vm0, %v1198_v47  ;;  %v632_v34 = vmul.f32 0.001953125, %v557_v32  ;;  %v1168_v5 = vmul.f32 %v847_v43, %v3785_v48  ;;  %957 = vperm.xlu0 %3203, %v847_v43  }
 0x10a   : > { %v3238_v29 = vpop.eup %3237  ;;  %v791_v30 = vadd.f32 1e-05, %v727_v63  ;;  %v697_v45 = vsub.f32 %v633_v4, %v3879_v11  ;;  %v1165_v13 = vmul.f32 %v4061_v54, %v3777_v44  ;;  %v4071_v42 = vmul.f32 %v3236_v56, %v750_v15  ;;  %v1138_v44 = vld [vmem:[%s5923_s3 + $0x68] sm:$0xff] }
 0x10b   : > { %v3240_v22 = vpop.eup %3239  ;;  %v790_v18 = vadd.f32 1e-05, %v726_v35  ;;  %v696_v31 = vsub.f32 %v632_v34, %v3883_v46  ;;  %v1200_v26 = vsub.f32 %v1136_v21, %v1168_v5  ;;  %932 = vperm.xlu1 %3204, %v4022_v27   ;;  %v563_v48 = vpop.xlane.xlu1 %562  ;;  %v849_v1 = vmul.f32 %v3238_v29, %v753_v3  ;;  %v755_v46 = vld [vmem:[%s5922_s2 + $0x78] sm:$0xff]  ;;  %v1137_v34 = vld [vmem:[%s5923_s3 + $0x60] sm:$0xff] }
 0x10c   : > { %3249 = vrsqrt.f32 %v791_v30  ;;  %v729_v11 = vmax.f32 %v697_v45, 0.0  ;;  %v635_v38 = vmul.f32 0.001953125, %v563_v48  ;;  %v561_v59 = vpop.xlane.xlu0 %560  ;;  %v1197_v6 = vsub.f32 %v1133_v37, %v1165_v13 }
 0x10d   : > { %3251 = vrsqrt.f32 %v790_v18  ;;  %v728_v27 = vmax.f32 %v696_v31, 0.0  ;;  %1233 = vst.msk [vmem:[#allocation3 + $0x58] sm:$0xff] %vm1221_vm0, %v1200_v26  ;;  %v634_v40 = vmul.f32 0.001953125, %v561_v59  ;;  %v1170_v55 = vmul.f32 %v849_v1, %v3793_v51  ;;  %967 = vperm.xlu0 %3203, %v849_v1  }
 0x10e   : > { %v3242_v23 = vpop.eup %3241  ;;  %v793_v20 = vadd.f32 1e-05, %v729_v11  ;;  %v699_v10 = vsub.f32 %v635_v38, %v3887_v19  ;;  %1230 = vst.msk [vmem:[#allocation3 + $0x40] sm:$0xff] %vm1221_vm0, %v1197_v6  ;;  %v1167_v56 = vmul.f32 %v4071_v42, %v3787_v49  ;;  %v4093_v8 = vmul.f32 %v3240_v22, %v752_v24  ;;  %v754_v19 = vld [vmem:[%s5922_s2 + $0x70] sm:$0xff]  ;;  %v1140_v49 = vld [vmem:[%s5923_s3 + $0x78] sm:$0xff] }
 0x10f   : > { %v3244_v39 = vpop.eup %3243  ;;  %v792_v47 = vadd.f32 1e-05, %v728_v27  ;;  %v698_v51 = vsub.f32 %v634_v40, %v3891_v41  ;;  %v1202_v12 = vsub.f32 %v1138_v44, %v1170_v55  ;;  %937 = vperm.xlu1 %3204, %v4015_v60   ;;  %v567_v43 = vpop.xlane.xlu1 %566  ;;  %v851_v15 = vmul.f32 %v3242_v23, %v755_v46  ;;  %v757_v41 = vld [vmem:[%s5922_s2 + $0x88] sm:$0xff]  ;;  %v1139_v44 = vld [vmem:[%s5923_s3 + $0x70] sm:$0xff] }
 0x110   : > { %3253 = vrsqrt.f32 %v793_v20  ;;  %v731_v63 = vmax.f32 %v699_v10, 0.0  ;;  %v637_v4 = vmul.f32 0.001953125, %v567_v43  ;;  %v565_v32 = vpop.xlane.xlu0 %564  ;;  %v1199_v21 = vsub.f32 %v1135_v36, %v1167_v56 }
 0x111   : > { %3255 = vrsqrt.f32 %v792_v47  ;;  %v730_v60 = vmax.f32 %v698_v51, 0.0  ;;  %1235 = vst.msk [vmem:[#allocation3 + $0x68] sm:$0xff] %vm1221_vm0, %v1202_v12  ;;  %v636_v3 = vmul.f32 0.001953125, %v565_v32  ;;  %v1172_v35 = vmul.f32 %v851_v15, %v3797_v53  ;;  %977 = vperm.xlu0 %3203, %v851_v15  }
 0x112   : > { %v3246_v5 = vpop.eup %3245  ;;  %v795_v37 = vadd.f32 1e-05, %v731_v63  ;;  %v701_v29 = vsub.f32 %v637_v4, %v3916_v16  ;;  %1232 = vst.msk [vmem:[#allocation3 + $0x50] sm:$0xff] %vm1221_vm0, %v1199_v21  ;;  %v1169_v30 = vmul.f32 %v4093_v8, %v3795_v52  ;;  %v4115_v45 = vmul.f32 %v3244_v39, %v754_v19  ;;  %v756_v16 = vld [vmem:[%s5922_s2 + $0x80] sm:$0xff]  ;;  %v1142_v52 = vld [vmem:[%s5923_s3 + $0x88] sm:$0xff] }
 0x113   : > { %v3248_v13 = vpop.eup %3247  ;;  %v794_v22 = vadd.f32 1e-05, %v730_v60  ;;  %v700_v53 = vsub.f32 %v636_v3, %v3920_v28  ;;  %v1204_v18 = vsub.f32 %v1140_v49, %v1172_v35  ;;  %942 = vperm.xlu1 %3204, %v4061_v54   ;;  %v571_v31 = vpop.xlane.xlu1 %570  ;;  %v853_v26 = vmul.f32 %v3246_v5, %v757_v41  ;;  %v759_v28 = vld [vmem:[%s5922_s2 + $0x98] sm:$0xff]  ;;  %v1141_v19 = vld [vmem:[%s5923_s3 + $0x80] sm:$0xff] }
 0x114   : > { %3257 = vrsqrt.f32 %v795_v37  ;;  %v733_v48 = vmax.f32 %v701_v29, 0.0  ;;  %v639_v1 = vmul.f32 0.001953125, %v571_v31  ;;  %v569_v24 = vpop.xlane.xlu0 %568  ;;  %v1201_v11 = vsub.f32 %v1137_v34, %v1169_v30 }
 0x115   : > { %3259 = vrsqrt.f32 %v794_v22  ;;  %v732_v54 = vmax.f32 %v700_v53, 0.0  ;;  %1237 = vst.msk [vmem:[#allocation3 + $0x78] sm:$0xff] %vm1221_vm0, %v1204_v18  ;;  %v638_v38 = vmul.f32 0.001953125, %v569_v24  ;;  %v1174_v59 = vmul.f32 %v853_v26, %v3821_v61  ;;  %987 = vperm.xlu0 %3203, %v853_v26   ;;  %v1143_v53 = vld [vmem:[%s5923_s3 + $0x90] sm:$0xff] }
 0x116   : > { %v3250_v46 = vpop.eup %3249  ;;  %v797_v6 = vadd.f32 1e-05, %v733_v48  ;;  %v703_v27 = vsub.f32 %v639_v1, %v3925_v33  ;;  %1234 = vst.msk [vmem:[#allocation3 + $0x60] sm:$0xff] %vm1221_vm0, %v1201_v11  ;;  %v1171_v40 = vmul.f32 %v4115_v45, %v3811_v57  ;;  %v4137_v55 = vmul.f32 %v3248_v13, %v756_v16  ;;  %v758_v33 = vld [vmem:[%s5922_s2 + $0x90] sm:$0xff]  ;;  %v1144_v57 = vld [vmem:[%s5923_s3 + $0x98] sm:$0xff]  ;;  %v6026_v16 = vld [vmem:[#allocation5_spill] sm:$0xff] }
 0x117   : > { %v3252_v36 = vpop.eup %3251  ;;  %v796_v23 = vadd.f32 1e-05, %v732_v54  ;;  %v702_v61 = vsub.f32 %v638_v38, %v3932_v62  ;;  %v1206_v20 = vsub.f32 %v1142_v52, %v1174_v59  ;;  %952 = vperm.xlu1 %3204, %v4071_v42   ;;  %v575_v10 = vpop.xlane.xlu1 %574  ;;  %v855_v56 = vmul.f32 %v3250_v46, %v759_v28  ;;  %v761_v62 = vld [vmem:[%s5922_s2 + $0xa8] sm:$0xff]  ;;  %v1148_v59 = vld [vmem:[%s5923_s3 + $0xb8] sm:$0xff] }
 0x118   : > { %3261 = vrsqrt.f32 %v797_v6  ;;  %v735_v39 = vmax.f32 %v703_v27, 0.0  ;;  %v641_v47 = vmul.f32 0.001953125, %v575_v10  ;;  %v573_v51 = vpop.xlane.xlu0 %572  ;;  %v1203_v12 = vsub.f32 %v1139_v44, %v1171_v40  ;;  %v765_v44 = vld [vmem:[%s5922_s2 + $0xc8] sm:$0xff]  ;;  %v6028_v27 = vld [vmem:[#allocation7_spill] sm:$0xff] }
 0x119   : > { %3263 = vrsqrt.f32 %v796_v23  ;;  %v734_v42 = vmax.f32 %v702_v61, 0.0  ;;  %1239 = vst.msk [vmem:[#allocation3 + $0x88] sm:$0xff] %vm1221_vm0, %v1206_v20  ;;  %v640_v43 = vmul.f32 0.001953125, %v573_v51  ;;  %v1176_v15 = vmul.f32 %v855_v56, %v3849_v9  ;;  %997 = vperm.xlu0 %3203, %v855_v56   ;;  %v764_v23 = vld [vmem:[%s5922_s2 + $0xc0] sm:$0xff]  ;;  %v1147_v56 = vld [vmem:[%s5923_s3 + $0xb0] sm:$0xff] }
 0x11a   : > { %v3254_v63 = vpop.eup %3253  ;;  %v799_v4 = vadd.f32 1e-05, %v735_v39  ;;  %v705_v32 = vsub.f32 %v641_v47, %v3939_v25  ;;  %1236 = vst.msk [vmem:[#allocation3 + $0x70] sm:$0xff] %vm1221_vm0, %v1203_v12  ;;  %v1173_v49 = vmul.f32 %v4137_v55, %v3831_v2  ;;  %v4159_v41 = vmul.f32 %v3252_v36, %v758_v33  ;;  %v760_v25 = vld [vmem:[%s5922_s2 + $0xa0] sm:$0xff]  ;;  %v1146_v2 = vld [vmem:[%s5923_s3 + $0xa8] sm:$0xff] }
 0x11b   : > { %v3256_v21 = vpop.eup %3255  ;;  %v798_v60 = vadd.f32 1e-05, %v734_v42  ;;  %v704_v9 = vsub.f32 %v640_v43, %v3943_v50  ;;  %v1208_v3 = vsub.f32 %v1144_v57, %v1176_v15  ;;  %962 = vperm.xlu1 %3204, %v4093_v8   ;;  %v579_v35 = vpop.xlane.xlu1 %578  ;;  %v857_v34 = vmul.f32 %v3254_v63, %v761_v62  ;;  %v763_v50 = vld [vmem:[%s5922_s2 + $0xb8] sm:$0xff]  ;;  %v1150_v12 = vld [vmem:[%s5923_s3 + $0xc8] sm:$0xff]  ;;  %v6030_v15 = vld [vmem:[#allocation9_spill] sm:$0xff] }
 0x11c   : > { %3265 = vrsqrt.f32 %v799_v4  ;;  %v737_v5 = vmax.f32 %v705_v32, 0.0  ;;  %v643_v37 = vmul.f32 0.001953125, %v579_v35  ;;  %v577_v29 = vpop.xlane.xlu0 %576  ;;  %v1205_v30 = vsub.f32 %v1141_v19, %v1173_v49  ;;  %v6029_v57 = vld [vmem:[#allocation8_spill] sm:$0xff]  ;;  %v1149_v63 = vld [vmem:[%s5923_s3 + $0xc0] sm:$0xff]  ;;  %v766_v4 = vld [vmem:[%s5922_s2 + $0xd0] sm:$0xff] }
 0x11d   : > { %3267 = vrsqrt.f32 %v798_v60  ;;  %v736_v8 = vmax.f32 %v704_v9, 0.0  ;;  %1241 = vst.msk [vmem:[#allocation3 + $0x98] sm:$0xff] %vm1221_vm0, %v1208_v3  ;;  %v642_v13 = vmul.f32 0.001953125, %v577_v29  ;;  %v1178_v22 = vmul.f32 %v857_v34, %v3857_v14  ;;  %1007 = vperm.xlu0 %3203, %v857_v34   ;;  %v762_v14 = vld [vmem:[%s5922_s2 + $0xb0] sm:$0xff]  ;;  %v767_v42 = vld [vmem:[%s5922_s2 + $0xd8] sm:$0xff]  ;;  %v6031_v49 = vld [vmem:[#allocation10_spill] sm:$0xff] }
 0x11e   : > { %v3258_v18 = vpop.eup %3257  ;;  %v801_v31 = vadd.f32 1e-05, %v737_v5  ;;  %v707_v26 = vsub.f32 %v643_v37, %v3974_v0  ;;  %1238 = vst.msk [vmem:[#allocation3 + $0x80] sm:$0xff] %vm1221_vm0, %v1205_v30  ;;  %v1175_v48 = vmul.f32 %v4159_v41, %v6026_v16  ;;  %v4181_v1 = vmul.f32 %v3256_v21, %v760_v25  ;;  %v1145_v0 = vld [vmem:[%s5923_s3 + $0xa0] sm:$0xff]  ;;  %v1152_v35 = vld [vmem:[%s5923_s3 + $0xd8] sm:$0xff]  ;;  %v769_v34 = vld [vmem:[%s5922_s2 + $0xe8] sm:$0xff] }
 0x11f   : > { %v3260_v24 = vpop.eup %3259  ;;  %v800_v52 = vadd.f32 1e-05, %v736_v8  ;;  %v706_v28 = vsub.f32 %v642_v13, %v4005_v58  ;;  %v1210_v11 = vsub.f32 %v1146_v2, %v1178_v22  ;;  %972 = vperm.xlu1 %3204, %v4115_v45   ;;  %v859_v54 = vmul.f32 %v3258_v18, %v763_v50  ;;  %v6027_v58 = vld [vmem:[#allocation6_spill] sm:$0xff]  ;;  %v6032_v37 = vld [vmem:[#allocation11_spill] sm:$0xff]  ;;  %v768_v2 = vld [vmem:[%s5922_s2 + $0xe0] sm:$0xff] }
 0x120   : > { %3269 = vrsqrt.f32 %v801_v31  ;;  %v739_v38 = vmax.f32 %v707_v26, 0.0  ;;  %v1207_v46 = vsub.f32 %v1143_v53, %v1175_v48  ;;  %v1177_v6 = vmul.f32 %v4181_v1, %v6027_v58  ;;  %v6033_v30 = vld [vmem:[#allocation12_spill] sm:$0xff]  ;;  %v1154_v18 = vld [vmem:[%s5923_s3 + $0xe8] sm:$0xff]  ;;  %v6034_v48 = vld [vmem:[#allocation13_spill] sm:$0xff] }
 0x121   : > { %3271 = vrsqrt.f32 %v800_v52  ;;  %v738_v45 = vmax.f32 %v706_v28, 0.0  ;;  %1243 = vst.msk [vmem:[#allocation3 + $0xa8] sm:$0xff] %vm1221_vm0, %v1210_v11  ;;  %v1180_v40 = vmul.f32 %v859_v54, %v6028_v27  ;;  %1017 = vperm.xlu0 %3203, %v859_v54   ;;  %v858_v36 = vmul.f32 %v3260_v24, %v762_v14  ;;  %v771_v31 = vld [vmem:[%s5922_s2 + $0xf8] sm:$0xff]  ;;  %v770_v24 = vld [vmem:[%s5922_s2 + $0xf0] sm:$0xff]  ;;  %v6035_v28 = vld [vmem:[#allocation14_spill] sm:$0xff] }
 0x122   : > { %v3262_v61 = vpop.eup %3261  ;;  %v803_v20 = vadd.f32 1e-05, %v739_v38  ;;  %1240 = vst.msk [vmem:[#allocation3 + $0x90] sm:$0xff] %vm1221_vm0, %v1207_v46  ;;  %v1209_v10 = vsub.f32 %v1145_v0, %v1177_v6  ;;  %v1155_v6 = vld [vmem:[%s5923_s3 + $0xf0] sm:$0xff] }
 0x123   : > { %v3264_v33 = vpop.eup %3263  ;;  %v802_v39 = vadd.f32 1e-05, %v738_v45  ;;  %v1212_v47 = vsub.f32 %v1148_v59, %v1180_v40  ;;  %982 = vperm.xlu1 %3204, %v4137_v55   ;;  %v861_v51 = vmul.f32 %v3262_v61, %v765_v44  ;;  %v1179_v62 = vmul.f32 %v858_v36, %v6029_v57  ;;  %v1156_v59 = vld [vmem:[%s5923_s3 + $0xf8] sm:$0xff] }
 0x124   : > { %3273 = vrsqrt.f32 %v803_v20  ;;  %1242 = vst.msk [vmem:[#allocation3 + $0xa0] sm:$0xff] %vm1221_vm0, %v1209_v10  ;;  %v860_v43 = vmul.f32 %v3264_v33, %v764_v23 }
 0x125   : > { %3275 = vrsqrt.f32 %v802_v39  ;;  %1245 = vst.msk [vmem:[#allocation3 + $0xb8] sm:$0xff] %vm1221_vm0, %v1212_v47  ;;  %v1182_v55 = vmul.f32 %v861_v51, %v6030_v15  ;;  %1027 = vperm.xlu0 %3203, %v861_v51   ;;  %v1211_v19 = vsub.f32 %v1147_v56, %v1179_v62  ;;  %v870_v56 = vld [vmem:[%s5921_s1 + $0x10] sm:$0xff]  ;;  %v871_v47 = vld [vmem:[%s5921_s1 + $0x18] sm:$0xff]  ;;  %v877_v15 = vld [vmem:[%s5921_s1 + $0x48] sm:$0xff] }
 0x126   : > { %v3266_v32 = vpop.eup %3265  ;;  %v1181_v21 = vmul.f32 %v860_v43, %v6031_v49 }
 0x127   : > { %v3268_v60 = vpop.eup %3267  ;;  %v1214_v9 = vsub.f32 %v1150_v12, %v1182_v55  ;;  %992 = vperm.xlu1 %3204, %v4159_v41   ;;  %v863_v3 = vmul.f32 %v3266_v32, %v767_v42  ;;  %1244 = vst.msk [vmem:[#allocation3 + $0xb0] sm:$0xff] %vm1221_vm0, %v1211_v19  ;;  %v1151_v41 = vld [vmem:[%s5923_s3 + $0xd0] sm:$0xff]  ;;  %v872_v42 = vld [vmem:[%s5921_s1 + $0x20] sm:$0xff] }
 0x128   : > { %v1213_v25 = vsub.f32 %v1149_v63, %v1181_v21  ;;  %v862_v5 = vmul.f32 %v3268_v60, %v766_v4  ;;  %v873_v63 = vld [vmem:[%s5921_s1 + $0x28] sm:$0xff]  ;;  %v879_v21 = vld [vmem:[%s5921_s1 + $0x58] sm:$0xff] }
 0x129   : > { %1247 = vst.msk [vmem:[#allocation3 + $0xc8] sm:$0xff] %vm1221_vm0, %v1214_v9  ;;  %v1184_v29 = vmul.f32 %v863_v3, %v6032_v37  ;;  %1037 = vperm.xlu0 %3203, %v863_v3   ;;  %v874_v9 = vld [vmem:[%s5921_s1 + $0x30] sm:$0xff] }
 0x12a   : > { %v3270_v50 = vpop.eup %3269  ;;  %1246 = vst.msk [vmem:[#allocation3 + $0xc0] sm:$0xff] %vm1221_vm0, %v1213_v25  ;;  %v1183_v8 = vmul.f32 %v862_v5, %v6033_v30  ;;  %v881_v25 = vld [vmem:[%s5921_s1 + $0x68] sm:$0xff]  ;;  %v883_v30 = vld [vmem:[%s5921_s1 + $0x78] sm:$0xff] }
 0x12b   : > { %v3272_v13 = vpop.eup %3271  ;;  %v1216_v22 = vsub.f32 %v1152_v35, %v1184_v29  ;;  %1002 = vperm.xlu1 %3204, %v4181_v1   ;;  %v865_v53 = vmul.f32 %v3270_v50, %v769_v34  ;;  %v1153_v1 = vld [vmem:[%s5923_s3 + $0xe0] sm:$0xff]  ;;  %v875_v29 = vld [vmem:[%s5921_s1 + $0x38] sm:$0xff] }
 0x12c   : > { %v1215_v26 = vsub.f32 %v1151_v41, %v1183_v8  ;;  %v864_v16 = vmul.f32 %v3272_v13, %v768_v2  ;;  %v876_v13 = vld [vmem:[%s5921_s1 + $0x40] sm:$0xff] }
 0x12d   : > { %1249 = vst.msk [vmem:[#allocation3 + $0xd8] sm:$0xff] %vm1221_vm0, %v1216_v22  ;;  %v1186_v14 = vmul.f32 %v865_v53, %v6034_v48  ;;  %1047 = vperm.xlu0 %3203, %v865_v53   ;;  %v878_v48 = vld [vmem:[%s5921_s1 + $0x50] sm:$0xff] }
 0x12e   : > { %v3274_v52 = vpop.eup %3273  ;;  %1248 = vst.msk [vmem:[#allocation3 + $0xd0] sm:$0xff] %vm1221_vm0, %v1215_v26  ;;  %v1185_v11 = vmul.f32 %v864_v16, %v6035_v28 }
 0x12f   : > { %v3276_v54 = vpop.eup %3275  ;;  %v1218_v0 = vsub.f32 %v1154_v18, %v1186_v14  ;;  %1012 = vperm.xlu1 %3204, %v858_v36   ;;  %v867_v38 = vmul.f32 %v3274_v52, %v771_v31  ;;  %v3302_v36 = vmov 1   ;;  %v885_v31 = vld [vmem:[%s5921_s1 + $0x88] sm:$0xff]  ;;  %v887_v52 = vld [vmem:[%s5921_s1 + $0x98] sm:$0xff] }
 0x130   : > { %v1217_v44 = vsub.f32 %v1153_v1, %v1185_v11  ;;  %v866_v46 = vmul.f32 %v3276_v54, %v770_v24  ;;  %v880_v11 = vld [vmem:[%s5921_s1 + $0x60] sm:$0xff] }
 0x131   : > { %1251 = vst.msk [vmem:[#allocation3 + $0xe8] sm:$0xff] %vm1221_vm0, %v1218_v0  ;;  %v1188_v58 = vmul.f32 %v867_v38, %v3947_v17  ;;  %1057 = vperm.xlu0 %3203, %v867_v38   ;;  %v869_v17 = vld [vmem:[%s5921_s1 + $0x8] sm:$0xff] }
 0x132   : > { %1250 = vst.msk [vmem:[#allocation3 + $0xe0] sm:$0xff] %vm1221_vm0, %v1217_v44  ;;  %v1187_v45 = vmul.f32 %v866_v46, %v3961_v7  ;;  %v868_v7 = vld [vmem:[%s5921_s1] sm:$0xff] }
 0x133   : > { %v1220_v27 = vsub.f32 %v1156_v59, %v1188_v58  ;;  %1022 = vperm.xlu1 %3204, %v860_v43   ;;  %v889_v59 = vld [vmem:[%s5921_s1 + $0xa8] sm:$0xff]  ;;  %v882_v58 = vld [vmem:[%s5921_s1 + $0x70] sm:$0xff] }
 0x134   : > { %v1219_v40 = vsub.f32 %v1155_v6, %v1187_v45 }
 0x135   : > { %1253 = vst.msk [vmem:[#allocation3 + $0xf8] sm:$0xff] %vm1221_vm0, %v1220_v27  ;;  %3206 = vset.pattern.permute.xlu0 %v3302_v36 }
 0x136   : > { %1252 = vst.msk [vmem:[#allocation3 + $0xf0] sm:$0xff] %vm1221_vm0, %v1219_v40  ;;  %v891_v40 = vld [vmem:[%s5921_s1 + $0xb8] sm:$0xff] }
 0x137   : > { %1032 = vperm.xlu1 %3204, %v862_v5  }
 0x13b   : > { %1042 = vperm.xlu1 %3204, %v864_v16  }
 0x13f   : > { %1052 = vperm.xlu1 %3204, %v866_v46  }
 0x174   : > { %v908_v23 = vpop.permute.xlu1 %907 }
 0x175   : > { %v1061_v61 = vmul.f32 %v908_v23, %v869_v17  ;;  %v903_v20 = vpop.permute.xlu0 %902  ;;  %v884_v23 = vld [vmem:[%s5921_s1 + $0x80] sm:$0xff] }
 0x176   : > { %v1060_v10 = vmul.f32 %v903_v20, %v868_v7 }
 0x177   : > { %1094 = vst.msk [vmem:[#allocation2 + $0x8] sm:$0xff] %vm1092_vm1, %v1061_v61 }
 0x178   : > { %1093 = vst.msk [vmem:[#allocation2] sm:$0xff] %vm1092_vm1, %v1060_v10 }
 0x17a   : > { %v913_v33 = vpop.permute.xlu1 %912 }
 0x17b   : > { %v1062_v39 = vmul.f32 %v913_v33, %v870_v56  ;;  %v893_v56 = vld [vmem:[%s5921_s1 + $0xc8] sm:$0xff] }
 0x17d   : > { %1095 = vst.msk [vmem:[#allocation2 + $0x10] sm:$0xff] %vm1092_vm1, %v1062_v39 }
 0x17e   : > { %v918_v51 = vpop.permute.xlu1 %917  ;;  %v4289_v57 = vld [vmem:[#allocation2 + $0x8] sm:$0xff] }
 0x17f   : > { %v1063_v62 = vmul.f32 %v918_v51, %v871_v47  ;;  %1568 = vperm.xlu0 %3206, %v4289_v57   ;;  %v4292_v12 = vld [vmem:[#allocation2] sm:$0xff]  ;;  %v886_v47 = vld [vmem:[%s5921_s1 + $0x90] sm:$0xff] }
 0x180   : > { %1322 = vperm.xlu1 %3204, %v4292_v12  }
 0x181   : > { %1096 = vst.msk [vmem:[#allocation2 + $0x18] sm:$0xff] %vm1092_vm1, %v1063_v62 }
 0x182   : > { %v923_v43 = vpop.permute.xlu1 %922 }
 0x183   : > { %v1064_v55 = vmul.f32 %v923_v43, %v872_v42  ;;  %v895_v43 = vld [vmem:[%s5921_s1 + $0xd8] sm:$0xff] }
 0x184   : > { %v4302_v19 = vld [vmem:[#allocation2 + $0x10] sm:$0xff]  ;;  %v948_v4 = vpop.permute.xlu0 %947 }
 0x185   : > { %1097 = vst.msk [vmem:[#allocation2 + $0x20] sm:$0xff] %vm1092_vm1, %v1064_v55  ;;  %1332 = vperm.xlu1 %3204, %v4302_v19   ;;  %v1069_v32 = vmul.f32 %v948_v4, %v877_v15 }
 0x186   : > { %v928_v49 = vpop.permute.xlu1 %927 }
 0x187   : > { %v1065_v60 = vmul.f32 %v928_v49, %v873_v63  ;;  %1102 = vst.msk [vmem:[#allocation2 + $0x48] sm:$0xff] %vm1092_vm1, %v1069_v32  ;;  %v888_v63 = vld [vmem:[%s5921_s1 + $0xa0] sm:$0xff] }
 0x188   : > { %v958_v3 = vpop.permute.xlu0 %957 }
 0x189   : > { %1098 = vst.msk [vmem:[#allocation2 + $0x28] sm:$0xff] %vm1092_vm1, %v1065_v60  ;;  %v1071_v35 = vmul.f32 %v958_v3, %v879_v21  ;;  %v897_v21 = vld [vmem:[%s5921_s1 + $0xe8] sm:$0xff]  ;;  %v890_v3 = vld [vmem:[%s5921_s1 + $0xb0] sm:$0xff] }
 0x18a   : > { %v933_v34 = vpop.permute.xlu1 %932 }
 0x18b   : > { %v1066_v5 = vmul.f32 %v933_v34, %v874_v9  ;;  %1104 = vst.msk [vmem:[#allocation2 + $0x58] sm:$0xff] %vm1092_vm1, %v1071_v35 }
 0x18c   : > { %v4321_v37 = vld [vmem:[#allocation2 + $0x20] sm:$0xff]  ;;  %v968_v41 = vpop.permute.xlu0 %967 }
 0x18d   : > { %1099 = vst.msk [vmem:[#allocation2 + $0x30] sm:$0xff] %vm1092_vm1, %v1066_v5  ;;  %1580 = vperm.xlu0 %3206, %v4321_v37   ;;  %1342 = vperm.xlu1 %3204, %v4321_v37   ;;  %v1073_v2 = vmul.f32 %v968_v41, %v881_v25  ;;  %v899_v5 = vld [vmem:[%s5921_s1 + $0xf8] sm:$0xff] }
 0x18e   : > { %v938_v50 = vpop.permute.xlu1 %937 }
 0x18f   : > { %v1067_v8 = vmul.f32 %v938_v50, %v875_v29  ;;  %1106 = vst.msk [vmem:[#allocation2 + $0x68] sm:$0xff] %vm1092_vm1, %v1073_v2  ;;  %v892_v2 = vld [vmem:[%s5921_s1 + $0xc0] sm:$0xff] }
 0x190   : > { %v978_v22 = vpop.permute.xlu0 %977 }
 0x191   : > { %1100 = vst.msk [vmem:[#allocation2 + $0x38] sm:$0xff] %vm1092_vm1, %v1067_v8  ;;  %v1075_v53 = vmul.f32 %v978_v22, %v883_v30 }
 0x192   : > { %v943_v18 = vpop.permute.xlu1 %942 }
 0x193   : > { %v1068_v26 = vmul.f32 %v943_v18, %v876_v13  ;;  %1108 = vst.msk [vmem:[#allocation2 + $0x78] sm:$0xff] %vm1092_vm1, %v1075_v53  ;;  %v894_v53 = vld [vmem:[%s5921_s1 + $0xd0] sm:$0xff] }
 0x194   : > { %v4341_v16 = vld [vmem:[#allocation2 + $0x30] sm:$0xff]  ;;  %v988_v14 = vpop.permute.xlu0 %987 }
 0x195   : > { %1101 = vst.msk [vmem:[#allocation2 + $0x40] sm:$0xff] %vm1092_vm1, %v1068_v26  ;;  %1588 = vperm.xlu0 %3206, %v4341_v16   ;;  %1352 = vperm.xlu1 %3204, %v4341_v16   ;;  %v1077_v1 = vmul.f32 %v988_v14, %v885_v31 }
 0x196   : > { %v953_v24 = vpop.permute.xlu1 %952 }
 0x197   : > { %v1070_v28 = vmul.f32 %v953_v24, %v878_v48  ;;  %1110 = vst.msk [vmem:[#allocation2 + $0x88] sm:$0xff] %vm1092_vm1, %v1077_v1  ;;  %v896_v48 = vld [vmem:[%s5921_s1 + $0xe0] sm:$0xff] }
 0x198   : > { %v998_v54 = vpop.permute.xlu0 %997 }
 0x199   : > { %1103 = vst.msk [vmem:[#allocation2 + $0x50] sm:$0xff] %vm1092_vm1, %v1070_v28  ;;  %v1079_v0 = vmul.f32 %v998_v54, %v887_v52  ;;  %v898_v52 = vld [vmem:[%s5921_s1 + $0xf0] sm:$0xff] }
 0x19a   : > { %v963_v38 = vpop.permute.xlu1 %962 }
 0x19b   : > { %v1072_v44 = vmul.f32 %v963_v38, %v880_v11  ;;  %1112 = vst.msk [vmem:[#allocation2 + $0x98] sm:$0xff] %vm1092_vm1, %v1079_v0 }
 0x19c   : > { %v4361_v46 = vld [vmem:[#allocation2 + $0x40] sm:$0xff]  ;;  %v1008_v6 = vpop.permute.xlu0 %1007 }
 0x19d   : > { %1105 = vst.msk [vmem:[#allocation2 + $0x60] sm:$0xff] %vm1092_vm1, %v1072_v44  ;;  %1596 = vperm.xlu0 %3206, %v4361_v46   ;;  %1362 = vperm.xlu1 %3204, %v4361_v46   ;;  %v1081_v45 = vmul.f32 %v1008_v6, %v889_v59  ;;  %v3303_v59 = vmov 2   ;;  %v4470_v44 = vld [vmem:[#allocation2 + $0x18] sm:$0xff] }
 0x19e   : > { %v973_v27 = vpop.permute.xlu1 %972  ;;  %v4478_v6 = vld [vmem:[#allocation2 + $0x38] sm:$0xff] }
 0x19f   : > { %v1074_v17 = vmul.f32 %v973_v27, %v882_v58  ;;  %1114 = vst.msk [vmem:[#allocation2 + $0xa8] sm:$0xff] %vm1092_vm1, %v1081_v45  ;;  %v4474_v58 = vld [vmem:[#allocation2 + $0x28] sm:$0xff]  ;;  %v4486_v45 = vld [vmem:[#allocation2 + $0x58] sm:$0xff] }
 0x1a0   : > { %v4373_v7 = vld [vmem:[#allocation2 + $0x50] sm:$0xff]  ;;  %v1018_v61 = vpop.permute.xlu0 %1017  ;;  %v4490_v27 = vld [vmem:[#allocation2 + $0x68] sm:$0xff] }
 0x1a1   : > { %1107 = vst.msk [vmem:[#allocation2 + $0x70] sm:$0xff] %vm1092_vm1, %v1074_v17  ;;  %1604 = vperm.xlu0 %3206, %v4373_v7   ;;  %1372 = vperm.xlu1 %3204, %v4373_v7   ;;  %v1083_v20 = vmul.f32 %v1018_v61, %v891_v40  ;;  %v4494_v40 = vld [vmem:[#allocation2 + $0x78] sm:$0xff]  ;;  %v4498_v17 = vld [vmem:[#allocation2 + $0x88] sm:$0xff] }
 0x1a2   : > { %v983_v10 = vpop.permute.xlu1 %982 }
 0x1a3   : > { %v1076_v33 = vmul.f32 %v983_v10, %v884_v23  ;;  %1116 = vst.msk [vmem:[#allocation2 + $0xb8] sm:$0xff] %vm1092_vm1, %v1083_v20  ;;  %v4502_v23 = vld [vmem:[#allocation2 + $0x98] sm:$0xff] }
 0x1a4   : > { %v4385_v39 = vld [vmem:[#allocation2 + $0x60] sm:$0xff]  ;;  %v1028_v51 = vpop.permute.xlu0 %1027 }
 0x1a5   : > { %1109 = vst.msk [vmem:[#allocation2 + $0x80] sm:$0xff] %vm1092_vm1, %v1076_v33  ;;  %1612 = vperm.xlu0 %3206, %v4385_v39   ;;  %1382 = vperm.xlu1 %3204, %v4385_v39   ;;  %v1085_v62 = vmul.f32 %v1028_v51, %v893_v56 }
 0x1a6   : > { %v993_v42 = vpop.permute.xlu1 %992  ;;  %v4506_v61 = vld [vmem:[#allocation2 + $0xa8] sm:$0xff] }
 0x1a7   : > { %v1078_v15 = vmul.f32 %v993_v42, %v886_v47  ;;  %1118 = vst.msk [vmem:[#allocation2 + $0xc8] sm:$0xff] %vm1092_vm1, %v1085_v62  ;;  %v3304_v62 = vmov 3  }
 0x1a8   : > { %v4397_v55 = vld [vmem:[#allocation2 + $0x70] sm:$0xff]  ;;  %v1038_v4 = vpop.permute.xlu0 %1037 }
 0x1a9   : > { %1111 = vst.msk [vmem:[#allocation2 + $0x90] sm:$0xff] %vm1092_vm1, %v1078_v15  ;;  %1620 = vperm.xlu0 %3206, %v4397_v55   ;;  %1392 = vperm.xlu1 %3204, %v4397_v55   ;;  %v1087_v32 = vmul.f32 %v1038_v4, %v895_v43 }
 0x1aa   : > { %v1003_v49 = vpop.permute.xlu1 %1002  ;;  %v4510_v20 = vld [vmem:[#allocation2 + $0xb8] sm:$0xff] }
 0x1ab   : > { %v1080_v60 = vmul.f32 %v1003_v49, %v888_v63  ;;  %1120 = vst.msk [vmem:[#allocation2 + $0xd8] sm:$0xff] %vm1092_vm1, %v1087_v32 }
 0x1ac   : > { %v4409_v9 = vld [vmem:[#allocation2 + $0x80] sm:$0xff]  ;;  %v1048_v35 = vpop.permute.xlu0 %1047 }
 0x1ad   : > { %1113 = vst.msk [vmem:[#allocation2 + $0xa0] sm:$0xff] %vm1092_vm1, %v1080_v60  ;;  %1628 = vperm.xlu0 %3206, %v4409_v9   ;;  %1402 = vperm.xlu1 %3204, %v4409_v9   ;;  %v1089_v34 = vmul.f32 %v1048_v35, %v897_v21 }
 0x1ae   : > { %v1013_v25 = vpop.permute.xlu1 %1012  ;;  %v4514_v10 = vld [vmem:[#allocation2 + $0xc8] sm:$0xff] }
 0x1af   : > { %v1082_v29 = vmul.f32 %v1013_v25, %v890_v3  ;;  %1122 = vst.msk [vmem:[#allocation2 + $0xe8] sm:$0xff] %vm1092_vm1, %v1089_v34 }
 0x1b0   : > { %v4421_v41 = vld [vmem:[#allocation2 + $0x90] sm:$0xff]  ;;  %v1058_v50 = vpop.permute.xlu0 %1057 }
 0x1b1   : > { %1115 = vst.msk [vmem:[#allocation2 + $0xb0] sm:$0xff] %vm1092_vm1, %v1082_v29  ;;  %1636 = vperm.xlu0 %3206, %v4421_v41   ;;  %1412 = vperm.xlu1 %3204, %v4421_v41   ;;  %v1091_v30 = vmul.f32 %v1058_v50, %v899_v5 }
 0x1b2   : > { %v1023_v8 = vpop.permute.xlu1 %1022  ;;  %v4518_v56 = vld [vmem:[#allocation2 + $0xd8] sm:$0xff] }
 0x1b3   : > { %v1084_v13 = vmul.f32 %v1023_v8, %v892_v2  ;;  %1124 = vst.msk [vmem:[#allocation2 + $0xf8] sm:$0xff] %vm1092_vm1, %v1091_v30 }
 0x1b4   : > { %v4430_v22 = vld [vmem:[#allocation2 + $0xa0] sm:$0xff] }
 0x1b5   : > { %1117 = vst.msk [vmem:[#allocation2 + $0xc0] sm:$0xff] %vm1092_vm1, %v1084_v13  ;;  %1644 = vperm.xlu0 %3206, %v4430_v22   ;;  %1422 = vperm.xlu1 %3204, %v4430_v22  }
 0x1b6   : > { %v1033_v18 = vpop.permute.xlu1 %1032  ;;  %v4522_v33 = vld [vmem:[#allocation2 + $0xe8] sm:$0xff] }
 0x1b7   : > { %v1086_v31 = vmul.f32 %v1033_v18, %v894_v53  ;;  %v6036_v18 = vmov 0  }
 0x1b8   : > { %v4438_v26 = vld [vmem:[#allocation2 + $0xb0] sm:$0xff] }
 0x1b9   : > { %1119 = vst.msk [vmem:[#allocation2 + $0xd0] sm:$0xff] %vm1092_vm1, %v1086_v31  ;;  %1652 = vperm.xlu0 %3206, %v4438_v26   ;;  %1432 = vperm.xlu1 %3204, %v4438_v26  }
 0x1ba   : > { %v1043_v14 = vpop.permute.xlu1 %1042  ;;  %v4526_v47 = vld [vmem:[#allocation2 + $0xf8] sm:$0xff] }
 0x1bb   : > { %v1088_v1 = vmul.f32 %v1043_v14, %v896_v48 }
 0x1bc   : > { %v4446_v24 = vld [vmem:[#allocation2 + $0xc0] sm:$0xff] }
 0x1bd   : > { %1121 = vst.msk [vmem:[#allocation2 + $0xe0] sm:$0xff] %vm1092_vm1, %v1088_v1  ;;  %1660 = vperm.xlu0 %3206, %v4446_v24   ;;  %1442 = vperm.xlu1 %3204, %v4446_v24  }
 0x1be   : > { %v1053_v28 = vpop.permute.xlu1 %1052 }
 0x1bf   : > { %v1090_v11 = vmul.f32 %v1053_v28, %v898_v52 }
 0x1c0   : > { %v4454_v54 = vld [vmem:[#allocation2 + $0xd0] sm:$0xff] }
 0x1c1   : > { %1123 = vst.msk [vmem:[#allocation2 + $0xf0] sm:$0xff] %vm1092_vm1, %v1090_v11  ;;  %1668 = vperm.xlu0 %3206, %v4454_v54   ;;  %1452 = vperm.xlu1 %3204, %v4454_v54  }
 0x1c4   : > { %v4459_v0 = vld [vmem:[#allocation2 + $0xe0] sm:$0xff] }
 0x1c5   : > { %1676 = vperm.xlu0 %3206, %v4459_v0   ;;  %1462 = vperm.xlu1 %3204, %v4459_v0  }
 0x1c8   : > { %v4463_v38 = vld [vmem:[#allocation2 + $0xf0] sm:$0xff] }
 0x1c9   : > { %1684 = vperm.xlu0 %3206, %v4463_v38   ;;  %1472 = vperm.xlu1 %3204, %v4463_v38  }
 0x1cd   : > { %3207 = vset.pattern.permute.xlu0 %v3303_v59  ;;  %3205 = vset.pattern.permute.xlu1 %v3302_v36  ;;  %v4482_v36 = vld [vmem:[#allocation2 + $0x48] sm:$0xff] }
 0x1ce   : > { %1838 = vperm.xlu0 %3207, %v4292_v12   ;;  %1564 = vperm.xlu1 %3205, %v4292_v12  }
 0x1d2   : > { %1850 = vperm.xlu0 %3207, %v4470_v44   ;;  %1572 = vperm.xlu1 %3205, %v4302_v19  }
 0x1d6   : > { %1858 = vperm.xlu0 %3207, %v4474_v58   ;;  %1576 = vperm.xlu1 %3205, %v4470_v44  }
 0x1da   : > { %1866 = vperm.xlu0 %3207, %v4478_v6   ;;  %1584 = vperm.xlu1 %3205, %v4474_v58  }
 0x1de   : > { %1592 = vperm.xlu1 %3205, %v4478_v6   ;;  %1874 = vperm.xlu0 %3207, %v4482_v36  }
 0x1e2   : > { %1600 = vperm.xlu1 %3205, %v4482_v36   ;;  %1882 = vperm.xlu0 %3207, %v4486_v45  }
 0x1e6   : > { %1608 = vperm.xlu1 %3205, %v4486_v45   ;;  %1890 = vperm.xlu0 %3207, %v4490_v27  }
 0x1ea   : > { %1616 = vperm.xlu1 %3205, %v4490_v27   ;;  %1898 = vperm.xlu0 %3207, %v4494_v40  }
 0x1ee   : > { %1624 = vperm.xlu1 %3205, %v4494_v40   ;;  %1906 = vperm.xlu0 %3207, %v4498_v17  }
 0x1f2   : > { %1632 = vperm.xlu1 %3205, %v4498_v17   ;;  %1914 = vperm.xlu0 %3207, %v4502_v23  }
 0x1f6   : > { %1640 = vperm.xlu1 %3205, %v4502_v23   ;;  %1922 = vperm.xlu0 %3207, %v4506_v61  }
 0x1fa   : > { %1648 = vperm.xlu1 %3205, %v4506_v61   ;;  %1930 = vperm.xlu0 %3207, %v4510_v20  }
 0x1fe   : > { %1656 = vperm.xlu1 %3205, %v4510_v20   ;;  %1938 = vperm.xlu0 %3207, %v4514_v10   ;;  %v4535_v42 = vpop.permute.xlu0 %1568 }
 0x1ff   : > { %v4528_v51 = vpop.permute.xlu1 %1322 }
 0x202   : > { %1664 = vperm.xlu1 %3205, %v4514_v10   ;;  %1946 = vperm.xlu0 %3207, %v4518_v56  }
 0x204   : > { %v4537_v43 = vpop.permute.xlu1 %1332 }
 0x206   : > { %1672 = vperm.xlu1 %3205, %v4518_v56   ;;  %1954 = vperm.xlu0 %3207, %v4522_v33  }
 0x20a   : > { %1680 = vperm.xlu1 %3205, %v4522_v33   ;;  %1962 = vperm.xlu0 %3207, %v4526_v47  }
 0x20c   : > { %v4541_v15 = vpop.permute.xlu1 %1342  ;;  %v4543_v63 = vpop.permute.xlu0 %1580 }
 0x20e   : > { %3210 = vset.pattern.permute.xlu0 %v3304_v62  ;;  %1688 = vperm.xlu1 %3205, %v4526_v47  }
 0x20f   : > { %2116 = vperm.xlu0 %3210, %v4289_v57  }
 0x212   : > { %3208 = vset.pattern.permute.xlu1 %v3303_v59 }
 0x213   : > { %2128 = vperm.xlu0 %3210, %v4321_v37   ;;  %1842 = vperm.xlu1 %3208, %v4289_v57  }
 0x214   : > { %v4547_v4 = vpop.permute.xlu1 %1352  ;;  %v4549_v32 = vpop.permute.xlu0 %1588 }
 0x217   : > { %2136 = vperm.xlu0 %3210, %v4341_v16   ;;  %1846 = vperm.xlu1 %3208, %v4302_v19  }
 0x21b   : > { %2144 = vperm.xlu0 %3210, %v4361_v46   ;;  %1854 = vperm.xlu1 %3208, %v4321_v37  }
 0x21c   : > { %v4553_v49 = vpop.permute.xlu1 %1362  ;;  %v4555_v21 = vpop.permute.xlu0 %1596 }
 0x21f   : > { %2152 = vperm.xlu0 %3210, %v4373_v7   ;;  %1862 = vperm.xlu1 %3208, %v4341_v16  }
 0x220   : > { %v4559_v60 = vpop.permute.xlu1 %1372  ;;  %v4561_v3 = vpop.permute.xlu0 %1604 }
 0x223   : > { %2160 = vperm.xlu0 %3210, %v4385_v39   ;;  %1870 = vperm.xlu1 %3208, %v4361_v46  }
 0x224   : > { %v4565_v35 = vpop.permute.xlu1 %1382  ;;  %v4567_v34 = vpop.permute.xlu0 %1612 }
 0x227   : > { %2168 = vperm.xlu0 %3210, %v4397_v55   ;;  %1878 = vperm.xlu1 %3208, %v4373_v7  }
 0x228   : > { %v4571_v37 = vpop.permute.xlu1 %1392  ;;  %v4573_v25 = vpop.permute.xlu0 %1620 }
 0x22b   : > { %2176 = vperm.xlu0 %3210, %v4409_v9   ;;  %1886 = vperm.xlu1 %3208, %v4385_v39  }
 0x22c   : > { %v4577_v16 = vpop.permute.xlu1 %1402  ;;  %v4579_v5 = vpop.permute.xlu0 %1628 }
 0x22f   : > { %2184 = vperm.xlu0 %3210, %v4421_v41   ;;  %1894 = vperm.xlu1 %3208, %v4397_v55  }
 0x230   : > { %v4583_v46 = vpop.permute.xlu1 %1412  ;;  %v4585_v29 = vpop.permute.xlu0 %1636 }
 0x233   : > { %2192 = vperm.xlu0 %3210, %v4430_v22   ;;  %1902 = vperm.xlu1 %3208, %v4409_v9  }
 0x234   : > { %v4589_v7 = vpop.permute.xlu1 %1422  ;;  %v4591_v2 = vpop.permute.xlu0 %1644 }
 0x237   : > { %2200 = vperm.xlu0 %3210, %v4438_v26   ;;  %1910 = vperm.xlu1 %3208, %v4421_v41  }
 0x238   : > { %v4595_v39 = vpop.permute.xlu1 %1432  ;;  %v4597_v50 = vpop.permute.xlu0 %1652 }
 0x23b   : > { %2208 = vperm.xlu0 %3210, %v4446_v24   ;;  %1918 = vperm.xlu1 %3208, %v4430_v22  }
 0x23c   : > { %v4601_v55 = vpop.permute.xlu1 %1442  ;;  %v4603_v30 = vpop.permute.xlu0 %1660 }
 0x23f   : > { %2216 = vperm.xlu0 %3210, %v4454_v54   ;;  %1926 = vperm.xlu1 %3208, %v4438_v26  }
 0x240   : > { %v4607_v9 = vpop.permute.xlu1 %1452  ;;  %v4609_v8 = vpop.permute.xlu0 %1668 }
 0x243   : > { %2224 = vperm.xlu0 %3210, %v4459_v0   ;;  %1934 = vperm.xlu1 %3208, %v4446_v24  }
 0x244   : > { %v4613_v41 = vpop.permute.xlu1 %1462  ;;  %v4615_v13 = vpop.permute.xlu0 %1676 }
 0x247   : > { %2232 = vperm.xlu0 %3210, %v4463_v38   ;;  %1942 = vperm.xlu1 %3208, %v4454_v54  }
 0x248   : > { %v4619_v22 = vpop.permute.xlu1 %1472  ;;  %v4621_v53 = vpop.permute.xlu0 %1684 }
 0x24b   : > { %3211 = vset.pattern.permute.xlu0 %v6036_v18  ;;  %1950 = vperm.xlu1 %3208, %v4459_v0  }
 0x24c   : > { %1327 = vperm.xlu0 %3211, %v4289_v57  }
 0x24d   : > { %v4626_v31 = vpop.permute.xlu1 %1564  ;;  %v4628_v26 = vpop.permute.xlu0 %1838 }
 0x24f   : > { %1958 = vperm.xlu1 %3208, %v4463_v38  }
 0x250   : > { %1337 = vperm.xlu0 %3211, %v4470_v44  }
 0x251   : > { %v4632_v48 = vpop.permute.xlu1 %1572  ;;  %v4634_v14 = vpop.permute.xlu0 %1850 }
 0x253   : > { %3209 = vset.pattern.permute.xlu1 %v3304_v62 }
 0x254   : > { %1347 = vperm.xlu0 %3211, %v4474_v58   ;;  %2112 = vperm.xlu1 %3209, %v4292_v12  }
 0x255   : > { %v4639_v1 = vpop.permute.xlu1 %1576  ;;  %v4641_v57 = vpop.permute.xlu0 %1858 }
 0x256   : > { %6037 = vst [vmem:[#allocation5_spill] sm:$0xff] %v4639_v1  ;;  %6038 = vst [vmem:[#allocation6_spill] sm:$0xff] %v4641_v57 }
 0x258   : > { %2120 = vperm.xlu1 %3209, %v4302_v19   ;;  %1357 = vperm.xlu0 %3211, %v4478_v6  }
 0x259   : > { %v4645_v24 = vpop.permute.xlu1 %1584  ;;  %v4647_v52 = vpop.permute.xlu0 %1866 }
 0x25a   : > { %6039 = vst [vmem:[#allocation7_spill] sm:$0xff] %v4645_v24  ;;  %6040 = vst [vmem:[#allocation8_spill] sm:$0xff] %v4647_v52 }
 0x25c   : > { %2124 = vperm.xlu1 %3209, %v4470_v44   ;;  %1367 = vperm.xlu0 %3211, %v4482_v36  }
 0x25d   : > { %v4651_v28 = vpop.permute.xlu1 %1592  ;;  %v4653_v11 = vpop.permute.xlu0 %1874 }
 0x25e   : > { %6041 = vst [vmem:[#allocation9_spill] sm:$0xff] %v4651_v28  ;;  %6042 = vst [vmem:[#allocation10_spill] sm:$0xff] %v4653_v11 }
 0x260   : > { %2132 = vperm.xlu1 %3209, %v4474_v58   ;;  %1377 = vperm.xlu0 %3211, %v4486_v45  }
 0x261   : > { %v4657_v12 = vpop.permute.xlu1 %1600  ;;  %v4659_v19 = vpop.permute.xlu0 %1882 }
 0x262   : > { %6043 = vst [vmem:[#allocation11_spill] sm:$0xff] %v4657_v12  ;;  %6044 = vst [vmem:[#allocation12_spill] sm:$0xff] %v4659_v19  ;;  %v2408_v19 = vld [vmem:[#allocation3 + $0xb8] sm:$0xff] }
 0x264   : > { %2140 = vperm.xlu1 %3209, %v4478_v6   ;;  %1387 = vperm.xlu0 %3211, %v4490_v27  }
 0x265   : > { %v4663_v54 = vpop.permute.xlu1 %1608  ;;  %v4665_v0 = vpop.permute.xlu0 %1890 }
 0x266   : > { %6045 = vst [vmem:[#allocation13_spill] sm:$0xff] %v4663_v54  ;;  %6046 = vst [vmem:[#allocation14_spill] sm:$0xff] %v4665_v0 }
 0x268   : > { %2148 = vperm.xlu1 %3209, %v4482_v36   ;;  %1397 = vperm.xlu0 %3211, %v4494_v40  }
 0x269   : > { %v4669_v38 = vpop.permute.xlu1 %1616  ;;  %v4671_v59 = vpop.permute.xlu0 %1898 }
 0x26a   : > { %6047 = vst [vmem:[#allocation15_spill] sm:$0xff] %v4669_v38  ;;  %6048 = vst [vmem:[#allocation16_spill] sm:$0xff] %v4671_v59 }
 0x26c   : > { %2156 = vperm.xlu1 %3209, %v4486_v45   ;;  %1407 = vperm.xlu0 %3211, %v4498_v17  }
 0x26d   : > { %v4675_v44 = vpop.permute.xlu1 %1624  ;;  %v4677_v58 = vpop.permute.xlu0 %1906 }
 0x26e   : > { %6049 = vst [vmem:[#allocation17_spill] sm:$0xff] %v4675_v44  ;;  %6050 = vst [vmem:[#allocation18_spill] sm:$0xff] %v4677_v58  ;;  %v2406_v44 = vld [vmem:[#allocation3 + $0xa8] sm:$0xff] }
 0x270   : > { %2164 = vperm.xlu1 %3209, %v4490_v27   ;;  %1417 = vperm.xlu0 %3211, %v4502_v23  }
 0x271   : > { %v4681_v6 = vpop.permute.xlu1 %1632  ;;  %v4683_v36 = vpop.permute.xlu0 %1914 }
 0x272   : > { %6051 = vst [vmem:[#allocation19_spill] sm:$0xff] %v4681_v6  ;;  %6052 = vst [vmem:[#allocation20_spill] sm:$0xff] %v4683_v36 }
 0x274   : > { %2172 = vperm.xlu1 %3209, %v4494_v40   ;;  %1427 = vperm.xlu0 %3211, %v4506_v61  }
 0x275   : > { %v4687_v62 = vpop.permute.xlu1 %1640  ;;  %v4689_v45 = vpop.permute.xlu0 %1922 }
 0x276   : > { %6053 = vst [vmem:[#allocation21_spill] sm:$0xff] %v4687_v62  ;;  %6054 = vst [vmem:[#allocation22_spill] sm:$0xff] %v4689_v45 }
 0x278   : > { %2180 = vperm.xlu1 %3209, %v4498_v17   ;;  %1437 = vperm.xlu0 %3211, %v4510_v20  }
 0x279   : > { %v4693_v58 = vpop.permute.xlu1 %1648  ;;  %v4695_v27 = vpop.permute.xlu0 %1930 }
 0x27a   : > { %6055 = vst [vmem:[#allocation23_spill] sm:$0xff] %v4693_v58  ;;  %6056 = vst [vmem:[#allocation24_spill] sm:$0xff] %v4695_v27  ;;  %v2404_v58 = vld [vmem:[#allocation3 + $0x98] sm:$0xff] }
 0x27c   : > { %2188 = vperm.xlu1 %3209, %v4502_v23   ;;  %1447 = vperm.xlu0 %3211, %v4514_v10  }
 0x27d   : > { %v4699_v36 = vpop.permute.xlu1 %1656  ;;  %v4701_v40 = vpop.permute.xlu0 %1938 }
 0x27e   : > { %6057 = vst [vmem:[#allocation25_spill] sm:$0xff] %v4699_v36  ;;  %6058 = vst [vmem:[#allocation26_spill] sm:$0xff] %v4701_v40  ;;  %v2385_v36 = vld [vmem:[#allocation3] sm:$0xff] }
 0x280   : > { %2196 = vperm.xlu1 %3209, %v4506_v61   ;;  %1457 = vperm.xlu0 %3211, %v4518_v56  }
 0x281   : > { %v4705_v45 = vpop.permute.xlu1 %1664  ;;  %v4707_v17 = vpop.permute.xlu0 %1946 }
 0x282   : > { %6059 = vst [vmem:[#allocation27_spill] sm:$0xff] %v4705_v45  ;;  %6060 = vst [vmem:[#allocation28_spill] sm:$0xff] %v4707_v17  ;;  %v2388_v45 = vld [vmem:[#allocation3 + $0x18] sm:$0xff] }
 0x284   : > { %2204 = vperm.xlu1 %3209, %v4510_v20   ;;  %1467 = vperm.xlu0 %3211, %v4522_v33  }
 0x285   : > { %v4711_v27 = vpop.permute.xlu1 %1672  ;;  %v4713_v23 = vpop.permute.xlu0 %1954 }
 0x286   : > { %6061 = vst [vmem:[#allocation29_spill] sm:$0xff] %v4711_v27  ;;  %6062 = vst [vmem:[#allocation30_spill] sm:$0xff] %v4713_v23  ;;  %v2390_v27 = vld [vmem:[#allocation3 + $0x28] sm:$0xff] }
 0x288   : > { %2212 = vperm.xlu1 %3209, %v4514_v10   ;;  %1477 = vperm.xlu0 %3211, %v4526_v47  }
 0x289   : > { %v4717_v40 = vpop.permute.xlu1 %1680  ;;  %v4719_v61 = vpop.permute.xlu0 %1962 }
 0x28a   : > { %6063 = vst [vmem:[#allocation31_spill] sm:$0xff] %v4717_v40  ;;  %6064 = vst [vmem:[#allocation32_spill] sm:$0xff] %v4719_v61 }
 0x28c   : > { %2220 = vperm.xlu1 %3209, %v4518_v56   ;;  %2419 = vperm.xlu0 %3211, %v2385_v36   ;;  %v2392_v36 = vld [vmem:[#allocation3 + $0x38] sm:$0xff] }
 0x28d   : > { %v4722_v17 = vpop.permute.xlu1 %1688 }
 0x28e   : > { %6065 = vst [vmem:[#allocation33_spill] sm:$0xff] %v4722_v17  ;;  %v4724_v20 = vpop.permute.xlu0 %2116 }
 0x28f   : > { %6066 = vst [vmem:[#allocation34_spill] sm:$0xff] %v4724_v20  ;;  %v2387_v20 = vld [vmem:[#allocation3 + $0x10] sm:$0xff] }
 0x290   : > { %2228 = vperm.xlu1 %3209, %v4522_v33   ;;  %2434 = vperm.xlu0 %3211, %v2388_v45   ;;  %v2386_v33 = vld [vmem:[#allocation3 + $0x8] sm:$0xff] }
 0x292   : > { %v4727_v23 = vpop.permute.xlu1 %1842  ;;  %v4729_v10 = vpop.permute.xlu0 %2128 }
 0x293   : > { %6067 = vst [vmem:[#allocation35_spill] sm:$0xff] %v4727_v23  ;;  %6068 = vst [vmem:[#allocation36_spill] sm:$0xff] %v4729_v10  ;;  %v2394_v10 = vld [vmem:[#allocation3 + $0x48] sm:$0xff] }
 0x294   : > { %2236 = vperm.xlu1 %3209, %v4526_v47   ;;  %2444 = vperm.xlu0 %3211, %v2390_v27  }
 0x296   : > { %v4732_v61 = vpop.permute.xlu1 %1846  ;;  %v4734_v56 = vpop.permute.xlu0 %2136 }
 0x297   : > { %6069 = vst [vmem:[#allocation37_spill] sm:$0xff] %v4732_v61  ;;  %6070 = vst [vmem:[#allocation38_spill] sm:$0xff] %v4734_v56  ;;  %v2396_v56 = vld [vmem:[#allocation3 + $0x58] sm:$0xff]  ;;  %v1286_v61 = vld [vmem:[%s246_s7] sm:$0xff] }
 0x298   : > { %3212 = vset.pattern.permute.xlu1 %v6036_v18  ;;  %2454 = vperm.xlu0 %3211, %v2392_v36   ;;  %v2389_v18 = vld [vmem:[#allocation3 + $0x20] sm:$0xff] }
 0x299   : > { %2424 = vperm.xlu1 %3212, %v2386_v33  }
 0x29a   : > { %v4737_v45 = vpop.permute.xlu1 %1854  ;;  %v4739_v23 = vpop.permute.xlu0 %2144 }
 0x29b   : > { %6071 = vst [vmem:[#allocation39_spill] sm:$0xff] %v4737_v45  ;;  %6072 = vst [vmem:[#allocation40_spill] sm:$0xff] %v4739_v23  ;;  %v2398_v23 = vld [vmem:[#allocation3 + $0x68] sm:$0xff]  ;;  %v1287_v45 = vmax.f32 %v1286_v61, 0.0  ;;  %v2399_v61 = vld [vmem:[#allocation3 + $0x70] sm:$0xff] }
 0x29c   : > { %2464 = vperm.xlu0 %3211, %v2394_v10   ;;  %v2391_v10 = vld [vmem:[#allocation3 + $0x30] sm:$0xff] }
 0x29d   : > { %2429 = vperm.xlu1 %3212, %v2387_v20  }
 0x29e   : > { %v4742_v47 = vpop.permute.xlu1 %1862  ;;  %v4744_v27 = vpop.permute.xlu0 %2152 }
 0x29f   : > { %6073 = vst [vmem:[#allocation41_spill] sm:$0xff] %v4742_v47  ;;  %6074 = vst [vmem:[#allocation42_spill] sm:$0xff] %v4744_v27  ;;  %v1481_v27 = vlaneseq }
 0x2a0   : > { %2474 = vperm.xlu0 %3211, %v2396_v56   ;;  %v2400_v56 = vld [vmem:[#allocation3 + $0x78] sm:$0xff] }
 0x2a1   : > { %2439 = vperm.xlu1 %3212, %v2389_v18   ;;  %v2393_v18 = vld [vmem:[#allocation3 + $0x40] sm:$0xff] }
 0x2a2   : > { %v4749_v36 = vpop.permute.xlu1 %1870  ;;  %v4751_v33 = vpop.permute.xlu0 %2160 }
 0x2a3   : > { %6075 = vst [vmem:[#allocation43_spill] sm:$0xff] %v4749_v36  ;;  %6076 = vst [vmem:[#allocation44_spill] sm:$0xff] %v4751_v33 }
 0x2a4   : > { %2484 = vperm.xlu0 %3211, %v2398_v23   ;;  %v1482_v23 = vshrl.u32 %v1481_v27, 7 }
 0x2a5   : > { %2449 = vperm.xlu1 %3212, %v2391_v10   ;;  %v2402_v10 = vld [vmem:[#allocation3 + $0x88] sm:$0xff] }
 0x2a6   : > { %v4754_v20 = vpop.permute.xlu1 %1878  ;;  %v4756_v47 = vpop.permute.xlu0 %2168  ;;  %v1693_v40 = vsub.s32 1, %v1482_v23  ;;  %v1487_v62 = vsub.s32 4, %v1482_v23  ;;  %v2241_v38 = vsub.s32 3, %v1482_v23  ;;  %v2245_v0 = vsub.s32 7, %v1482_v23 }
 0x2a7   : > { %6077 = vst [vmem:[#allocation45_spill] sm:$0xff] %v4754_v20  ;;  %6078 = vst [vmem:[#allocation46_spill] sm:$0xff] %v4756_v47  ;;  %v2395_v20 = vld [vmem:[#allocation3 + $0x50] sm:$0xff] }
 0x2a8   : > { %2494 = vperm.xlu0 %3211, %v2400_v56   ;;  %v1483_v56 = vsub.s32 0, %v1482_v23  ;;  %v1694_v6 = vrot.slane %v1287_v45, %v1693_v40 }
 0x2a9   : > { %2459 = vperm.xlu1 %3212, %v2393_v18   ;;  %v1697_v18 = vsub.s32 5, %v1482_v23 }
 0x2aa   : > { %v4761_v36 = vpop.permute.xlu1 %1886  ;;  %v4763_v33 = vpop.permute.xlu0 %2176 }
 0x2ab   : > { %6079 = vst [vmem:[#allocation47_spill] sm:$0xff] %v4761_v36  ;;  %6080 = vst [vmem:[#allocation48_spill] sm:$0xff] %v4763_v33  ;;  %v2397_v36 = vld [vmem:[#allocation3 + $0x60] sm:$0xff]  ;;  %v1698_v59 = vrot.slane %v1287_v45, %v1697_v18 }
 0x2ac   : > { %2504 = vperm.xlu0 %3211, %v2402_v10   ;;  %v1484_v10 = vrot.slane %v1287_v45, %v1483_v56 }
 0x2ad   : > { %2469 = vperm.xlu1 %3212, %v2395_v20   ;;  %v1967_v20 = vsub.s32 2, %v1482_v23 }
 0x2ae   : > { %v4765_v47 = vpop.permute.xlu1 %1894  ;;  %v4767_v17 = vpop.permute.xlu0 %2184 }
 0x2af   : > { %6081 = vst [vmem:[#allocation49_spill] sm:$0xff] %v4765_v47  ;;  %6082 = vst [vmem:[#allocation50_spill] sm:$0xff] %v4767_v17  ;;  %v1488_v47 = vrot.slane %v1287_v45, %v1487_v62  ;;  %v1971_v17 = vsub.s32 6, %v1482_v23  ;;  %v4783_v62 = vrot.slane %v1698_v59, %v1693_v40 }
 0x2b0   : > { %2514 = vperm.xlu0 %3211, %v2404_v58  }
 0x2b1   : > { %2479 = vperm.xlu1 %3212, %v2397_v36   ;;  %v4777_v36 = vrot.slane %v1484_v10, %v1483_v56  ;;  %v4781_v12 = vrot.slane %v1488_v47, %v1483_v56  ;;  %v1972_v18 = vrot.slane %v1287_v45, %v1971_v17  ;;  %v1718_v10 = vmul.f32 %v4783_v62, %v4543_v63 }
 0x2b2   : > { %v4769_v33 = vpop.permute.xlu1 %1902  ;;  %v4771_v27 = vpop.permute.xlu0 %2192  ;;  %v2242_v47 = vrot.slane %v1287_v45, %v2241_v38  ;;  %v2246_v56 = vrot.slane %v1287_v45, %v2245_v0  ;;  %v4813_v0 = vmul.f32 %v4783_v62, %v4535_v42 }
 0x2b3   : > { %6083 = vst [vmem:[#allocation51_spill] sm:$0xff] %v4769_v33  ;;  %6084 = vst [vmem:[#allocation52_spill] sm:$0xff] %v4771_v27  ;;  %v4779_v33 = vrot.slane %v1694_v6, %v1693_v40  ;;  %v1968_v27 = vrot.slane %v1287_v45, %v1967_v20  ;;  %v1507_v23 = vmul.f32 %v4777_v36, %v4541_v15 }
 0x2b4   : > { %2524 = vperm.xlu0 %3211, %v2406_v44   ;;  %v2401_v44 = vld [vmem:[#allocation3 + $0x80] sm:$0xff]  ;;  %v1508_v6 = vmul.f32 %v4781_v12, %v4541_v15  ;;  %v4805_v15 = vmul.f32 %v4777_v36, %v4528_v51  ;;  %6091 = vst [vmem:[#allocation59_spill] sm:$0xff] %v4813_v0  ;;  %v4815_v45 = vrot.slane %v1972_v18, %v1967_v20 }
 0x2b5   : > { %2489 = vperm.xlu1 %3212, %v2399_v61   ;;  %v1717_v61 = vmul.f32 %v4779_v33, %v4543_v63  ;;  %v1721_v17 = vmul.f32 %v4779_v33, %v4549_v32  ;;  %v4809_v63 = vmul.f32 %v4779_v33, %v4535_v42  ;;  %v4835_v18 = vrot.slane %v2242_v47, %v2241_v38  ;;  %v2405_v47 = vld [vmem:[#allocation3 + $0xa0] sm:$0xff] }
 0x2b6   : > { %v4773_v54 = vpop.permute.xlu1 %1910  ;;  %v4775_v58 = vpop.permute.xlu0 %2200  ;;  %6092 = vst [vmem:[#allocation60_spill] sm:$0xff] %v4815_v45  ;;  %v4831_v42 = vadd.f32 %v1718_v10, %v1508_v6  ;;  %v1726_v6 = vmul.f32 %v4783_v62, %v4555_v21  ;;  %v1519_v10 = vmul.f32 %v4777_v36, %v4559_v60 }
 0x2b7   : > { %6085 = vst [vmem:[#allocation53_spill] sm:$0xff] %v4773_v54  ;;  %6086 = vst [vmem:[#allocation54_spill] sm:$0xff] %v4775_v58  ;;  %v4801_v58 = vrot.slane %v1968_v27, %v1967_v20  ;;  %v4819_v27 = vmul.f32 %v4781_v12, %v4528_v51  ;;  %v4827_v54 = vmul.f32 %v4781_v12, %v4537_v43 }
 0x2b8   : > { %2534 = vperm.xlu0 %3211, %v2408_v19   ;;  %v1511_v19 = vmul.f32 %v4777_v36, %v4547_v4  ;;  %6090 = vst [vmem:[#allocation58_spill] sm:$0xff] %v4809_v63  ;;  %v4829_v63 = vadd.f32 %v1717_v61, %v1507_v23  ;;  %6095 = vst [vmem:[#allocation63_spill] sm:$0xff] %v4831_v42  ;;  %v1512_v20 = vmul.f32 %v4781_v12, %v4547_v4  ;;  %v2412_v4 = vld [vmem:[#allocation3 + $0xd8] sm:$0xff] }
 0x2b9   : > { %2499 = vperm.xlu1 %3212, %v2401_v44   ;;  %6089 = vst [vmem:[#allocation57_spill] sm:$0xff] %v4801_v58  ;;  %v2410_v44 = vld [vmem:[#allocation3 + $0xc8] sm:$0xff]  ;;  %6093 = vst [vmem:[#allocation61_spill] sm:$0xff] %v4827_v54  ;;  %v4837_v51 = vrot.slane %v2246_v56, %v2241_v38  ;;  %v1515_v23 = vmul.f32 %v4777_v36, %v4553_v49  ;;  %v1516_v61 = vmul.f32 %v4781_v12, %v4553_v49 }
 0x2ba   : > { %v4793_v59 = vpop.permute.xlu1 %1918  ;;  %v4795_v40 = vpop.permute.xlu0 %2208  ;;  %6094 = vst [vmem:[#allocation62_spill] sm:$0xff] %v4829_v63  ;;  %6096 = vst [vmem:[#allocation64_spill] sm:$0xff] %v4835_v18  ;;  %v4845_v11 = vadd.f32 %v1721_v17, %v1511_v19  ;;  %v1725_v38 = vmul.f32 %v4779_v33, %v4555_v21  ;;  %v1729_v56 = vmul.f32 %v4779_v33, %v4561_v3 }
 0x2bb   : > { %6087 = vst [vmem:[#allocation55_spill] sm:$0xff] %v4793_v59  ;;  %6088 = vst [vmem:[#allocation56_spill] sm:$0xff] %v4795_v40  ;;  %v2403_v40 = vld [vmem:[#allocation3 + $0x90] sm:$0xff]  ;;  %v4823_v59 = vmul.f32 %v4777_v36, %v4537_v43  ;;  %v1722_v43 = vmul.f32 %v4783_v62, %v4549_v32  ;;  %v1520_v32 = vmul.f32 %v4781_v12, %v4559_v60 }
 0x2bc   : > { %2544 = vperm.xlu0 %3211, %v2410_v44   ;;  %6097 = vst [vmem:[#allocation65_spill] sm:$0xff] %v4837_v51  ;;  %6100 = vst [vmem:[#allocation68_spill] sm:$0xff] %v4845_v11  ;;  %v1730_v49 = vmul.f32 %v4783_v62, %v4561_v3  ;;  %v1524_v21 = vmul.f32 %v4781_v12, %v4565_v35  ;;  %v1733_v19 = vmul.f32 %v4779_v33, %v4567_v34  ;;  %v2414_v11 = vld [vmem:[#allocation3 + $0xe8] sm:$0xff] }
 0x2bd   : > { %2509 = vperm.xlu1 %3212, %v2403_v40   ;;  %v1523_v40 = vmul.f32 %v4777_v36, %v4565_v35  ;;  %v1734_v60 = vmul.f32 %v4783_v62, %v4567_v34  ;;  %v1527_v17 = vmul.f32 %v4777_v36, %v4571_v37  ;;  %v1737_v35 = vmul.f32 %v4779_v33, %v4573_v25 }
 0x2be   : > { %v4839_v44 = vpop.permute.xlu1 %1926  ;;  %v4841_v0 = vpop.permute.xlu0 %2216  ;;  %v1532_v34 = vmul.f32 %v4781_v12, %v4577_v16  ;;  %v1745_v42 = vmul.f32 %v4779_v33, %v4585_v29  ;;  %v1536_v63 = vmul.f32 %v4781_v12, %v4583_v46  ;;  %v1539_v51 = vmul.f32 %v4777_v36, %v4589_v7 }
 0x2bf   : > { %6098 = vst [vmem:[#allocation66_spill] sm:$0xff] %v4839_v44  ;;  %6099 = vst [vmem:[#allocation67_spill] sm:$0xff] %v4841_v0  ;;  %v1531_v44 = vmul.f32 %v4777_v36, %v4577_v16  ;;  %v1746_v16 = vmul.f32 %v4783_v62, %v4585_v29  ;;  %v4903_v18 = vadd.f32 %v1722_v43, %v1512_v20  ;;  %v2416_v20 = vld [vmem:[#allocation3 + $0xf8] sm:$0xff] }
 0x2c0   : > { %2554 = vperm.xlu0 %3211, %v2412_v4   ;;  %v1528_v4 = vmul.f32 %v4781_v12, %v4571_v37  ;;  %v1741_v37 = vmul.f32 %v4779_v33, %v4579_v5  ;;  %v4905_v28 = vadd.f32 %v1725_v38, %v1515_v23  ;;  %v4907_v52 = vadd.f32 %v1726_v6, %v1516_v61  ;;  %v2409_v6 = vld [vmem:[#allocation3 + $0xc0] sm:$0xff] }
 0x2c1   : > { %2519 = vperm.xlu1 %3212, %v2405_v47   ;;  %v1738_v47 = vmul.f32 %v4783_v62, %v4573_v25  ;;  %v2407_v25 = vld [vmem:[#allocation3 + $0xb0] sm:$0xff]  ;;  %v4915_v29 = vadd.f32 %v1730_v49, %v1520_v32  ;;  %v4917_v57 = vadd.f32 %v1733_v19, %v1523_v40  ;;  %v4919_v1 = vadd.f32 %v1734_v60, %v1524_v21 }
 0x2c2   : > { %v4875_v3 = vpop.permute.xlu1 %1934  ;;  %v4877_v0 = vpop.permute.xlu0 %2224  ;;  %v4921_v54 = vadd.f32 %v1737_v35, %v1527_v17  ;;  %v4925_v23 = vadd.f32 %v1741_v37, %v1531_v44  ;;  %v1540_v32 = vmul.f32 %v4781_v12, %v4589_v7  ;;  %v1543_v44 = vmul.f32 %v4777_v36, %v4595_v39 }
 0x2c3   : > { %6101 = vst [vmem:[#allocation69_spill] sm:$0xff] %v4875_v3  ;;  %6102 = vst [vmem:[#allocation70_spill] sm:$0xff] %v4877_v0  ;;  %v1742_v3 = vmul.f32 %v4783_v62, %v4579_v5  ;;  %v1535_v0 = vmul.f32 %v4777_v36, %v4583_v46  ;;  %v1749_v5 = vmul.f32 %v4779_v33, %v4591_v2 }
 0x2c4   : > { %2564 = vperm.xlu0 %3211, %v2414_v11   ;;  %v4909_v11 = vadd.f32 %v1729_v56, %v1519_v10  ;;  %v4923_v43 = vadd.f32 %v1738_v47, %v1528_v4  ;;  %v4931_v10 = vadd.f32 %v1746_v16, %v1536_v63  ;;  %v1750_v56 = vmul.f32 %v4783_v62, %v4591_v2  ;;  %v2411_v4 = vld [vmem:[#allocation3 + $0xd0] sm:$0xff] }
 0x2c5   : > { %2529 = vperm.xlu1 %3212, %v2407_v25   ;;  %v4927_v61 = vadd.f32 %v1742_v3, %v1532_v34  ;;  %v4929_v38 = vadd.f32 %v1745_v42, %v1535_v0  ;;  %v4937_v49 = vadd.f32 %v1749_v5, %v1539_v51  ;;  %v1544_v0 = vmul.f32 %v4781_v12, %v4595_v39 }
 0x2c6   : > { %v4911_v24 = vpop.permute.xlu1 %1942  ;;  %v4913_v46 = vpop.permute.xlu0 %2232  ;;  %v1753_v42 = vmul.f32 %v4779_v33, %v4597_v50  ;;  %v1754_v63 = vmul.f32 %v4783_v62, %v4597_v50  ;;  %v1547_v7 = vmul.f32 %v4777_v36, %v4601_v55  ;;  %v1757_v2 = vmul.f32 %v4779_v33, %v4603_v30 }
 0x2c7   : > { %6103 = vst [vmem:[#allocation71_spill] sm:$0xff] %v4913_v46  ;;  %v1709_v51 = vmul.f32 %v4779_v33, %v4626_v31  ;;  %v1710_v39 = vmul.f32 %v4783_v62, %v4626_v31  ;;  %v1548_v19 = vmul.f32 %v4781_v12, %v4601_v55  ;;  %v1758_v50 = vmul.f32 %v4783_v62, %v4603_v30 }
 0x2c8   : > { %2574 = vperm.xlu0 %3211, %v2416_v20   ;;  %v1551_v60 = vmul.f32 %v4777_v36, %v4607_v9  ;;  %v1761_v17 = vmul.f32 %v4779_v33, %v4609_v8  ;;  %v1552_v3 = vmul.f32 %v4781_v12, %v4607_v9  ;;  %v1762_v31 = vmul.f32 %v4783_v62, %v4609_v8 }
 0x2c9   : > { %2539 = vperm.xlu1 %3212, %v2409_v6   ;;  %v1555_v35 = vmul.f32 %v4777_v36, %v4613_v41  ;;  %v1765_v55 = vmul.f32 %v4779_v33, %v4615_v13  ;;  %v4975_v30 = vadd.f32 %v1750_v56, %v1540_v32  ;;  %v4977_v47 = vadd.f32 %v1753_v42, %v1543_v44  ;;  %v2413_v56 = vld [vmem:[#allocation3 + $0xe0] sm:$0xff] }
 0x2ca   : > { %v4947_v40 = vpop.permute.xlu1 %1950  ;;  %v1556_v34 = vmul.f32 %v4781_v12, %v4613_v41  ;;  %v1766_v9 = vmul.f32 %v4783_v62, %v4615_v13  ;;  %v4985_v8 = vadd.f32 %v1754_v63, %v1544_v0  ;;  %v4987_v25 = vadd.f32 %v1757_v2, %v1547_v7 }
 0x2cb   : > { %6104 = vst [vmem:[#allocation72_spill] sm:$0xff] %v4947_v40  ;;  %v4957_v21 = vpop.permute.xlu0 %1327  ;;  %v1773_v16 = vadd.f32 %v1709_v51, %v4805_v15  ;;  %v1774_v5 = vadd.f32 %v1710_v39, %v4819_v27  ;;  %v4993_v6 = vadd.f32 %v1758_v50, %v1548_v19  ;;  %v4995_v32 = vadd.f32 %v1761_v17, %v1551_v60  ;;  %v6115_v60 = vld [vmem:[#allocation61_spill] sm:$0xff]  ;;  %v6146_v40 = vld [vmem:[#allocation15_spill] sm:$0xff] }
 0x2cc   : > { %v1713_v41 = vmul.f32 %v4779_v33, %v4632_v48  ;;  %v1714_v13 = vmul.f32 %v4783_v62, %v4632_v48  ;;  %v5001_v44 = vadd.f32 %v1762_v31, %v1552_v3  ;;  %v5003_v0 = vadd.f32 %v1765_v55, %v1555_v35  ;;  %v2415_v31 = vld [vmem:[#allocation3 + $0xf0] sm:$0xff]  ;;  %v6118_v55 = vld [vmem:[#allocation6_spill] sm:$0xff] }
 0x2cd   : > { %2549 = vperm.xlu1 %3212, %v2411_v4   ;;  %v1983_v15 = vmul.f32 %v4801_v58, %v4628_v26  ;;  %v1984_v27 = vmul.f32 %v4815_v45, %v4628_v26  ;;  %v5009_v42 = vadd.f32 %v1766_v9, %v1556_v34  ;;  %v5013_v63 = vmul.f32 %v4777_v36, %v4619_v22  ;;  %v6117_v4 = vld [vmem:[#allocation5_spill] sm:$0xff]  ;;  %v6121_v9 = vld [vmem:[#allocation7_spill] sm:$0xff] }
 0x2ce   : > { %v4983_v37 = vpop.permute.xlu1 %1958  ;;  %6106 = vst [vmem:[#allocation74_spill] sm:$0xff] %v5003_v0  ;;  %v5017_v48 = vmul.f32 %v4781_v12, %v4619_v22  ;;  %v5021_v7 = vmul.f32 %v4779_v33, %v4621_v53  ;;  %v5025_v2 = vmul.f32 %v4783_v62, %v4621_v53  ;;  %v5033_v39 = vmul.f32 %v4801_v58, %v4634_v14 }
 0x2cf   : > { %6105 = vst [vmem:[#allocation73_spill] sm:$0xff] %v4983_v37  ;;  %v4991_v20 = vpop.permute.xlu0 %1337  ;;  %6107 = vst [vmem:[#allocation75_spill] sm:$0xff] %v5009_v42  ;;  %v5027_v26 = vadd.f32 %v1983_v15, %v1773_v16  ;;  %v5029_v51 = vadd.f32 %v1984_v27, %v1774_v5  ;;  %v5040_v50 = vadd.f32 %v1713_v41, %v4823_v59  ;;  %v6124_v5 = vld [vmem:[#allocation8_spill] sm:$0xff]  ;;  %v6143_v42 = vld [vmem:[#allocation14_spill] sm:$0xff] }
 0x2d0   : > { %6108 = vst [vmem:[#allocation76_spill] sm:$0xff] %v5013_v63  ;;  %6109 = vst [vmem:[#allocation77_spill] sm:$0xff] %v5017_v48  ;;  %v5043_v17 = vadd.f32 %v1714_v13, %v6115_v60  ;;  %v5047_v53 = vmul.f32 %v4815_v45, %v4634_v14  ;;  %v5051_v3 = vmul.f32 %v4779_v33, %v6117_v4  ;;  %v6130_v60 = vld [vmem:[#allocation10_spill] sm:$0xff] }
 0x2d1   : > { %2559 = vperm.xlu1 %3212, %v2413_v56   ;;  %6110 = vst [vmem:[#allocation78_spill] sm:$0xff] %v5021_v7  ;;  %6111 = vst [vmem:[#allocation79_spill] sm:$0xff] %v5025_v2  ;;  %v5055_v35 = vmul.f32 %v4783_v62, %v6117_v4  ;;  %v5059_v59 = vmul.f32 %v4801_v58, %v6118_v55  ;;  %v5063_v34 = vmul.f32 %v4815_v45, %v6118_v55  ;;  %v6127_v56 = vld [vmem:[#allocation9_spill] sm:$0xff]  ;;  %v6133_v55 = vld [vmem:[#allocation11_spill] sm:$0xff] }
 0x2d2   : > { %6112 = vst [vmem:[#allocation80_spill] sm:$0xff] %v5027_v26  ;;  %6113 = vst [vmem:[#allocation81_spill] sm:$0xff] %v5029_v51  ;;  %v5067_v14 = vmul.f32 %v4779_v33, %v6121_v9  ;;  %v5071_v16 = vmul.f32 %v4783_v62, %v6121_v9  ;;  %v5075_v41 = vmul.f32 %v4801_v58, %v6124_v5  ;;  %v6137_v2 = vld [vmem:[#allocation12_spill] sm:$0xff]  ;;  %v6140_v7 = vld [vmem:[#allocation13_spill] sm:$0xff] }
 0x2d3   : > { %6114 = vst [vmem:[#allocation82_spill] sm:$0xff] %v5033_v39  ;;  %v5035_v19 = vpop.permute.xlu1 %2112  ;;  %v5037_v22 = vpop.permute.xlu0 %1347  ;;  %6116 = vst [vmem:[#allocation61_spill] sm:$0xff] %v5047_v53  ;;  %v5079_v13 = vmul.f32 %v4815_v45, %v6124_v5  ;;  %v5083_v15 = vmul.f32 %v4779_v33, %v6127_v56  ;;  %v5087_v27 = vmul.f32 %v4783_v62, %v6127_v56  ;;  %v6220_v51 = vld [vmem:[#allocation62_spill] sm:$0xff]  ;;  %v6222_v53 = vld [vmem:[#allocation63_spill] sm:$0xff] }
 0x2d4   : > { %6119 = vst [vmem:[#allocation5_spill] sm:$0xff] %v5059_v59  ;;  %6120 = vst [vmem:[#allocation6_spill] sm:$0xff] %v5063_v34  ;;  %v5091_v4 = vmul.f32 %v4801_v58, %v6130_v60  ;;  %v5099_v9 = vmul.f32 %v4779_v33, %v6133_v55  ;;  %v5107_v56 = vmul.f32 %v4783_v62, %v6133_v55  ;;  %v6218_v59 = vld [vmem:[#allocation36_spill] sm:$0xff]  ;;  %v6223_v26 = vld [vmem:[#allocation43_spill] sm:$0xff] }
 0x2d5   : > { %6122 = vst [vmem:[#allocation7_spill] sm:$0xff] %v5067_v14  ;;  %2569 = vperm.xlu1 %3212, %v2415_v31   ;;  %6123 = vst [vmem:[#allocation83_spill] sm:$0xff] %v5071_v16  ;;  %v5095_v31 = vmul.f32 %v4815_v45, %v6130_v60  ;;  %v5111_v48 = vmul.f32 %v4801_v58, %v6137_v2  ;;  %v5115_v60 = vmul.f32 %v4815_v45, %v6137_v2 }
 0x2d6   : > { %6125 = vst [vmem:[#allocation8_spill] sm:$0xff] %v5075_v41  ;;  %6126 = vst [vmem:[#allocation84_spill] sm:$0xff] %v5079_v13  ;;  %v5119_v63 = vmul.f32 %v4779_v33, %v6140_v7  ;;  %v5123_v37 = vmul.f32 %v4783_v62, %v6140_v7  ;;  %v5127_v55 = vmul.f32 %v4801_v58, %v6143_v42  ;;  %v6169_v13 = vld [vmem:[#allocation22_spill] sm:$0xff] }
 0x2d7   : > { %6128 = vst [vmem:[#allocation9_spill] sm:$0xff] %v5083_v15  ;;  %6129 = vst [vmem:[#allocation85_spill] sm:$0xff] %v5087_v27  ;;  %v5101_v5 = vpop.permute.xlu1 %2120  ;;  %v5103_v46 = vpop.permute.xlu0 %1357  ;;  %v5131_v0 = vmul.f32 %v4815_v45, %v6143_v42  ;;  %v5135_v2 = vmul.f32 %v4779_v33, %v6146_v40  ;;  %v6219_v27 = vld [vmem:[#allocation38_spill] sm:$0xff]  ;;  %v2000_v39 = vmul.f32 %v4815_v45, %v6223_v26 }
 0x2d8   : > { %6131 = vst [vmem:[#allocation10_spill] sm:$0xff] %v5091_v4  ;;  %6132 = vst [vmem:[#allocation86_spill] sm:$0xff] %v5095_v31  ;;  %v6155_v4 = vld [vmem:[#allocation18_spill] sm:$0xff] }
 0x2d9   : > { %6134 = vst [vmem:[#allocation11_spill] sm:$0xff] %v5099_v9  ;;  %6135 = vst [vmem:[#allocation87_spill] sm:$0xff] %v5101_v5 }
 0x2da   : > { %6136 = vst [vmem:[#allocation88_spill] sm:$0xff] %v5107_v56  ;;  %6138 = vst [vmem:[#allocation12_spill] sm:$0xff] %v5111_v48  ;;  %v6149_v48 = vld [vmem:[#allocation16_spill] sm:$0xff] }
 0x2db   : > { %6139 = vst [vmem:[#allocation89_spill] sm:$0xff] %v5115_v60  ;;  %6141 = vst [vmem:[#allocation13_spill] sm:$0xff] %v5119_v63  ;;  %v5139_v60 = vmul.f32 %v4783_v62, %v6146_v40  ;;  %v5143_v7 = vmul.f32 %v4801_v58, %v6149_v48  ;;  %v5147_v31 = vmul.f32 %v4815_v45, %v6149_v48  ;;  %v6212_v56 = vld [vmem:[#allocation64_spill] sm:$0xff] }
 0x2dc   : > { %6142 = vst [vmem:[#allocation90_spill] sm:$0xff] %v5123_v37  ;;  %6144 = vst [vmem:[#allocation14_spill] sm:$0xff] %v5127_v55  ;;  %v6152_v55 = vld [vmem:[#allocation17_spill] sm:$0xff]  ;;  %v5159_v40 = vmul.f32 %v4801_v58, %v6155_v4  ;;  %v6195_v37 = vld [vmem:[#allocation30_spill] sm:$0xff] }
 0x2dd   : > { %6145 = vst [vmem:[#allocation91_spill] sm:$0xff] %v5131_v0  ;;  %6147 = vst [vmem:[#allocation15_spill] sm:$0xff] %v5135_v2  ;;  %v5151_v42 = vmul.f32 %v4779_v33, %v6152_v55  ;;  %v5155_v0 = vmul.f32 %v4783_v62, %v6152_v55  ;;  %v5171_v2 = vpop.permute.xlu0 %1367 }
 0x2de   : > { %6148 = vst [vmem:[#allocation92_spill] sm:$0xff] %v5139_v60  ;;  %6150 = vst [vmem:[#allocation16_spill] sm:$0xff] %v5143_v7  ;;  %v5163_v60 = vmul.f32 %v4815_v45, %v6155_v4  ;;  %v6158_v7 = vld [vmem:[#allocation19_spill] sm:$0xff] }
 0x2df   : > { %6151 = vst [vmem:[#allocation93_spill] sm:$0xff] %v5147_v31  ;;  %6153 = vst [vmem:[#allocation17_spill] sm:$0xff] %v5151_v42  ;;  %v5167_v48 = vmul.f32 %v4779_v33, %v6158_v7  ;;  %v5169_v31 = vpop.permute.xlu1 %2124  ;;  %v5175_v55 = vmul.f32 %v4783_v62, %v6158_v7  ;;  %v5195_v7 = vmul.f32 %v4801_v58, %v6169_v13 }
 0x2e0   : > { %6154 = vst [vmem:[#allocation94_spill] sm:$0xff] %v5155_v0  ;;  %6156 = vst [vmem:[#allocation18_spill] sm:$0xff] %v5159_v40  ;;  %v6163_v0 = vld [vmem:[#allocation20_spill] sm:$0xff] }
 0x2e1   : > { %6157 = vst [vmem:[#allocation95_spill] sm:$0xff] %v5163_v60  ;;  %6159 = vst [vmem:[#allocation19_spill] sm:$0xff] %v5167_v48  ;;  %v5179_v42 = vmul.f32 %v4801_v58, %v6163_v0  ;;  %v5183_v4 = vmul.f32 %v4815_v45, %v6163_v0  ;;  %v6166_v60 = vld [vmem:[#allocation21_spill] sm:$0xff]  ;;  %v5239_v41 = vpop.permute.xlu0 %1377 }
 0x2e2   : > { %6160 = vst [vmem:[#allocation96_spill] sm:$0xff] %v5169_v31  ;;  %6161 = vst [vmem:[#allocation97_spill] sm:$0xff] %v5171_v2  ;;  %v5187_v40 = vmul.f32 %v4779_v33, %v6166_v60  ;;  %v5191_v48 = vmul.f32 %v4783_v62, %v6166_v60 }
 0x2e3   : > { %6162 = vst [vmem:[#allocation98_spill] sm:$0xff] %v5175_v55  ;;  %6164 = vst [vmem:[#allocation20_spill] sm:$0xff] %v5179_v42  ;;  %v5199_v55 = vmul.f32 %v4815_v45, %v6169_v13  ;;  %v6172_v42 = vld [vmem:[#allocation23_spill] sm:$0xff] }
 0x2e4   : > { %6165 = vst [vmem:[#allocation99_spill] sm:$0xff] %v5183_v4  ;;  %6167 = vst [vmem:[#allocation21_spill] sm:$0xff] %v5187_v40  ;;  %v5203_v0 = vmul.f32 %v4779_v33, %v6172_v42  ;;  %v5207_v4 = vmul.f32 %v4783_v62, %v6172_v42  ;;  %v6175_v40 = vld [vmem:[#allocation24_spill] sm:$0xff] }
 0x2e5   : > { %6168 = vst [vmem:[#allocation100_spill] sm:$0xff] %v5191_v48  ;;  %6170 = vst [vmem:[#allocation22_spill] sm:$0xff] %v5195_v7  ;;  %v5211_v60 = vmul.f32 %v4801_v58, %v6175_v40  ;;  %v5215_v48 = vmul.f32 %v4815_v45, %v6175_v40  ;;  %v6178_v7 = vld [vmem:[#allocation25_spill] sm:$0xff] }
 0x2e6   : > { %6171 = vst [vmem:[#allocation101_spill] sm:$0xff] %v5199_v55  ;;  %6173 = vst [vmem:[#allocation23_spill] sm:$0xff] %v5203_v0  ;;  %v5219_v13 = vmul.f32 %v4779_v33, %v6178_v7  ;;  %v5223_v55 = vmul.f32 %v4783_v62, %v6178_v7  ;;  %v6181_v0 = vld [vmem:[#allocation26_spill] sm:$0xff] }
 0x2e7   : > { %6174 = vst [vmem:[#allocation102_spill] sm:$0xff] %v5207_v4  ;;  %6176 = vst [vmem:[#allocation24_spill] sm:$0xff] %v5211_v60  ;;  %v5227_v42 = vmul.f32 %v4801_v58, %v6181_v0  ;;  %v5231_v4 = vmul.f32 %v4815_v45, %v6181_v0  ;;  %v6184_v60 = vld [vmem:[#allocation27_spill] sm:$0xff] }
 0x2e8   : > { %6177 = vst [vmem:[#allocation103_spill] sm:$0xff] %v5215_v48  ;;  %6179 = vst [vmem:[#allocation25_spill] sm:$0xff] %v5219_v13  ;;  %v5235_v40 = vmul.f32 %v4779_v33, %v6184_v60  ;;  %v5237_v48 = vpop.permute.xlu1 %2132  ;;  %v5243_v7 = vmul.f32 %v4783_v62, %v6184_v60  ;;  %v5263_v60 = vmul.f32 %v4801_v58, %v6195_v37 }
 0x2e9   : > { %6180 = vst [vmem:[#allocation104_spill] sm:$0xff] %v5223_v55  ;;  %6182 = vst [vmem:[#allocation26_spill] sm:$0xff] %v5227_v42  ;;  %v6189_v55 = vld [vmem:[#allocation28_spill] sm:$0xff] }
 0x2ea   : > { %6183 = vst [vmem:[#allocation105_spill] sm:$0xff] %v5231_v4  ;;  %6185 = vst [vmem:[#allocation27_spill] sm:$0xff] %v5235_v40  ;;  %v5247_v13 = vmul.f32 %v4801_v58, %v6189_v55  ;;  %v5251_v0 = vmul.f32 %v4815_v45, %v6189_v55  ;;  %v6192_v4 = vld [vmem:[#allocation29_spill] sm:$0xff] }
 0x2eb   : > { %6186 = vst [vmem:[#allocation106_spill] sm:$0xff] %v5237_v48  ;;  %6187 = vst [vmem:[#allocation107_spill] sm:$0xff] %v5239_v41  ;;  %v5255_v42 = vmul.f32 %v4779_v33, %v6192_v4  ;;  %v5259_v40 = vmul.f32 %v4783_v62, %v6192_v4 }
 0x2ec   : > { %6188 = vst [vmem:[#allocation108_spill] sm:$0xff] %v5243_v7  ;;  %6190 = vst [vmem:[#allocation28_spill] sm:$0xff] %v5247_v13  ;;  %v5267_v7 = vmul.f32 %v4815_v45, %v6195_v37  ;;  %v6198_v13 = vld [vmem:[#allocation31_spill] sm:$0xff]  ;;  %v5299_v48 = vpop.permute.xlu1 %2140 }
 0x2ed   : > { %6191 = vst [vmem:[#allocation109_spill] sm:$0xff] %v5251_v0  ;;  %6193 = vst [vmem:[#allocation29_spill] sm:$0xff] %v5255_v42  ;;  %v5271_v55 = vmul.f32 %v4779_v33, %v6198_v13  ;;  %v5275_v0 = vmul.f32 %v4783_v62, %v6198_v13  ;;  %v6201_v42 = vld [vmem:[#allocation32_spill] sm:$0xff]  ;;  %v6208_v13 = vld [vmem:[#allocation37_spill] sm:$0xff] }
 0x2ee   : > { %6194 = vst [vmem:[#allocation110_spill] sm:$0xff] %v5259_v40  ;;  %6196 = vst [vmem:[#allocation30_spill] sm:$0xff] %v5263_v60  ;;  %v5279_v4 = vmul.f32 %v4801_v58, %v6201_v42  ;;  %v5283_v40 = vmul.f32 %v4815_v45, %v6201_v42  ;;  %v6204_v60 = vld [vmem:[#allocation39_spill] sm:$0xff]  ;;  %v5301_v42 = vpop.permute.xlu0 %1387 }
 0x2ef   : > { %6197 = vst [vmem:[#allocation111_spill] sm:$0xff] %v5267_v7  ;;  %6199 = vst [vmem:[#allocation31_spill] sm:$0xff] %v5271_v55  ;;  %v1991_v37 = vmul.f32 %v4801_v58, %v6204_v60  ;;  %v6205_v7 = vld [vmem:[#allocation33_spill] sm:$0xff] }
 0x2f0   : > { %6200 = vst [vmem:[#allocation112_spill] sm:$0xff] %v5275_v0  ;;  %6202 = vst [vmem:[#allocation32_spill] sm:$0xff] %v5279_v4  ;;  %v5289_v63 = vmul.f32 %v4779_v33, %v6205_v7  ;;  %v5293_v55 = vmul.f32 %v4783_v62, %v6205_v7  ;;  %v1987_v0 = vmul.f32 %v4801_v58, %v6208_v13 }
 0x2f1   : > { %6203 = vst [vmem:[#allocation113_spill] sm:$0xff] %v5283_v40  ;;  %v1992_v4 = vmul.f32 %v4815_v45, %v6204_v60  ;;  %6209 = vst [vmem:[#allocation37_spill] sm:$0xff] %v5299_v48  ;;  %v6211_v40 = vld [vmem:[#allocation34_spill] sm:$0xff]  ;;  %v1988_v33 = vmul.f32 %v4815_v45, %v6208_v13  ;;  %v6217_v48 = vld [vmem:[#allocation35_spill] sm:$0xff]  ;;  %v2265_v13 = vmul.f32 %v6212_v56, %v6218_v59 }
 0x2f2   : > { %6206 = vst [vmem:[#allocation39_spill] sm:$0xff] %v5289_v63  ;;  %6207 = vst [vmem:[#allocation33_spill] sm:$0xff] %v5293_v55  ;;  %v5305_v9 = vmul.f32 %v6212_v56, %v6211_v40  ;;  %v6214_v63 = vld [vmem:[#allocation41_spill] sm:$0xff]  ;;  %v5323_v34 = vmul.f32 %v4815_v45, %v6217_v48  ;;  %v2055_v41 = vadd.f32 %v1991_v37, %v6220_v51  ;;  %v5344_v2 = vpop.permute.xlu0 %1397 }
 0x2f3   : > { %6210 = vst [vmem:[#allocation114_spill] sm:$0xff] %v5301_v42  ;;  %v1995_v62 = vmul.f32 %v4801_v58, %v6214_v63  ;;  %v1996_v7 = vmul.f32 %v4815_v45, %v6214_v63  ;;  %v6215_v55 = vld [vmem:[#allocation65_spill] sm:$0xff]  ;;  %v5319_v42 = vmul.f32 %v4801_v58, %v6217_v48  ;;  %v2269_v63 = vmul.f32 %v6212_v56, %v6219_v27 }
 0x2f4   : > { %6213 = vst [vmem:[#allocation34_spill] sm:$0xff] %v5305_v9  ;;  %v5315_v60 = vmul.f32 %v6215_v55, %v6211_v40  ;;  %v2266_v31 = vmul.f32 %v6215_v55, %v6218_v59  ;;  %v2270_v40 = vmul.f32 %v6215_v55, %v6219_v27  ;;  %v5335_v15 = vadd.f32 %v1987_v0, %v5040_v50  ;;  %v5342_v59 = vpop.permute.xlu1 %2148  ;;  %v6227_v27 = vld [vmem:[#allocation68_spill] sm:$0xff]  ;;  %v6228_v0 = vld [vmem:[#allocation45_spill] sm:$0xff] }
 0x2f5   : > { %v2056_v48 = vadd.f32 %v1992_v4, %v6222_v53  ;;  %6224 = vst [vmem:[#allocation65_spill] sm:$0xff] %v5342_v59  ;;  %6225 = vst [vmem:[#allocation35_spill] sm:$0xff] %v5344_v2  ;;  %v5347_v5 = vadd.f32 %v1988_v33, %v5043_v17  ;;  %v2059_v51 = vadd.f32 %v1995_v62, %v6227_v27  ;;  %v6229_v4 = vld [vmem:[#allocation40_spill] sm:$0xff]  ;;  %v6231_v62 = vld [vmem:[#allocation47_spill] sm:$0xff] }
 0x2f6   : > { %6216 = vst [vmem:[#allocation64_spill] sm:$0xff] %v5315_v60  ;;  %6221 = vst [vmem:[#allocation41_spill] sm:$0xff] %v5335_v15  ;;  %v1999_v60 = vmul.f32 %v4801_v58, %v6223_v26  ;;  %v2060_v50 = vadd.f32 %v1996_v7, %v4903_v18  ;;  %v2003_v53 = vmul.f32 %v4801_v58, %v6228_v0  ;;  %v6230_v15 = vld [vmem:[#allocation42_spill] sm:$0xff] }
 0x2f7   : > { %6226 = vst [vmem:[#allocation36_spill] sm:$0xff] %v5347_v5  ;;  %v2273_v37 = vmul.f32 %v6212_v56, %v6229_v4  ;;  %v2274_v26 = vmul.f32 %v6215_v55, %v6229_v4  ;;  %v2277_v59 = vmul.f32 %v6212_v56, %v6230_v15  ;;  %v2004_v17 = vmul.f32 %v4815_v45, %v6228_v0  ;;  %v6233_v5 = vld [vmem:[#allocation44_spill] sm:$0xff]  ;;  %v5375_v0 = vpop.permute.xlu0 %1407 }
 0x2f8   : > { %v2278_v33 = vmul.f32 %v6215_v55, %v6230_v15  ;;  %v2007_v18 = vmul.f32 %v4801_v58, %v6231_v62  ;;  %v2008_v7 = vmul.f32 %v4815_v45, %v6231_v62  ;;  %v5367_v27 = vadd.f32 %v2265_v13, %v2055_v41  ;;  %v5373_v16 = vpop.permute.xlu1 %2156 }
 0x2f9   : > { %v2063_v2 = vadd.f32 %v1999_v60, %v4905_v28  ;;  %v2064_v4 = vadd.f32 %v2000_v39, %v4907_v52  ;;  %v2281_v9 = vmul.f32 %v6212_v56, %v6233_v5  ;;  %v5377_v15 = vadd.f32 %v2266_v31, %v2056_v48  ;;  %v6237_v28 = vld [vmem:[#allocation46_spill] sm:$0xff] }
 0x2fa   : > { %6232 = vst [vmem:[#allocation38_spill] sm:$0xff] %v5367_v27  ;;  %v2282_v14 = vmul.f32 %v6215_v55, %v6233_v5  ;;  %v2067_v62 = vadd.f32 %v2003_v53, %v4909_v11  ;;  %v5382_v41 = vadd.f32 %v2269_v63, %v2059_v51  ;;  %v5384_v13 = vadd.f32 %v2270_v40, %v2060_v50  ;;  %v6238_v27 = vld [vmem:[#allocation49_spill] sm:$0xff]  ;;  %v6239_v63 = vld [vmem:[#allocation51_spill] sm:$0xff] }
 0x2fb   : > { %6234 = vst [vmem:[#allocation62_spill] sm:$0xff] %v5377_v15  ;;  %v2068_v52 = vadd.f32 %v2004_v17, %v4915_v29  ;;  %v2285_v39 = vmul.f32 %v6212_v56, %v6237_v28  ;;  %v2286_v60 = vmul.f32 %v6215_v55, %v6237_v28  ;;  %v2011_v31 = vmul.f32 %v4801_v58, %v6238_v27  ;;  %v6240_v29 = vld [vmem:[#allocation48_spill] sm:$0xff]  ;;  %v5405_v17 = vpop.permute.xlu0 %1417 }
 0x2fc   : > { %6235 = vst [vmem:[#allocation63_spill] sm:$0xff] %v5382_v41  ;;  %6236 = vst [vmem:[#allocation43_spill] sm:$0xff] %v5384_v13  ;;  %v2071_v48 = vadd.f32 %v2007_v18, %v4917_v57  ;;  %v2072_v5 = vadd.f32 %v2008_v7, %v4919_v1  ;;  %v2012_v11 = vmul.f32 %v4815_v45, %v6238_v27  ;;  %v5403_v53 = vpop.permute.xlu1 %2164  ;;  %v6242_v18 = vld [vmem:[#allocation53_spill] sm:$0xff]  ;;  %v6243_v41 = vld [vmem:[#allocation50_spill] sm:$0xff] }
 0x2fd   : > { %v2015_v40 = vmul.f32 %v4801_v58, %v6239_v63  ;;  %v2289_v51 = vmul.f32 %v6212_v56, %v6240_v29  ;;  %v2016_v50 = vmul.f32 %v4815_v45, %v6239_v63  ;;  %v5407_v28 = vadd.f32 %v2273_v37, %v2063_v2 }
 0x2fe   : > { %v5409_v57 = vadd.f32 %v2274_v26, %v2064_v4  ;;  %v2290_v1 = vmul.f32 %v6215_v55, %v6240_v29  ;;  %v2019_v7 = vmul.f32 %v4801_v58, %v6242_v18  ;;  %v2020_v27 = vmul.f32 %v4815_v45, %v6242_v18  ;;  %v6246_v18 = vld [vmem:[#allocation55_spill] sm:$0xff] }
 0x2ff   : > { %v5417_v13 = vadd.f32 %v2277_v59, %v2067_v62  ;;  %v2075_v63 = vadd.f32 %v2011_v31, %v4921_v54  ;;  %v2293_v15 = vmul.f32 %v6212_v56, %v6243_v41  ;;  %v2294_v2 = vmul.f32 %v6215_v55, %v6243_v41  ;;  %v6245_v62 = vld [vmem:[#allocation52_spill] sm:$0xff] }
 0x300   : > { %6241 = vst [vmem:[#allocation68_spill] sm:$0xff] %v5409_v57  ;;  %v5424_v37 = vadd.f32 %v2278_v33, %v2068_v52  ;;  %v2076_v26 = vadd.f32 %v2012_v11, %v4923_v43  ;;  %v2079_v4 = vadd.f32 %v2015_v40, %v4925_v23  ;;  %v5428_v29 = vadd.f32 %v2281_v9, %v2071_v48  ;;  %v5439_v41 = vpop.permute.xlu1 %2172  ;;  %v5441_v43 = vpop.permute.xlu0 %1427  ;;  %v6247_v52 = vld [vmem:[#allocation66_spill] sm:$0xff] }
 0x301   : > { %v5430_v57 = vadd.f32 %v2282_v14, %v2072_v5  ;;  %v2080_v59 = vadd.f32 %v2016_v50, %v4927_v61  ;;  %v2297_v54 = vmul.f32 %v6212_v56, %v6245_v62  ;;  %v2298_v31 = vmul.f32 %v6215_v55, %v6245_v62 }
 0x302   : > { %v2023_v33 = vmul.f32 %v4801_v58, %v6246_v18  ;;  %v2083_v23 = vadd.f32 %v2019_v7, %v4929_v38  ;;  %v2084_v14 = vadd.f32 %v2020_v27, %v4931_v10  ;;  %v2024_v61 = vmul.f32 %v4815_v45, %v6246_v18  ;;  %v6249_v38 = vld [vmem:[#allocation54_spill] sm:$0xff]  ;;  %v6252_v18 = vld [vmem:[#allocation56_spill] sm:$0xff] }
 0x303   : > { %6244 = vst [vmem:[#allocation45_spill] sm:$0xff] %v5430_v57  ;;  %v1501_v9 = vmul.f32 %v4777_v36, %v4957_v21  ;;  %v2027_v48 = vmul.f32 %v4801_v58, %v6247_v52  ;;  %v2028_v5 = vmul.f32 %v4815_v45, %v6247_v52  ;;  %v1502_v11 = vmul.f32 %v4781_v12, %v4957_v21 }
 0x304   : > { %v5455_v40 = vadd.f32 %v2285_v39, %v2075_v63  ;;  %v2301_v10 = vmul.f32 %v6212_v56, %v6249_v38  ;;  %v2302_v50 = vmul.f32 %v6215_v55, %v6249_v38  ;;  %v5461_v7 = vadd.f32 %v2286_v60, %v2076_v26  ;;  %v5474_v39 = vpop.permute.xlu1 %2180  ;;  %v5476_v63 = vpop.permute.xlu0 %1437 }
 0x305   : > { %v5463_v27 = vadd.f32 %v2289_v51, %v2079_v4  ;;  %v2087_v62 = vadd.f32 %v2023_v33, %v4937_v49  ;;  %v5468_v52 = vmul.f32 %v6212_v56, %v6252_v18  ;;  %v5472_v21 = vmul.f32 %v6215_v55, %v6252_v18  ;;  %v6256_v51 = vld [vmem:[#allocation58_spill] sm:$0xff]  ;;  %v6259_v18 = vld [vmem:[#allocation59_spill] sm:$0xff] }
 0x306   : > { %6248 = vst [vmem:[#allocation40_spill] sm:$0xff] %v5455_v40  ;;  %6250 = vst [vmem:[#allocation42_spill] sm:$0xff] %v5461_v7  ;;  %v5478_v40 = vadd.f32 %v2290_v1, %v2080_v59  ;;  %v2088_v60 = vadd.f32 %v2024_v61, %v4975_v30  ;;  %v1775_v26 = vadd.f32 %v6256_v51, %v1501_v9  ;;  %v6262_v30 = vld [vmem:[#allocation69_spill] sm:$0xff] }
 0x307   : > { %6251 = vst [vmem:[#allocation47_spill] sm:$0xff] %v5463_v27  ;;  %6253 = vst [vmem:[#allocation44_spill] sm:$0xff] %v5468_v52  ;;  %v5482_v4 = vadd.f32 %v2293_v15, %v2083_v23  ;;  %v5484_v49 = vadd.f32 %v2294_v2, %v2084_v14  ;;  %v2091_v33 = vadd.f32 %v2027_v48, %v4977_v47  ;;  %v6260_v27 = vld [vmem:[#allocation67_spill] sm:$0xff] }
 0x308   : > { %6254 = vst [vmem:[#allocation46_spill] sm:$0xff] %v5472_v21  ;;  %6255 = vst [vmem:[#allocation49_spill] sm:$0xff] %v5478_v40  ;;  %v2092_v38 = vadd.f32 %v2028_v5, %v4985_v8  ;;  %v1776_v21 = vadd.f32 %v6259_v18, %v1502_v11  ;;  %v1505_v52 = vmul.f32 %v4777_v36, %v4991_v20  ;;  %v5509_v14 = vpop.permute.xlu1 %2188  ;;  %v5511_v61 = vpop.permute.xlu0 %1447 }
 0x309   : > { %6257 = vst [vmem:[#allocation51_spill] sm:$0xff] %v5482_v4  ;;  %6258 = vst [vmem:[#allocation48_spill] sm:$0xff] %v5484_v49  ;;  %v5493_v1 = vmul.f32 %v6212_v56, %v6260_v27  ;;  %v2031_v59 = vmul.f32 %v4801_v58, %v6262_v30  ;;  %v2032_v15 = vmul.f32 %v4815_v45, %v6262_v30  ;;  %v6277_v30 = vld [vmem:[#allocation82_spill] sm:$0xff] }
 0x30a   : > { %v1506_v47 = vmul.f32 %v4781_v12, %v4991_v20  ;;  %v5503_v8 = vmul.f32 %v6215_v55, %v6260_v27  ;;  %v2035_v2 = vmul.f32 %v4801_v58, %v4911_v24  ;;  %v2036_v23 = vmul.f32 %v4815_v45, %v4911_v24  ;;  %v6299_v58 = vld [vmem:[#allocation37_spill] sm:$0xff]  ;;  %v6303_v49 = vld [vmem:[#allocation10_spill] sm:$0xff] }
 0x30b   : > { %6261 = vst [vmem:[#allocation53_spill] sm:$0xff] %v5493_v1  ;;  %v5513_v9 = vadd.f32 %v2297_v54, %v2087_v62  ;;  %v1509_v48 = vmul.f32 %v4777_v36, %v5037_v22  ;;  %v1510_v20 = vmul.f32 %v4781_v12, %v5037_v22  ;;  %v2049_v5 = vadd.f32 %v5319_v42, %v1775_v26  ;;  %v6275_v26 = vld [vmem:[#allocation87_spill] sm:$0xff]  ;;  %v6285_v1 = vld [vmem:[#allocation96_spill] sm:$0xff] }
 0x30c   : > { %6263 = vst [vmem:[#allocation50_spill] sm:$0xff] %v5503_v8  ;;  %v5520_v11 = vadd.f32 %v2298_v31, %v2088_v60  ;;  %v1779_v27 = vadd.f32 %v5051_v3, %v1505_v52  ;;  %v2050_v24 = vadd.f32 %v5323_v34, %v1776_v21  ;;  %v5524_v51 = vadd.f32 %v2301_v10, %v2091_v33  ;;  %v5547_v10 = vpop.permute.xlu1 %2196  ;;  %v6273_v52 = vld [vmem:[#allocation83_spill] sm:$0xff]  ;;  %v6274_v60 = vld [vmem:[#allocation34_spill] sm:$0xff]  ;;  %v6276_v33 = vld [vmem:[#allocation97_spill] sm:$0xff] }
 0x30d   : > { %6264 = vst [vmem:[#allocation52_spill] sm:$0xff] %v5513_v9  ;;  %v5526_v18 = vadd.f32 %v2302_v50, %v2092_v38  ;;  %v5529_v54 = vadd.f32 %v2031_v59, %v4987_v25  ;;  %v5532_v62 = vadd.f32 %v2032_v15, %v4993_v6  ;;  %v1780_v22 = vadd.f32 %v5055_v35, %v1506_v47  ;;  %v5549_v6 = vpop.permute.xlu0 %1457  ;;  %v6272_v35 = vld [vmem:[#allocation7_spill] sm:$0xff]  ;;  %v6278_v15 = vld [vmem:[#allocation64_spill] sm:$0xff] }
 0x30e   : > { %6265 = vst [vmem:[#allocation55_spill] sm:$0xff] %v5520_v11  ;;  %6266 = vst [vmem:[#allocation66_spill] sm:$0xff] %v5524_v51  ;;  %v2257_v42 = vmul.f32 %v6212_v56, %v5035_v19  ;;  %v5538_v31 = vadd.f32 %v2035_v2, %v4995_v32  ;;  %v5541_v3 = vadd.f32 %v2036_v23, %v5001_v44  ;;  %v6279_v23 = vld [vmem:[#allocation80_spill] sm:$0xff] }
 0x30f   : > { %6267 = vst [vmem:[#allocation54_spill] sm:$0xff] %v5526_v18  ;;  %6268 = vst [vmem:[#allocation56_spill] sm:$0xff] %v5529_v54  ;;  %v2258_v34 = vmul.f32 %v6215_v55, %v5035_v19  ;;  %v1513_v25 = vmul.f32 %v4777_v36, %v5103_v46  ;;  %v1783_v50 = vadd.f32 %v6272_v35, %v1509_v48  ;;  %v6281_v35 = vld [vmem:[#allocation9_spill] sm:$0xff] }
 0x310   : > { %6269 = vst [vmem:[#allocation58_spill] sm:$0xff] %v5532_v62  ;;  %6270 = vst [vmem:[#allocation59_spill] sm:$0xff] %v5538_v31  ;;  %v1784_v21 = vadd.f32 %v6273_v52, %v1510_v20  ;;  %v1514_v32 = vmul.f32 %v4781_v12, %v5103_v46  ;;  %v5556_v44 = vadd.f32 %v6274_v60, %v2049_v5  ;;  %v6280_v20 = vld [vmem:[#allocation61_spill] sm:$0xff]  ;;  %v6282_v60 = vld [vmem:[#allocation107_spill] sm:$0xff] }
 0x311   : > { %6271 = vst [vmem:[#allocation67_spill] sm:$0xff] %v5541_v3  ;;  %v2261_v19 = vmul.f32 %v6212_v56, %v6275_v26  ;;  %v1517_v38 = vmul.f32 %v4777_v36, %v6276_v33  ;;  %v2053_v59 = vadd.f32 %v6277_v30, %v1779_v27  ;;  %v5564_v47 = vadd.f32 %v6278_v15, %v2050_v24  ;;  %v5577_v24 = vpop.permute.xlu1 %2204  ;;  %v5579_v30 = vpop.permute.xlu0 %1467  ;;  %v6284_v3 = vld [vmem:[#allocation85_spill] sm:$0xff]  ;;  %v6288_v31 = vld [vmem:[#allocation11_spill] sm:$0xff]  ;;  %v6289_v62 = vld [vmem:[#allocation114_spill] sm:$0xff] }
 0x312   : > { %v2262_v2 = vmul.f32 %v6215_v55, %v6275_v26  ;;  %v1518_v46 = vmul.f32 %v4781_v12, %v6276_v33  ;;  %v2321_v48 = vadd.f32 %v2257_v42, %v6279_v23  ;;  %v2054_v5 = vadd.f32 %v6280_v20, %v1780_v22  ;;  %v6283_v26 = vld [vmem:[#allocation81_spill] sm:$0xff] }
 0x313   : > { %v1787_v52 = vadd.f32 %v6281_v35, %v1513_v25  ;;  %v1521_v8 = vmul.f32 %v4777_v36, %v6282_v60  ;;  %v1522_v27 = vmul.f32 %v4781_v12, %v6282_v60  ;;  %v2322_v15 = vadd.f32 %v2258_v34, %v6283_v26  ;;  %v6286_v22 = vld [vmem:[#allocation5_spill] sm:$0xff]  ;;  %v6287_v25 = vld [vmem:[#allocation6_spill] sm:$0xff]  ;;  %v6291_v34 = vld [vmem:[#allocation88_spill] sm:$0xff] }
 0x314   : > { %v1788_v33 = vadd.f32 %v6284_v3, %v1514_v32  ;;  %v2263_v42 = vmul.f32 %v6212_v56, %v6285_v1  ;;  %v2057_v23 = vadd.f32 %v6286_v22, %v1783_v50  ;;  %v2058_v20 = vadd.f32 %v6287_v25, %v1784_v21  ;;  %v6290_v18 = vld [vmem:[#allocation41_spill] sm:$0xff]  ;;  %v6292_v32 = vld [vmem:[#allocation106_spill] sm:$0xff]  ;;  %v6293_v21 = vld [vmem:[#allocation36_spill] sm:$0xff] }
 0x315   : > { %v2264_v35 = vmul.f32 %v6215_v55, %v6285_v1  ;;  %v1791_v60 = vadd.f32 %v6288_v31, %v1517_v38  ;;  %v1525_v54 = vmul.f32 %v4777_v36, %v6289_v62  ;;  %v5593_v51 = vadd.f32 %v2261_v19, %v6290_v18  ;;  %v6294_v1 = vld [vmem:[#allocation13_spill] sm:$0xff]  ;;  %v6295_v31 = vld [vmem:[#allocation90_spill] sm:$0xff]  ;;  %v5607_v18 = vpop.permute.xlu1 %2212  ;;  %v5609_v19 = vpop.permute.xlu0 %1477 }
 0x316   : > { %v1792_v3 = vadd.f32 %v6291_v34, %v1518_v46  ;;  %v2267_v26 = vmul.f32 %v6212_v56, %v6292_v32  ;;  %v2268_v50 = vmul.f32 %v6215_v55, %v6292_v32  ;;  %v5601_v22 = vadd.f32 %v2262_v2, %v6293_v21  ;;  %6296 = vst [vmem:[#allocation69_spill] sm:$0xff] %v5607_v18  ;;  %v6298_v46 = vld [vmem:[#allocation8_spill] sm:$0xff] }
 0x317   : > { %v1795_v25 = vadd.f32 %v6294_v1, %v1521_v8  ;;  %v1796_v38 = vadd.f32 %v6295_v31, %v1522_v27  ;;  %v1526_v45 = vmul.f32 %v4781_v12, %v6289_v62  ;;  %6297 = vst [vmem:[#allocation7_spill] sm:$0xff] %v5609_v19  ;;  %v2061_v34 = vadd.f32 %v6298_v46, %v1787_v52  ;;  %v6300_v21 = vld [vmem:[#allocation84_spill] sm:$0xff]  ;;  %v6301_v1 = vld [vmem:[#allocation15_spill] sm:$0xff]  ;;  %v6304_v19 = vld [vmem:[#allocation86_spill] sm:$0xff] }
 0x318   : > { %v2271_v11 = vmul.f32 %v6212_v56, %v6299_v58  ;;  %v2272_v2 = vmul.f32 %v6215_v55, %v6299_v58  ;;  %v2327_v32 = vadd.f32 %v2263_v42, %v2053_v59  ;;  %v2062_v8 = vadd.f32 %v6300_v21, %v1788_v33  ;;  %v6302_v31 = vld [vmem:[#allocation35_spill] sm:$0xff]  ;;  %v6305_v18 = vld [vmem:[#allocation92_spill] sm:$0xff]  ;;  %v6306_v59 = vld [vmem:[#allocation65_spill] sm:$0xff] }
 0x319   : > { %v1799_v27 = vadd.f32 %v6301_v1, %v1525_v54  ;;  %v1529_v62 = vmul.f32 %v4777_v36, %v6302_v31  ;;  %v2328_v9 = vadd.f32 %v2264_v35, %v2054_v5  ;;  %v2065_v4 = vadd.f32 %v6303_v49, %v1791_v60  ;;  %v5627_v42 = vpop.permute.xlu1 %2220  ;;  %v2420_v54 = vpop.permute.xlu0 %2419  ;;  %v6308_v21 = vld [vmem:[#allocation12_spill] sm:$0xff]  ;;  %v6309_v5 = vld [vmem:[#allocation89_spill] sm:$0xff] }
 0x31a   : > { %v1530_v52 = vmul.f32 %v4781_v12, %v6302_v31  ;;  %v2331_v46 = vadd.f32 %v2267_v26, %v2057_v23  ;;  %v2332_v40 = vadd.f32 %v2268_v50, %v2058_v20  ;;  %v2066_v7 = vadd.f32 %v6304_v19, %v1792_v3  ;;  %6307 = vst [vmem:[#allocation83_spill] sm:$0xff] %v5627_v42  ;;  %v6310_v20 = vld [vmem:[#allocation17_spill] sm:$0xff]  ;;  %v6311_v26 = vld [vmem:[#allocation14_spill] sm:$0xff] }
 0x31b   : > { %v1800_v58 = vadd.f32 %v6305_v18, %v1526_v45  ;;  %v2275_v33 = vmul.f32 %v6212_v56, %v6306_v59  ;;  %v2069_v1 = vadd.f32 %v6308_v21, %v1795_v25  ;;  %v2070_v35 = vadd.f32 %v6309_v5, %v1796_v38  ;;  %v6312_v18 = vld [vmem:[#allocation94_spill] sm:$0xff]  ;;  %v6315_v21 = vld [vmem:[#allocation19_spill] sm:$0xff] }
 0x31c   : > { %v2577_v49 = vadd.f32 %v2420_v54, %v2321_v48  ;;  %v2578_v60 = vadd.f32 %v2420_v54, %v2322_v15  ;;  %v2335_v57 = vadd.f32 %v2271_v11, %v2061_v34  ;;  %v2336_v31 = vadd.f32 %v2272_v2, %v2062_v8 }
 0x31d   : > { %v2276_v23 = vmul.f32 %v6215_v55, %v6306_v59  ;;  %v1803_v3 = vadd.f32 %v6310_v20, %v1529_v62  ;;  %v1533_v45 = vmul.f32 %v4777_v36, %v5375_v0  ;;  %v2073_v50 = vadd.f32 %v6311_v26, %v1799_v27  ;;  %v5644_v34 = vpop.permute.xlu1 %2228  ;;  %v2435_v2 = vpop.permute.xlu0 %2434  ;;  %v6314_v62 = vld [vmem:[#allocation91_spill] sm:$0xff]  ;;  %v6316_v20 = vld [vmem:[#allocation16_spill] sm:$0xff] }
 0x31e   : > { %v1804_v19 = vadd.f32 %v6312_v18, %v1530_v52  ;;  %v1534_v25 = vmul.f32 %v4781_v12, %v5375_v0  ;;  %v2641_v38 = vmax.f32 %v2577_v49, 0.0  ;;  %v2642_v48 = vmax.f32 %v2578_v60, 0.0  ;;  %6313 = vst [vmem:[#allocation34_spill] sm:$0xff] %v5644_v34  ;;  %v6317_v18 = vld [vmem:[#allocation98_spill] sm:$0xff] }
 0x31f   : > { %v2279_v11 = vmul.f32 %v6212_v56, %v5373_v16  ;;  %v1537_v15 = vmul.f32 %v4777_v36, %v5405_v17  ;;  %v2339_v8 = vadd.f32 %v2275_v33, %v2065_v4  ;;  %v2074_v59 = vadd.f32 %v6314_v62, %v1800_v58  ;;  %v6318_v33 = vld [vmem:[#allocation93_spill] sm:$0xff] }
 0x320   : > { %v2280_v27 = vmul.f32 %v6215_v55, %v5373_v16  ;;  %v1538_v0 = vmul.f32 %v4781_v12, %v5405_v17  ;;  %v2583_v52 = vadd.f32 %v2435_v2, %v2327_v32  ;;  %v2584_v54 = vadd.f32 %v2435_v2, %v2328_v9  ;;  %v6319_v32 = vld [vmem:[#allocation21_spill] sm:$0xff] }
 0x321   : > { %v1807_v5 = vadd.f32 %v6315_v21, %v1533_v45  ;;  %v2737_v49 = vadd.f32 %v2642_v48, %v2641_v38  ;;  %v2340_v60 = vadd.f32 %v2276_v23, %v2066_v7  ;;  %v2077_v26 = vadd.f32 %v6316_v20, %v1803_v3  ;;  %v5660_v45 = vpop.permute.xlu1 %2236  ;;  %v2445_v7 = vpop.permute.xlu0 %2444  ;;  %v6320_v3 = vld [vmem:[#allocation100_spill] sm:$0xff] }
 0x322   : > { %v1808_v34 = vadd.f32 %v6317_v18, %v1534_v25  ;;  %v2647_v42 = vmax.f32 %v2583_v52, 0.0  ;;  %v2648_v4 = vmax.f32 %v2584_v54, 0.0  ;;  %v2078_v58 = vadd.f32 %v6318_v33, %v1804_v19 }
 0x323   : > { %v2283_v16 = vmul.f32 %v6212_v56, %v5403_v53  ;;  %v2284_v17 = vmul.f32 %v6215_v55, %v5403_v53  ;;  %v1811_v9 = vadd.f32 %v6319_v32, %v1537_v15  ;;  %2868 = vadd.xlane.f32.xlu1 %v2737_v49  ;;  %v2343_v23 = vadd.f32 %v2279_v11, %v2069_v1  ;;  %v6321_v53 = vld [vmem:[#allocation18_spill] sm:$0xff] }
 0x324   : > { %v1812_v38 = vadd.f32 %v6320_v3, %v1538_v0  ;;  %v2587_v25 = vadd.f32 %v2445_v7, %v2331_v46  ;;  %v2588_v48 = vadd.f32 %v2445_v7, %v2332_v40  ;;  %v2344_v2 = vadd.f32 %v2280_v27, %v2070_v35  ;;  %v6322_v27 = vld [vmem:[#allocation95_spill] sm:$0xff]  ;;  %v6326_v7 = vld [vmem:[#allocation102_spill] sm:$0xff] }
 0x325   : > { %v1541_v19 = vmul.f32 %v4777_v36, %v5441_v43  ;;  %v1542_v62 = vmul.f32 %v4781_v12, %v5441_v43  ;;  %v2740_v52 = vadd.f32 %v2648_v4, %v2647_v42  ;;  %v2081_v54 = vadd.f32 %v6321_v53, %v1807_v5  ;;  %v2455_v40 = vpop.permute.xlu0 %2454  ;;  %v6323_v43 = vld [vmem:[#allocation20_spill] sm:$0xff]  ;;  %v2425_v20 = vpop.permute.xlu1 %2424  ;;  %v6324_v4 = vld [vmem:[#allocation99_spill] sm:$0xff] }
 0x326   : > { %v2287_v15 = vmul.f32 %v6212_v56, %v5439_v41  ;;  %v2288_v1 = vmul.f32 %v6215_v55, %v5439_v41  ;;  %v2651_v11 = vmax.f32 %v2587_v25, 0.0  ;;  %v2652_v0 = vmax.f32 %v2588_v48, 0.0  ;;  %v6325_v41 = vld [vmem:[#allocation23_spill] sm:$0xff] }
 0x327   : > { %2874 = vadd.xlane.f32.xlu1 %v2740_v52  ;;  %v5672_v46 = vadd.f32 %v2283_v16, %v2073_v50  ;;  %v5674_v35 = vadd.f32 %v2284_v17, %v2074_v59  ;;  %v2082_v21 = vadd.f32 %v6322_v27, %v1808_v34  ;;  %v5678_v42 = vadd.f32 %v6323_v43, %v1811_v9  ;;  %v6330_v43 = vld [vmem:[#allocation104_spill] sm:$0xff] }
 0x328   : > { %v2591_v5 = vadd.f32 %v2455_v40, %v2335_v57  ;;  %v2592_v49 = vadd.f32 %v2455_v40, %v2336_v31  ;;  %v2742_v18 = vadd.f32 %v2652_v0, %v2651_v11  ;;  %v5681_v33 = vadd.f32 %v6324_v4, %v1812_v38  ;;  %v6327_v11 = vld [vmem:[#allocation22_spill] sm:$0xff]  ;;  %v6328_v40 = vld [vmem:[#allocation101_spill] sm:$0xff] }
 0x329   : > { %v1815_v32 = vadd.f32 %v6325_v41, %v1541_v19  ;;  %v1816_v3 = vadd.f32 %v6326_v7, %v1542_v62  ;;  %v2579_v50 = vadd.f32 %v2425_v20, %v5556_v44  ;;  %v2580_v59 = vadd.f32 %v2425_v20, %v5564_v47  ;;  %v2465_v48 = vpop.permute.xlu0 %2464  ;;  %v2430_v62 = vpop.permute.xlu1 %2429  ;;  %v6331_v7 = vld [vmem:[#allocation38_spill] sm:$0xff] }
 0x32a   : > { %v2655_v16 = vmax.f32 %v2591_v5, 0.0  ;;  %v2656_v34 = vmax.f32 %v2592_v49, 0.0  ;;  %v5687_v17 = vadd.f32 %v2287_v15, %v2077_v26  ;;  %v5689_v9 = vadd.f32 %v2288_v1, %v2078_v58 }
 0x32b   : > { %v1545_v57 = vmul.f32 %v4777_v36, %v5476_v63  ;;  %v1546_v31 = vmul.f32 %v4781_v12, %v5476_v63  ;;  %v2643_v38 = vmax.f32 %v2579_v50, 0.0  ;;  %v2644_v25 = vmax.f32 %v2580_v59, 0.0  ;;  %2878 = vadd.xlane.f32.xlu1 %v2742_v18  ;;  %v6332_v50 = vld [vmem:[#allocation62_spill] sm:$0xff] }
 0x32c   : > { %v2291_v44 = vmul.f32 %v6212_v56, %v5474_v39  ;;  %v2595_v47 = vadd.f32 %v2465_v48, %v2339_v8  ;;  %v2596_v19 = vadd.f32 %v2465_v48, %v2340_v60  ;;  %v2744_v26 = vadd.f32 %v2656_v34, %v2655_v16  ;;  %v6329_v8 = vld [vmem:[#allocation25_spill] sm:$0xff] }
 0x32d   : > { %v2292_v58 = vmul.f32 %v6215_v55, %v5474_v39  ;;  %v2581_v52 = vadd.f32 %v2430_v62, %v5593_v51  ;;  %v2582_v53 = vadd.f32 %v2430_v62, %v5601_v22  ;;  %v2738_v15 = vadd.f32 %v2644_v25, %v2643_v38  ;;  %v2475_v39 = vpop.permute.xlu0 %2474  ;;  %v2440_v18 = vpop.permute.xlu1 %2439 }
 0x32e   : > { %v2659_v63 = vmax.f32 %v2595_v47, 0.0  ;;  %v2660_v1 = vmax.f32 %v2596_v19, 0.0  ;;  %v5702_v0 = vadd.f32 %v6327_v11, %v1815_v32  ;;  %v5705_v27 = vadd.f32 %v6328_v40, %v1816_v3  ;;  %v6338_v40 = vld [vmem:[#allocation108_spill] sm:$0xff] }
 0x32f   : > { %v1819_v60 = vadd.f32 %v6329_v8, %v1545_v57  ;;  %v1820_v5 = vadd.f32 %v6330_v43, %v1546_v31  ;;  %v2645_v49 = vmax.f32 %v2581_v52, 0.0  ;;  %v2646_v20 = vmax.f32 %v2582_v53, 0.0  ;;  %2882 = vadd.xlane.f32.xlu1 %v2744_v26  ;;  %2870 = vadd.xlane.f32.xlu0 %v2738_v15  ;;  %v6334_v26 = vld [vmem:[#allocation63_spill] sm:$0xff] }
 0x330   : > { %v2599_v51 = vadd.f32 %v2475_v39, %v2343_v23  ;;  %v2600_v22 = vadd.f32 %v2475_v39, %v2344_v2  ;;  %v2746_v4 = vadd.f32 %v2660_v1, %v2659_v63  ;;  %v2355_v41 = vadd.f32 %v2291_v44, %v2081_v54  ;;  %v6335_v52 = vld [vmem:[#allocation43_spill] sm:$0xff] }
 0x331   : > { %v2585_v32 = vadd.f32 %v2440_v18, %v6331_v7  ;;  %v2586_v59 = vadd.f32 %v2440_v18, %v6332_v50  ;;  %v2739_v3 = vadd.f32 %v2646_v20, %v2645_v49  ;;  %v2356_v16 = vadd.f32 %v2292_v58, %v2082_v21  ;;  %v2485_v48 = vpop.permute.xlu0 %2484  ;;  %v2450_v47 = vpop.permute.xlu1 %2449  ;;  %v6337_v1 = vld [vmem:[#allocation27_spill] sm:$0xff]  ;;  %v6339_v50 = vld [vmem:[#allocation68_spill] sm:$0xff] }
 0x332   : > { %v1549_v34 = vmul.f32 %v4777_v36, %v5511_v61  ;;  %v1550_v57 = vmul.f32 %v4781_v12, %v5511_v61  ;;  %v2663_v31 = vmax.f32 %v2599_v51, 0.0  ;;  %v2664_v38 = vmax.f32 %v2600_v22, 0.0  ;;  %v6333_v61 = vld [vmem:[#allocation24_spill] sm:$0xff] }
 0x333   : > { %v2295_v23 = vmul.f32 %v6212_v56, %v5509_v14  ;;  %v2296_v2 = vmul.f32 %v6215_v55, %v5509_v14  ;;  %v2649_v54 = vmax.f32 %v2585_v32, 0.0  ;;  %v2650_v25 = vmax.f32 %v2586_v59, 0.0  ;;  %2886 = vadd.xlane.f32.xlu1 %v2746_v4  ;;  %2872 = vadd.xlane.f32.xlu0 %v2739_v3  ;;  %v6336_v14 = vld [vmem:[#allocation103_spill] sm:$0xff] }
 0x334   : > { %v2603_v21 = vadd.f32 %v2485_v48, %v5672_v46  ;;  %v2604_v44 = vadd.f32 %v2485_v48, %v5674_v35  ;;  %v2748_v19 = vadd.f32 %v2664_v38, %v2663_v31  ;;  %v5722_v62 = vadd.f32 %v6333_v61, %v1819_v60  ;;  %v6340_v38 = vld [vmem:[#allocation26_spill] sm:$0xff] }
 0x335   : > { %v2589_v58 = vadd.f32 %v2450_v47, %v6334_v26  ;;  %v2590_v53 = vadd.f32 %v2450_v47, %v6335_v52  ;;  %v2741_v15 = vadd.f32 %v2650_v25, %v2649_v54  ;;  %v5727_v63 = vadd.f32 %v6336_v14, %v1820_v5  ;;  %v2495_v20 = vpop.permute.xlu0 %2494  ;;  %v2460_v18 = vpop.permute.xlu1 %2459 }
 0x336   : > { %v1823_v11 = vadd.f32 %v6337_v1, %v1549_v34  ;;  %v1824_v8 = vadd.f32 %v6338_v40, %v1550_v57  ;;  %v2667_v46 = vmax.f32 %v2603_v21, 0.0  ;;  %v2668_v43 = vmax.f32 %v2604_v44, 0.0 }
 0x337   : > { %v2653_v35 = vmax.f32 %v2589_v58, 0.0  ;;  %v2654_v49 = vmax.f32 %v2590_v53, 0.0  ;;  %2890 = vadd.xlane.f32.xlu1 %v2748_v19  ;;  %2876 = vadd.xlane.f32.xlu0 %v2741_v15  ;;  %v2359_v60 = vadd.f32 %v2295_v23, %v5678_v42  ;;  %v2360_v39 = vadd.f32 %v2296_v2, %v5681_v33  ;;  %v6342_v2 = vld [vmem:[#allocation29_spill] sm:$0xff] }
 0x338   : > { %v1553_v51 = vmul.f32 %v4777_v36, %v5549_v6  ;;  %v2607_v5 = vadd.f32 %v2495_v20, %v5687_v17  ;;  %v2608_v22 = vadd.f32 %v2495_v20, %v5689_v9  ;;  %v2750_v4 = vadd.f32 %v2668_v43, %v2667_v46  ;;  %v6344_v43 = vld [vmem:[#allocation45_spill] sm:$0xff] }
 0x339   : > { %v1554_v7 = vmul.f32 %v4781_v12, %v5549_v6  ;;  %v2593_v32 = vadd.f32 %v2460_v18, %v5407_v28  ;;  %v2594_v59 = vadd.f32 %v2460_v18, %v6339_v50  ;;  %v2743_v3 = vadd.f32 %v2654_v49, %v2653_v35  ;;  %v2505_v31 = vpop.permute.xlu0 %2504  ;;  %v6341_v28 = vld [vmem:[#allocation105_spill] sm:$0xff]  ;;  %v2470_v21 = vpop.permute.xlu1 %2469 }
 0x33a   : > { %v2299_v42 = vmul.f32 %v6212_v56, %v5547_v10  ;;  %v2300_v33 = vmul.f32 %v6215_v55, %v5547_v10  ;;  %v2671_v34 = vmax.f32 %v2607_v5, 0.0  ;;  %v2672_v17 = vmax.f32 %v2608_v22, 0.0  ;;  %v6343_v10 = vld [vmem:[#allocation110_spill] sm:$0xff]  ;;  %v6346_v22 = vld [vmem:[#allocation109_spill] sm:$0xff] }
 0x33b   : > { %v2657_v57 = vmax.f32 %v2593_v32, 0.0  ;;  %v2658_v9 = vmax.f32 %v2594_v59, 0.0  ;;  %2894 = vadd.xlane.f32.xlu1 %v2750_v4  ;;  %2880 = vadd.xlane.f32.xlu0 %v2743_v3  ;;  %v5746_v6 = vadd.f32 %v6340_v38, %v1823_v11  ;;  %v5749_v23 = vadd.f32 %v6341_v28, %v1824_v8  ;;  %v6347_v4 = vld [vmem:[#allocation31_spill] sm:$0xff] }
 0x33c   : > { %v1827_v54 = vadd.f32 %v6342_v2, %v1553_v51  ;;  %v2611_v25 = vadd.f32 %v2505_v31, %v2355_v41  ;;  %v2612_v48 = vadd.f32 %v2505_v31, %v2356_v16  ;;  %v2752_v44 = vadd.f32 %v2672_v17, %v2671_v34  ;;  %v6345_v51 = vld [vmem:[#allocation28_spill] sm:$0xff]  ;;  %v6351_v31 = vld [vmem:[#allocation42_spill] sm:$0xff] }
 0x33d   : > { %v1828_v47 = vadd.f32 %v6343_v10, %v1554_v7  ;;  %v2597_v19 = vadd.f32 %v2470_v21, %v5417_v13  ;;  %v2598_v61 = vadd.f32 %v2470_v21, %v5424_v37  ;;  %v2745_v26 = vadd.f32 %v2658_v9, %v2657_v57  ;;  %v2515_v11 = vpop.permute.xlu0 %2514  ;;  %v2480_v8 = vpop.permute.xlu1 %2479  ;;  %v6350_v57 = vld [vmem:[#allocation40_spill] sm:$0xff]  ;;  %v6352_v21 = vld [vmem:[#allocation7_spill] sm:$0xff] }
 0x33e   : > { %v2675_v58 = vmax.f32 %v2611_v25, 0.0  ;;  %v2676_v52 = vmax.f32 %v2612_v48, 0.0  ;;  %v2363_v53 = vadd.f32 %v2299_v42, %v5702_v0  ;;  %v2364_v15 = vadd.f32 %v2300_v33, %v5705_v27 }
 0x33f   : > { %v1557_v14 = vmul.f32 %v4777_v36, %v5579_v30  ;;  %v1558_v41 = vmul.f32 %v4781_v12, %v5579_v30  ;;  %v2661_v16 = vmax.f32 %v2597_v19, 0.0  ;;  %v2662_v1 = vmax.f32 %v2598_v61, 0.0  ;;  %2898 = vadd.xlane.f32.xlu1 %v2752_v44  ;;  %2884 = vadd.xlane.f32.xlu0 %v2745_v26 }
 0x340   : > { %v2303_v13 = vmul.f32 %v6212_v56, %v5577_v24  ;;  %v2615_v37 = vadd.f32 %v2515_v11, %v2359_v60  ;;  %v2616_v40 = vadd.f32 %v2515_v11, %v2360_v39  ;;  %v2754_v0 = vadd.f32 %v2676_v52, %v2675_v58  ;;  %v6348_v60 = vld [vmem:[#allocation112_spill] sm:$0xff] }
 0x341   : > { %v2304_v27 = vmul.f32 %v6215_v55, %v5577_v24  ;;  %v2601_v46 = vadd.f32 %v2480_v8, %v5428_v29  ;;  %v2602_v35 = vadd.f32 %v2480_v8, %v6344_v43  ;;  %v2747_v30 = vadd.f32 %v2662_v1, %v2661_v16  ;;  %v2525_v59 = vpop.permute.xlu0 %2524  ;;  %v6349_v24 = vld [vmem:[#allocation69_spill] sm:$0xff]  ;;  %v2490_v33 = vpop.permute.xlu1 %2489  ;;  %v6355_v1 = vld [vmem:[#allocation83_spill] sm:$0xff] }
 0x342   : > { %v2679_v49 = vmax.f32 %v2615_v37, 0.0  ;;  %v2680_v20 = vmax.f32 %v2616_v40, 0.0  ;;  %v2101_v5 = vadd.f32 %v6345_v51, %v1827_v54  ;;  %v2102_v18 = vadd.f32 %v6346_v22, %v1828_v47 }
 0x343   : > { %v1831_v7 = vadd.f32 %v6347_v4, %v1557_v14  ;;  %v1832_v39 = vadd.f32 %v6348_v60, %v1558_v41  ;;  %v2665_v32 = vmax.f32 %v2601_v46, 0.0  ;;  %v2666_v50 = vmax.f32 %v2602_v35, 0.0  ;;  %2902 = vadd.xlane.f32.xlu1 %v2754_v0  ;;  %2888 = vadd.xlane.f32.xlu0 %v2747_v30  ;;  %v6357_v46 = vld [vmem:[#allocation111_spill] sm:$0xff]  ;;  %v6358_v35 = vld [vmem:[#allocation34_spill] sm:$0xff] }
 0x344   : > { %v2307_v29 = vmul.f32 %v6212_v56, %v6349_v24  ;;  %v2619_v3 = vadd.f32 %v2525_v59, %v2363_v53  ;;  %v2620_v42 = vadd.f32 %v2525_v59, %v2364_v15  ;;  %v2756_v34 = vadd.f32 %v2680_v20, %v2679_v49  ;;  %v6359_v4 = vld [vmem:[#allocation51_spill] sm:$0xff] }
 0x345   : > { %v2308_v17 = vmul.f32 %v6215_v55, %v6349_v24  ;;  %v2605_v9 = vadd.f32 %v2490_v33, %v6350_v57  ;;  %v2606_v38 = vadd.f32 %v2490_v33, %v6351_v31  ;;  %v2749_v28 = vadd.f32 %v2666_v50, %v2665_v32  ;;  %v2535_v61 = vpop.permute.xlu0 %2534  ;;  %v2500_v52 = vpop.permute.xlu1 %2499  ;;  %v6360_v32 = vld [vmem:[#allocation48_spill] sm:$0xff]  ;;  %v6362_v33 = vld [vmem:[#allocation33_spill] sm:$0xff] }
 0x346   : > { %v2683_v2 = vmax.f32 %v2619_v3, 0.0  ;;  %v2684_v54 = vmax.f32 %v2620_v42, 0.0  ;;  %v2367_v25 = vadd.f32 %v2303_v13, %v5722_v62  ;;  %v2368_v48 = vadd.f32 %v2304_v27, %v5727_v63  ;;  %v6353_v62 = vld [vmem:[#allocation47_spill] sm:$0xff]  ;;  %v6354_v63 = vld [vmem:[#allocation49_spill] sm:$0xff] }
 0x347   : > { %v1561_v44 = vmul.f32 %v4777_v36, %v6352_v21  ;;  %v1562_v10 = vmul.f32 %v4781_v12, %v6352_v21  ;;  %v2669_v47 = vmax.f32 %v2605_v9, 0.0  ;;  %v2670_v19 = vmax.f32 %v2606_v38, 0.0  ;;  %2906 = vadd.xlane.f32.xlu1 %v2756_v34  ;;  %2892 = vadd.xlane.f32.xlu0 %v2749_v28  ;;  %v6364_v21 = vld [vmem:[#allocation55_spill] sm:$0xff] }
 0x348   : > { %v2623_v26 = vadd.f32 %v2535_v61, %v2367_v25  ;;  %v2624_v58 = vadd.f32 %v2535_v61, %v2368_v48  ;;  %v2758_v53 = vadd.f32 %v2684_v54, %v2683_v2  ;;  %v2371_v15 = vadd.f32 %v2307_v29, %v5746_v6  ;;  %v6356_v6 = vld [vmem:[#allocation30_spill] sm:$0xff]  ;;  %v6363_v25 = vld [vmem:[#allocation52_spill] sm:$0xff] }
 0x349   : > { %v2609_v14 = vadd.f32 %v2500_v52, %v6353_v62  ;;  %v2610_v41 = vadd.f32 %v2500_v52, %v6354_v63  ;;  %v2372_v36 = vadd.f32 %v2308_v17, %v5749_v23  ;;  %v2751_v16 = vadd.f32 %v2670_v19, %v2669_v47  ;;  %v2545_v0 = vpop.permute.xlu0 %2544  ;;  %v2510_v20 = vpop.permute.xlu1 %2509 }
 0x34a   : > { %v2311_v12 = vmul.f32 %v6212_v56, %v6355_v1  ;;  %v2312_v11 = vmul.f32 %v6215_v55, %v6355_v1  ;;  %v2687_v13 = vmax.f32 %v2623_v26, 0.0  ;;  %v2688_v37 = vmax.f32 %v2624_v58, 0.0  ;;  %v6365_v26 = vld [vmem:[#allocation72_spill] sm:$0xff]  ;;  %v6366_v58 = vld [vmem:[#allocation57_spill] sm:$0xff] }
 0x34b   : > { %v2673_v40 = vmax.f32 %v2609_v14, 0.0  ;;  %v2674_v8 = vmax.f32 %v2610_v41, 0.0  ;;  %2910 = vadd.xlane.f32.xlu1 %v2758_v53  ;;  %2896 = vadd.xlane.f32.xlu0 %v2751_v16  ;;  %v2105_v27 = vadd.f32 %v6356_v6, %v1831_v7  ;;  %v2106_v43 = vadd.f32 %v6357_v46, %v1832_v39  ;;  %v6361_v39 = vld [vmem:[#allocation39_spill] sm:$0xff]  ;;  %v6367_v14 = vld [vmem:[#allocation32_spill] sm:$0xff] }
 0x34c   : > { %v2315_v23 = vmul.f32 %v6212_v56, %v6358_v35  ;;  %v2627_v30 = vadd.f32 %v2545_v0, %v2371_v15  ;;  %v2628_v49 = vadd.f32 %v2545_v0, %v2372_v36  ;;  %v2760_v51 = vadd.f32 %v2688_v37, %v2687_v13  ;;  %v6370_v37 = vld [vmem:[#allocation66_spill] sm:$0xff] }
 0x34d   : > { %v2316_v22 = vmul.f32 %v6215_v55, %v6358_v35  ;;  %v2613_v60 = vadd.f32 %v2510_v20, %v6359_v4  ;;  %v2614_v50 = vadd.f32 %v2510_v20, %v6360_v32  ;;  %v2753_v59 = vadd.f32 %v2674_v8, %v2673_v40  ;;  %v2555_v9 = vpop.permute.xlu0 %2554  ;;  %v2520_v28 = vpop.permute.xlu1 %2519  ;;  %v6371_v8 = vld [vmem:[#allocation54_spill] sm:$0xff]  ;;  %v6372_v20 = vld [vmem:[#allocation56_spill] sm:$0xff] }
 0x34e   : > { %v2691_v24 = vmax.f32 %v2627_v30, 0.0  ;;  %v2692_v29 = vmax.f32 %v2628_v49, 0.0  ;;  %v2375_v7 = vadd.f32 %v2311_v12, %v2101_v5  ;;  %v2376_v3 = vadd.f32 %v2312_v11, %v2102_v18  ;;  %v6368_v12 = vld [vmem:[#allocation113_spill] sm:$0xff]  ;;  %v6374_v4 = vld [vmem:[#allocation58_spill] sm:$0xff] }
 0x34f   : > { %v1835_v42 = vadd.f32 %v6361_v39, %v1561_v44  ;;  %v1836_v34 = vadd.f32 %v6362_v33, %v1562_v10  ;;  %v2677_v17 = vmax.f32 %v2613_v60, 0.0  ;;  %v2678_v57 = vmax.f32 %v2614_v50, 0.0  ;;  %2914 = vadd.xlane.f32.xlu1 %v2760_v51  ;;  %2900 = vadd.xlane.f32.xlu0 %v2753_v59  ;;  %v6373_v51 = vld [vmem:[#allocation44_spill] sm:$0xff]  ;;  %v6375_v60 = vld [vmem:[#allocation46_spill] sm:$0xff] }
 0x350   : > { %v2631_v31 = vadd.f32 %v2555_v9, %v2375_v7  ;;  %v2632_v38 = vadd.f32 %v2555_v9, %v2376_v3  ;;  %v2762_v2 = vadd.f32 %v2692_v29, %v2691_v24  ;;  %v2379_v54 = vadd.f32 %v2315_v23, %v2105_v27  ;;  %v6376_v7 = vld [vmem:[#allocation59_spill] sm:$0xff]  ;;  %v6377_v3 = vld [vmem:[#allocation53_spill] sm:$0xff] }
 0x351   : > { %v2617_v48 = vadd.f32 %v2520_v28, %v6363_v25  ;;  %v2618_v47 = vadd.f32 %v2520_v28, %v6364_v21  ;;  %v2380_v5 = vadd.f32 %v2316_v22, %v2106_v43  ;;  %v2755_v18 = vadd.f32 %v2678_v57, %v2677_v17  ;;  %v2565_v62 = vpop.permute.xlu0 %2564  ;;  %v2530_v16 = vpop.permute.xlu1 %2529  ;;  %v6378_v17 = vld [vmem:[#allocation67_spill] sm:$0xff]  ;;  %v6379_v57 = vld [vmem:[#allocation50_spill] sm:$0xff] }
 0x352   : > { %v2319_v44 = vmul.f32 %v6212_v56, %v5660_v45  ;;  %v2320_v10 = vmul.f32 %v6215_v55, %v5660_v45  ;;  %v2695_v19 = vmax.f32 %v2631_v31, 0.0  ;;  %v2696_v61 = vmax.f32 %v2632_v38, 0.0  ;;  %v6369_v45 = vld [vmem:[#allocation60_spill] sm:$0xff]  ;;  %v6380_v31 = vld [vmem:[#allocation74_spill] sm:$0xff]  ;;  %v6381_v28 = vld [vmem:[#allocation75_spill] sm:$0xff] }
 0x353   : > { %v2039_v52 = vmul.f32 %v6366_v58, %v6365_v26  ;;  %v2681_v53 = vmax.f32 %v2617_v48, 0.0  ;;  %v2682_v15 = vmax.f32 %v2618_v47, 0.0  ;;  %2918 = vadd.xlane.f32.xlu1 %v2762_v2  ;;  %2904 = vadd.xlane.f32.xlu0 %v2755_v18  ;;  %v2109_v63 = vadd.f32 %v6367_v14, %v1835_v42  ;;  %v6382_v48 = vld [vmem:[#allocation73_spill] sm:$0xff] }
 0x354   : > { %v2635_v41 = vadd.f32 %v2565_v62, %v2379_v54  ;;  %v2636_v36 = vadd.f32 %v2565_v62, %v2380_v5  ;;  %v2764_v1 = vadd.f32 %v2696_v61, %v2695_v19  ;;  %v2110_v11 = vadd.f32 %v6368_v12, %v1836_v34  ;;  %v6385_v61 = vld [vmem:[#allocation70_spill] sm:$0xff]  ;;  %v6386_v62 = vld [vmem:[#allocation77_spill] sm:$0xff] }
 0x355   : > { %v2040_v13 = vmul.f32 %v6369_v45, %v6365_v26  ;;  %v2621_v40 = vadd.f32 %v2530_v16, %v6370_v37  ;;  %v2622_v0 = vadd.f32 %v2530_v16, %v6371_v8  ;;  %v2757_v6 = vadd.f32 %v2682_v15, %v2681_v53  ;;  %v2575_v49 = vpop.permute.xlu0 %2574  ;;  %v2540_v24 = vpop.permute.xlu1 %2539  ;;  %v6388_v37 = vld [vmem:[#allocation71_spill] sm:$0xff] }
 0x356   : > { %v2699_v27 = vmax.f32 %v2635_v41, 0.0  ;;  %v2700_v46 = vmax.f32 %v2636_v36, 0.0  ;;  %v2383_v43 = vadd.f32 %v2319_v44, %v2109_v63  ;;  %v2384_v35 = vadd.f32 %v2320_v10, %v2110_v11  ;;  %v6383_v44 = vld [vmem:[#allocation76_spill] sm:$0xff]  ;;  %v6384_v10 = vld [vmem:[#allocation78_spill] sm:$0xff] }
 0x357   : > { %v2685_v23 = vmax.f32 %v2621_v40, 0.0  ;;  %v2686_v30 = vmax.f32 %v2622_v0, 0.0  ;;  %2922 = vadd.xlane.f32.xlu1 %v2764_v1  ;;  %2908 = vadd.xlane.f32.xlu0 %v2757_v6  ;;  %v2369_v22 = vadd.f32 %v6373_v51, %v6372_v20  ;;  %v2370_v32 = vadd.f32 %v6375_v60, %v6374_v4 }
 0x358   : > { %v2639_v50 = vadd.f32 %v2575_v49, %v2383_v43  ;;  %v2640_v59 = vadd.f32 %v2575_v49, %v2384_v35  ;;  %v2766_v29 = vadd.f32 %v2700_v46, %v2699_v27  ;;  %v2373_v39 = vadd.f32 %v6377_v3, %v6376_v7 }
 0x359   : > { %v2625_v42 = vadd.f32 %v2540_v24, %v2369_v22  ;;  %v2626_v33 = vadd.f32 %v2540_v24, %v2370_v32  ;;  %v2759_v34 = vadd.f32 %v2686_v30, %v2685_v23  ;;  %v2374_v9 = vadd.f32 %v6379_v57, %v6378_v17  ;;  %v2550_v53 = vpop.permute.xlu1 %2549 }
 0x35a   : > { %v2103_v38 = vadd.f32 %v2039_v52, %v6380_v31  ;;  %v2104_v2 = vadd.f32 %v2040_v13, %v6381_v28  ;;  %v2703_v54 = vmax.f32 %v2639_v50, 0.0  ;;  %v2704_v25 = vmax.f32 %v2640_v59, 0.0 }
 0x35b   : > { %v2043_v21 = vmul.f32 %v6366_v58, %v6382_v48  ;;  %v2044_v47 = vmul.f32 %v6369_v45, %v6382_v48  ;;  %v2689_v5 = vmax.f32 %v2625_v42, 0.0  ;;  %v2690_v18 = vmax.f32 %v2626_v33, 0.0  ;;  %2926 = vadd.xlane.f32.xlu1 %v2766_v29  ;;  %2912 = vadd.xlane.f32.xlu0 %v2759_v34  ;;  %v6387_v58 = vld [vmem:[#allocation79_spill] sm:$0xff] }
 0x35c   : > { %v1833_v19 = vadd.f32 %v6384_v10, %v6383_v44  ;;  %v2313_v26 = vmul.f32 %v6212_v56, %v6385_v61  ;;  %v2314_v52 = vmul.f32 %v6215_v55, %v6385_v61  ;;  %v2768_v15 = vadd.f32 %v2704_v25, %v2703_v54 }
 0x35d   : > { %v1834_v14 = vadd.f32 %v6387_v58, %v6386_v62  ;;  %v2629_v63 = vadd.f32 %v2550_v53, %v2373_v39  ;;  %v2630_v41 = vadd.f32 %v2550_v53, %v2374_v9  ;;  %v2761_v36 = vadd.f32 %v2690_v18, %v2689_v5  ;;  %v2560_v8 = vpop.permute.xlu1 %2559 }
 0x35e   : > { %v2377_v16 = vadd.f32 %v2313_v26, %v2103_v38  ;;  %v2378_v1 = vadd.f32 %v2314_v52, %v2104_v2  ;;  %v2107_v12 = vadd.f32 %v2043_v21, %v1833_v19  ;;  %v2317_v40 = vmul.f32 %v6212_v56, %v6388_v37 }
 0x35f   : > { %v2108_v11 = vadd.f32 %v2044_v47, %v1834_v14  ;;  %v2693_v45 = vmax.f32 %v2629_v63, 0.0  ;;  %v2694_v13 = vmax.f32 %v2630_v41, 0.0  ;;  %2930 = vadd.xlane.f32.xlu1 %v2768_v15  ;;  %2916 = vadd.xlane.f32.xlu0 %v2761_v36  ;;  %v2318_v0 = vmul.f32 %v6215_v55, %v6388_v37 }
 0x360   : > { %v2633_v6 = vadd.f32 %v2560_v8, %v2377_v16  ;;  %v2634_v27 = vadd.f32 %v2560_v8, %v2378_v1  ;;  %v2381_v23 = vadd.f32 %v2317_v40, %v2107_v12 }
 0x361   : > { %v2763_v46 = vadd.f32 %v2694_v13, %v2693_v45  ;;  %v2382_v30 = vadd.f32 %v2318_v0, %v2108_v11  ;;  %v2570_v49 = vpop.permute.xlu1 %2569 }
 0x362   : > { %v2697_v43 = vmax.f32 %v2633_v6, 0.0  ;;  %v2698_v35 = vmax.f32 %v2634_v27, 0.0  ;;  %v2637_v20 = vadd.f32 %v2570_v49, %v2381_v23 }
 0x363   : > { %2920 = vadd.xlane.f32.xlu0 %v2763_v46  ;;  %v2638_v51 = vadd.f32 %v2570_v49, %v2382_v30 }
 0x364   : > { %v2765_v22 = vadd.f32 %v2698_v35, %v2697_v43  ;;  %v2701_v4 = vmax.f32 %v2637_v20, 0.0 }
 0x365   : > { %v2702_v60 = vmax.f32 %v2638_v51, 0.0 }
 0x367   : > { %2924 = vadd.xlane.f32.xlu0 %v2765_v22  ;;  %v2767_v56 = vadd.f32 %v2702_v60, %v2701_v4 }
 0x36b   : > { %2928 = vadd.xlane.f32.xlu0 %v2767_v56 }
 0x3b0   : > { %v2869_v55 = vpop.xlane.xlu1 %2868 }
 0x3b1   : > { %v2932_v32 = vmul.f32 0.00390625, %v2869_v55 }
 0x3b3   : > { %2965 = vst.msk [vmem:[%s5845_s11] sm:$0xff] %vm1221_vm0, %v2932_v32 }
 0x3b4   : > { %v2875_v50 = vpop.xlane.xlu1 %2874 }
 0x3b5   : > { %v2935_v59 = vmul.f32 0.00390625, %v2875_v50 }
 0x3b7   : > { %2968 = vst.msk [vmem:[%s5845_s11 + $0x18] sm:$0xff] %vm1221_vm0, %v2935_v59 }
 0x3b8   : > { %v2879_v24 = vpop.xlane.xlu1 %2878 }
 0x3b9   : > { %v2937_v29 = vmul.f32 0.00390625, %v2879_v24 }
 0x3bb   : > { %2970 = vst.msk [vmem:[%s5845_s11 + $0x28] sm:$0xff] %vm1221_vm0, %v2937_v29 }
 0x3bc   : > { %v2883_v7 = vpop.xlane.xlu1 %2882  ;;  %v2871_v3 = vpop.xlane.xlu0 %2870 }
 0x3bd   : > { %v2939_v39 = vmul.f32 0.00390625, %v2883_v7  ;;  %v2933_v42 = vmul.f32 0.00390625, %v2871_v3 }
 0x3bf   : > { %2972 = vst.msk [vmem:[%s5845_s11 + $0x38] sm:$0xff] %vm1221_vm0, %v2939_v39  ;;  %2966 = vst.msk [vmem:[%s5845_s11 + $0x8] sm:$0xff] %vm1221_vm0, %v2933_v42 }
 0x3c0   : > { %v2887_v33 = vpop.xlane.xlu1 %2886  ;;  %v2873_v34 = vpop.xlane.xlu0 %2872 }
 0x3c1   : > { %v2941_v17 = vmul.f32 0.00390625, %v2887_v33  ;;  %v2934_v57 = vmul.f32 0.00390625, %v2873_v34 }
 0x3c3   : > { %2974 = vst.msk [vmem:[%s5845_s11 + $0x48] sm:$0xff] %vm1221_vm0, %v2941_v17  ;;  %2967 = vst.msk [vmem:[%s5845_s11 + $0x10] sm:$0xff] %vm1221_vm0, %v2934_v57 }
 0x3c4   : > { %v2891_v9 = vpop.xlane.xlu1 %2890  ;;  %v2877_v31 = vpop.xlane.xlu0 %2876 }
 0x3c5   : > { %v2943_v38 = vmul.f32 0.00390625, %v2891_v9  ;;  %v2936_v28 = vmul.f32 0.00390625, %v2877_v31 }
 0x3c7   : > { %2976 = vst.msk [vmem:[%s5845_s11 + $0x58] sm:$0xff] %vm1221_vm0, %v2943_v38  ;;  %2969 = vst.msk [vmem:[%s5845_s11 + $0x20] sm:$0xff] %vm1221_vm0, %v2936_v28 }
 0x3c8   : > { %v2895_v2 = vpop.xlane.xlu1 %2894  ;;  %v2881_v54 = vpop.xlane.xlu0 %2880 }
 0x3c9   : > { %v2945_v25 = vmul.f32 0.00390625, %v2895_v2  ;;  %v2938_v48 = vmul.f32 0.00390625, %v2881_v54 }
 0x3cb   : > { %2978 = vst.msk [vmem:[%s5845_s11 + $0x68] sm:$0xff] %vm1221_vm0, %v2945_v25  ;;  %2971 = vst.msk [vmem:[%s5845_s11 + $0x30] sm:$0xff] %vm1221_vm0, %v2938_v48 }
 0x3cc   : > { %v2899_v21 = vpop.xlane.xlu1 %2898  ;;  %v2885_v47 = vpop.xlane.xlu0 %2884 }
 0x3cd   : > { %v2947_v5 = vmul.f32 0.00390625, %v2899_v21  ;;  %v2940_v18 = vmul.f32 0.00390625, %v2885_v47 }
 0x3cf   : > { %2980 = vst.msk [vmem:[%s5845_s11 + $0x78] sm:$0xff] %vm1221_vm0, %v2947_v5  ;;  %2973 = vst.msk [vmem:[%s5845_s11 + $0x40] sm:$0xff] %vm1221_vm0, %v2940_v18 }
 0x3d0   : > { %v2903_v44 = vpop.xlane.xlu1 %2902  ;;  %v2889_v10 = vpop.xlane.xlu0 %2888 }
 0x3d1   : > { %v2949_v19 = vmul.f32 0.00390625, %v2903_v44  ;;  %v2942_v61 = vmul.f32 0.00390625, %v2889_v10 }
 0x3d3   : > { %2982 = vst.msk [vmem:[%s5845_s11 + $0x88] sm:$0xff] %vm1221_vm0, %v2949_v19  ;;  %2975 = vst.msk [vmem:[%s5845_s11 + $0x50] sm:$0xff] %vm1221_vm0, %v2942_v61 }
 0x3d4   : > { %v2907_v26 = vpop.xlane.xlu1 %2906  ;;  %v2893_v52 = vpop.xlane.xlu0 %2892 }
 0x3d5   : > { %v2951_v53 = vmul.f32 0.00390625, %v2907_v26  ;;  %v2944_v15 = vmul.f32 0.00390625, %v2893_v52 }
 0x3d7   : > { %2984 = vst.msk [vmem:[%s5845_s11 + $0x98] sm:$0xff] %vm1221_vm0, %v2951_v53  ;;  %2977 = vst.msk [vmem:[%s5845_s11 + $0x60] sm:$0xff] %vm1221_vm0, %v2944_v15 }
 0x3d8   : > { %v2911_v62 = vpop.xlane.xlu1 %2910  ;;  %v2897_v58 = vpop.xlane.xlu0 %2896 }
 0x3d9   : > { %v2953_v14 = vmul.f32 0.00390625, %v2911_v62  ;;  %v2946_v63 = vmul.f32 0.00390625, %v2897_v58 }
 0x3db   : > { %2986 = vst.msk [vmem:[%s5845_s11 + $0xa8] sm:$0xff] %vm1221_vm0, %v2953_v14  ;;  %2979 = vst.msk [vmem:[%s5845_s11 + $0x70] sm:$0xff] %vm1221_vm0, %v2946_v63 }
 0x3dc   : > { %v2915_v41 = vpop.xlane.xlu1 %2914  ;;  %v2901_v36 = vpop.xlane.xlu0 %2900 }
 0x3dd   : > { %v2955_v16 = vmul.f32 0.00390625, %v2915_v41  ;;  %v2948_v1 = vmul.f32 0.00390625, %v2901_v36 }
 0x3df   : > { %2988 = vst.msk [vmem:[%s5845_s11 + $0xb8] sm:$0xff] %vm1221_vm0, %v2955_v16  ;;  %2981 = vst.msk [vmem:[%s5845_s11 + $0x80] sm:$0xff] %vm1221_vm0, %v2948_v1 }
 0x3e0   : > { %v2919_v12 = vpop.xlane.xlu1 %2918  ;;  %v2905_v11 = vpop.xlane.xlu0 %2904 }
 0x3e1   : > { %v2957_v45 = vmul.f32 0.00390625, %v2919_v12  ;;  %v2950_v13 = vmul.f32 0.00390625, %v2905_v11 }
 0x3e3   : > { %2990 = vst.msk [vmem:[%s5845_s11 + $0xc8] sm:$0xff] %vm1221_vm0, %v2957_v45  ;;  %2983 = vst.msk [vmem:[%s5845_s11 + $0x90] sm:$0xff] %vm1221_vm0, %v2950_v13 }
 0x3e4   : > { %v2923_v37 = vpop.xlane.xlu1 %2922  ;;  %v2909_v40 = vpop.xlane.xlu0 %2908 }
 0x3e5   : > { %v2959_v8 = vmul.f32 0.00390625, %v2923_v37  ;;  %v2952_v0 = vmul.f32 0.00390625, %v2909_v40 }
 0x3e7   : > { %2992 = vst.msk [vmem:[%s5845_s11 + $0xd8] sm:$0xff] %vm1221_vm0, %v2959_v8  ;;  %2985 = vst.msk [vmem:[%s5845_s11 + $0xa0] sm:$0xff] %vm1221_vm0, %v2952_v0 }
 0x3e8   : > { %v2927_v6 = vpop.xlane.xlu1 %2926  ;;  %v2913_v27 = vpop.xlane.xlu0 %2912 }
 0x3e9   : > { %v2961_v46 = vmul.f32 0.00390625, %v2927_v6  ;;  %v2954_v43 = vmul.f32 0.00390625, %v2913_v27 }
 0x3eb   : > { %2994 = vst.msk [vmem:[%s5845_s11 + $0xe8] sm:$0xff] %vm1221_vm0, %v2961_v46  ;;  %2987 = vst.msk [vmem:[%s5845_s11 + $0xb0] sm:$0xff] %vm1221_vm0, %v2954_v43 }
 0x3ec   : > { %v2931_v35 = vpop.xlane.xlu1 %2930  ;;  %v2917_v23 = vpop.xlane.xlu0 %2916 }
 0x3ed   : > { %v2963_v30 = vmul.f32 0.00390625, %v2931_v35  ;;  %v2956_v49 = vmul.f32 0.00390625, %v2917_v23 }
 0x3ef   : > { %2996 = vst.msk [vmem:[%s5845_s11 + $0xf8] sm:$0xff] %vm1221_vm0, %v2963_v30  ;;  %2989 = vst.msk [vmem:[%s5845_s11 + $0xc0] sm:$0xff] %vm1221_vm0, %v2956_v49 }
 0x3f0   : > { %v2921_v20 = vpop.xlane.xlu0 %2920 }
 0x3f1   : > { %v2958_v51 = vmul.f32 0.00390625, %v2921_v20 }
 0x3f3   : > { %2991 = vst.msk [vmem:[%s5845_s11 + $0xd0] sm:$0xff] %vm1221_vm0, %v2958_v51 }
 0x3f4   : > { %v2925_v22 = vpop.xlane.xlu0 %2924 }
 0x3f5   : > { %v2960_v4 = vmul.f32 0.00390625, %v2925_v22 }
 0x3f7   : > { %2993 = vst.msk [vmem:[%s5845_s11 + $0xe0] sm:$0xff] %vm1221_vm0, %v2960_v4 }
 0x3f8   : > { %v2929_v60 = vpop.xlane.xlu0 %2928 }
 0x3f9   : > { %v2962_v56 = vmul.f32 0.00390625, %v2929_v60 }
 0x3fb   : > { %2995 = vst.msk [vmem:[%s5845_s11 + $0xf0] sm:$0xff] %vm1221_vm0, %v2962_v56 }
 0x3fc PF: > { %s15_s20 = sadd.s32 1, %s3299_s20   ;;  %s6389_s18 = smov %s3295_s19 }
 0x3fd   : > { %p12_p5 = scmp.ge.s32.totalorder %s15_s20, 4   ;;  %s6390_s19 = smov %s6392_s21 }
 0x3ff   :  { %14 = sbr.rel (!%p12_p5) target bundleno = 2 (0x2), region = 81 }

</bundles_post_ra>
